<compile_context>
chip_gen: v7x
topology: tpu7x:2x2x1
jax: 0.10.0
libtpu: 0.0.40
codegen_flags: <defaults>
</compile_context>

<pallas_src>
import math
import jax
import jax.numpy as jnp
from jax.experimental import pallas as pl
from jax.experimental.pallas import tpu as pltpu

# ---- module hyperparameters (small, consistent with the reference module) ----
VOCAB = 100
VOCAB_PAD = 128            # padded at pack time -> K=128-aligned first matmul
D_MODEL = 32
NHEAD = 4
HEAD_DIM = D_MODEL // NHEAD
NUM_LAYERS = 2
DIM_FF = 64
SEQ = 8
EPS = 1e-5                 # nn.LayerNorm default

# ---- kernel tiling ----
BATCH_TILE = 8                    # sequences per grid step (>=8-sublane output)
ROWS_TILE = BATCH_TILE * SEQ      # 64 activation rows per grid step

# parity / perf flags (flip for bit-closer PyTorch parity testing)
STABLE_SOFTMAX = False     # row-max subtraction (mathematically identical here)
APPROX_RECIPROCAL = True   # EUP vrcp for softmax denominator (~1e-3 rel err)

# ---- packed per-layer weight-slab row offsets (lane width 96 = 3*D_MODEL) ----
SLAB_LANES = 3 * D_MODEL     # 96
R_QKV = 0                    # Wqkv^T (32, 96)  q rows pre-scaled by 1/sqrt(hd)
R_WO = R_QKV + D_MODEL       # Wo^T   (32, 96)  valid lanes 0:32
R_W1 = R_WO + D_MODEL        # W1^T   (32, 96)  valid lanes 0:64
R_W2 = R_W1 + D_MODEL        # W2^T   (64, 96)  valid lanes 0:32
R_VEC = R_W2 + DIM_FF        # 8 bias / LayerNorm vector rows
SLAB_ROWS = R_VEC + 8        # 168


# ---------------------------------------------------------------------------
# Fused Pallas kernel: embedding -> pos-enc -> 2 x encoder layer -> mean pool
# (one grid step = BATCH_TILE full sequences)
# ---------------------------------------------------------------------------
def fused_encoder_kernel(ids_ref, emb_pe_ref, w_ref, o_ref, ctx_ref):
    # ---- embedding lookup as a one-hot MXU matmul (K = 128 aligned) ----
    # (out-of-range ids yield a zero embedding instead of raising like torch)
    ids = ids_ref[...]                                            # (64, 1) i32
    onehot = (ids == jax.lax.broadcasted_iota(
        jnp.int32, (ROWS_TILE, VOCAB_PAD), 1)).astype(jnp.float32)
    x = jnp.dot(onehot, emb_pe_ref[0:VOCAB_PAD, :],
                preferred_element_type=jnp.float32)               # (64, 32)
    x = x + emb_pe_ref[VOCAB_PAD:VOCAB_PAD + ROWS_TILE, :]        # + pos-enc

    # TODO(synk): src_key_padding_mask (additive -inf) not wired; the
    # reference forward is exercised with src_mask=None.
    for li in range(NUM_LAYERS):          # static unroll (NUM_LAYERS == 2)
        # pre-transposed weights -> every projection is a plain x @ W
        wqkvT = w_ref[li, R_QKV:R_QKV + D_MODEL, :]               # (32, 96)
        woT = w_ref[li, R_WO:R_WO + D_MODEL, 0:D_MODEL]           # (32, 32)
        w1T = w_ref[li, R_W1:R_W1 + D_MODEL, 0:DIM_FF]            # (32, 64)
        w2T = w_ref[li, R_W2:R_W2 + DIM_FF, 0:D_MODEL]            # (64, 32)
        bqkv = w_ref[li, R_VEC + 0:R_VEC + 1, :]                  # (1, 96)
        bo = w_ref[li, R_VEC + 1:R_VEC + 2, 0:D_MODEL]
        g1 = w_ref[li, R_VEC + 2:R_VEC + 3, 0:D_MODEL]
        be1 = w_ref[li, R_VEC + 3:R_VEC + 4, 0:D_MODEL]
        b1 = w_ref[li, R_VEC + 4:R_VEC + 5, 0:DIM_FF]
        b2 = w_ref[li, R_VEC + 5:R_VEC + 6, 0:D_MODEL]
        g2 = w_ref[li, R_VEC + 6:R_VEC + 7, 0:D_MODEL]
        be2 = w_ref[li, R_VEC + 7:R_VEC + 8, 0:D_MODEL]

        # ---- self attention: one row-collapsed QKV projection ----
        qkv = jnp.dot(x, wqkvT, preferred_element_type=jnp.float32) + bqkv
        qkv = qkv.reshape(BATCH_TILE, SEQ, 3 * D_MODEL)

        for h in range(NHEAD):            # unrolled; heads are independent
            lo = h * HEAD_DIM
            hi = lo + HEAD_DIM
            q = qkv[:, :, lo:hi]                                  # pre-scaled q
            k = qkv[:, :, D_MODEL + lo:D_MODEL + hi]
            v = qkv[:, :, 2 * D_MODEL + lo:2 * D_MODEL + hi]
            s = jnp.einsum('bqd,bkd->bqk', q, k,
                           preferred_element_type=jnp.float32)
            if STABLE_SOFTMAX:
                s = s - jnp.max(s, axis=-1, keepdims=True)
            p = jnp.exp(s)
            den = jnp.sum(p, axis=-1, keepdims=True)
            if APPROX_RECIPROCAL:
                p = p * pl.reciprocal(den, approx=True)
            else:
                p = p / den
            # write the head context straight into its lane slice (no concat)
            ctx_ref[:, :, lo:hi] = jnp.einsum(
                'bqk,bkd->bqd', p, v, preferred_element_type=jnp.float32)

        # single out-projection over the concatenated heads
        ctx = ctx_ref[...].reshape(ROWS_TILE, D_MODEL)
        attn = jnp.dot(ctx, woT, preferred_element_type=jnp.float32) + bo

        # ---- residual + LayerNorm 1 (post-norm; one-pass variance) ----
        y = x + attn
        mu = jnp.mean(y, axis=-1, keepdims=True)
        var = jnp.mean(y * y, axis=-1, keepdims=True) - mu * mu
        y = (y - mu) * jax.lax.rsqrt(var + EPS) * g1 + be1

        # ---- feed forward: relu(y @ W1^T + b1) @ W2^T + b2 ----
        hdn = jnp.maximum(
            jnp.dot(y, w1T, preferred_element_type=jnp.float32) + b1, 0.0)
        ff = jnp.dot(hdn, w2T, preferred_element_type=jnp.float32) + b2

        # ---- residual + LayerNorm 2 (one-pass variance) ----
        z = y + ff
        mu2 = jnp.mean(z, axis=-1, keepdims=True)
        var2 = jnp.mean(z * z, axis=-1, keepdims=True) - mu2 * mu2
        x = (z - mu2) * jax.lax.rsqrt(var2 + EPS) * g2 + be2

    # ---- pooled = encoded.mean(dim=1): (8, 8, 32) -> (8, 32) block store ----
    o_ref[...] = jnp.mean(x.reshape(BATCH_TILE, SEQ, D_MODEL), axis=1)


# ---------------------------------------------------------------------------
# Wrapper
# ---------------------------------------------------------------------------
@jax.jit
def transformer_text_encoder(src_ids, packed):
    b, s = src_ids.shape
    # pos-enc rows and pooling grouping are baked for SEQ / BATCH_TILE; fail
    # loudly instead of silently applying the wrong encoding (review note).
    if s != SEQ:
        raise ValueError(f"seq len must be {SEQ}, got {s}")
    if b % BATCH_TILE != 0:
        raise ValueError(f"batch must be a multiple of {BATCH_TILE}, got {b}")

    ids = src_ids.reshape(b * s, 1).astype(jnp.int32)
    return pl.pallas_call(
        fused_encoder_kernel,
        out_shape=jax.ShapeDtypeStruct((b, D_MODEL), jnp.float32),
        grid_spec=pltpu.PrefetchScalarGridSpec(
            num_scalar_prefetch=0,
            grid=(b // BATCH_TILE,),
            in_specs=[
                # per-step token ids (64 rows)
                pl.BlockSpec((ROWS_TILE, 1), lambda i: (i, 0)),
                # padded embedding + tiled pos-enc: constant -> VMEM-resident
                pl.BlockSpec((VOCAB_PAD + ROWS_TILE, D_MODEL),
                             lambda i: (0, 0)),
                # per-layer weight/bias/LN slab: constant -> VMEM-resident
                pl.BlockSpec((NUM_LAYERS, SLAB_ROWS, SLAB_LANES),
                             lambda i: (0, 0, 0)),
            ],
            out_specs=pl.BlockSpec((BATCH_TILE, D_MODEL), lambda i: (i, 0)),
            scratch_shapes=[
                pltpu.VMEM((BATCH_TILE, SEQ, D_MODEL), jnp.float32)],
        ),
        compiler_params=pltpu.CompilerParams(
            dimension_semantics=("parallel",)),
    )(ids, packed['emb_pe'], packed['w_slab'])


# ---------------------------------------------------------------------------
# Parameter construction (PyTorch layout) + packing into kernel slabs
# ---------------------------------------------------------------------------
def positional_encoding(seq_len, d_model):
    pos = jnp.arange(seq_len, dtype=jnp.float32)[:, None]
    div = jnp.exp(jnp.arange(0, d_model, 2, dtype=jnp.float32)
                  * (-math.log(10000.0) / d_model))
    pe = jnp.zeros((seq_len, d_model), dtype=jnp.float32)
    pe = pe.at[:, 0::2].set(jnp.sin(pos * div))
    pe = pe.at[:, 1::2].set(jnp.cos(pos * div))
    return pe


def init_params(key):
    """Raw parameters in PyTorch (out, in) / 1-D bias layout."""
    ks = jax.random.split(key, 1 + NUM_LAYERS)
    params = {
        'embedding': 0.02 * jax.random.normal(ks[0], (VOCAB, D_MODEL),
                                              dtype=jnp.float32),
        'layers': [],
    }
    for li in range(NUM_LAYERS):
        lk = jax.random.split(ks[1 + li], 4)
        params['layers'].append({
            'wqkv': 0.05 * jax.random.normal(lk[0], (3 * D_MODEL, D_MODEL),
                                             dtype=jnp.float32),
            'bqkv': jnp.zeros((3 * D_MODEL,), jnp.float32),
            'wo': 0.05 * jax.random.normal(lk[1], (D_MODEL, D_MODEL),
                                           dtype=jnp.float32),
            'bo': jnp.zeros((D_MODEL,), jnp.float32),
            'ln1_g': jnp.ones((D_MODEL,), jnp.float32),
            'ln1_b': jnp.zeros((D_MODEL,), jnp.float32),
            'w1': 0.05 * jax.random.normal(lk[2], (DIM_FF, D_MODEL),
                                           dtype=jnp.float32),
            'b1': jnp.zeros((DIM_FF,), jnp.float32),
            'w2': 0.05 * jax.random.normal(lk[3], (D_MODEL, DIM_FF),
                                           dtype=jnp.float32),
            'b2': jnp.zeros((D_MODEL,), jnp.float32),
            'ln2_g': jnp.ones((D_MODEL,), jnp.float32),
            'ln2_b': jnp.zeros((D_MODEL,), jnp.float32),
        })
    return params


def pack_params(raw):
    """Pre-transpose weights, pad vocab, fold 1/sqrt(hd) into q, build slabs."""
    scale = 1.0 / math.sqrt(HEAD_DIM)

    def pad_lanes(m):
        return jnp.pad(m, ((0, 0), (0, SLAB_LANES - m.shape[1])))

    def vec_row(v):
        return jnp.pad(v, (0, SLAB_LANES - v.shape[0]))[None, :]

    layers = []
    for layer in raw['layers']:
        wqkv = layer['wqkv'].at[:D_MODEL].multiply(scale)   # q rows pre-scaled
        bqkv = layer['bqkv'].at[:D_MODEL].multiply(scale)
        slab = jnp.concatenate([
            wqkv.T,                           # (32, 96)  x @ -> qkv
            pad_lanes(layer['wo'].T),         # (32, 96)  valid 0:32
            pad_lanes(layer['w1'].T),         # (32, 96)  valid 0:64
            pad_lanes(layer['w2'].T),         # (64, 96)  valid 0:32
            vec_row(bqkv), vec_row(layer['bo']),
            vec_row(layer['ln1_g']), vec_row(layer['ln1_b']),
            vec_row(layer['b1']), vec_row(layer['b2']),
            vec_row(layer['ln2_g']), vec_row(layer['ln2_b']),
        ], axis=0)                            # (168, 96)
        layers.append(slab)

    emb_pad = jnp.pad(raw['embedding'],
                      ((0, VOCAB_PAD - VOCAB), (0, 0)))      # (128, 32)
    pe_rows = jnp.tile(positional_encoding(SEQ, D_MODEL),
                       (BATCH_TILE, 1))                      # (64, 32)
    return {
        'emb_pe': jnp.concatenate([emb_pad, pe_rows], axis=0),  # (192, 32)
        'w_slab': jnp.stack(layers, axis=0),                    # (L, 168, 96)
    }


# ---------------------------------------------------------------------------
# Pure-JAX reference (PyTorch semantics) for a loose-tolerance sanity check
# ---------------------------------------------------------------------------
def _layer_norm_ref(x, g, b):
    mu = x.mean(-1, keepdims=True)
    var = ((x - mu) ** 2).mean(-1, keepdims=True)
    return (x - mu) * jax.lax.rsqrt(var + EPS) * g + b


def reference_forward(src_ids, raw):
    x = raw['embedding'][src_ids] + positional_encoding(SEQ, D_MODEL)[None]
    scale = 1.0 / math.sqrt(HEAD_DIM)
    b, s, d = x.shape
    for layer in raw['layers']:
        qkv = x @ layer['wqkv'].T + layer['bqkv']
        q, k, v = jnp.split(qkv, 3, axis=-1)
        q = q.reshape(b, s, NHEAD, HEAD_DIM).transpose(0, 2, 1, 3)
        k = k.reshape(b, s, NHEAD, HEAD_DIM).transpose(0, 2, 1, 3)
        v = v.reshape(b, s, NHEAD, HEAD_DIM).transpose(0, 2, 1, 3)
        sdot = jnp.einsum('bhqd,bhkd->bhqk', q, k) * scale
        p = jax.nn.softmax(sdot, axis=-1)
        ctx = jnp.einsum('bhqk,bhkd->bhqd', p, v)
        ctx = ctx.transpose(0, 2, 1, 3).reshape(b, s, d)
        y = _layer_norm_ref(x + ctx @ layer['wo'].T + layer['bo'],
                            layer['ln1_g'], layer['ln1_b'])
        h = jax.nn.relu(y @ layer['w1'].T + layer['b1'])
        x = _layer_norm_ref(y + h @ layer['w2'].T + layer['b2'],
                            layer['ln2_g'], layer['ln2_b'])
    return x.mean(axis=1)


if __name__ == "__main__":
    key = jax.random.PRNGKey(0)
    pk, ik = jax.random.split(key)
    raw_params = init_params(pk)
    packed = pack_params(raw_params)

    BATCH = 16                      # 2 grid steps of BATCH_TILE=8 sequences
    src_ids = jax.random.randint(ik, (BATCH, SEQ), 0, VOCAB, dtype=jnp.int32)

    pooled = transformer_text_encoder(src_ids, packed)
    jax.block_until_ready(pooled)
    assert pooled.shape == (BATCH, D_MODEL) and pooled.dtype == jnp.float32

    ref = reference_forward(src_ids, raw_params)
    max_err = float(jnp.max(jnp.abs(pooled - ref)))
    assert max_err < 1e-2, f"max abs err vs reference too large: {max_err}"

    print("KERNEL_OK")
</pallas_src>

<mosaic_0001>
module attributes {stable_mosaic.version = 11 : i64} {
  func.func @fused_encoder_kernel(%arg0: i32, %arg1: memref<64x1xi32, #tpu.memory_space<vmem>>, %arg2: memref<192x32xf32, #tpu.memory_space<vmem>>, %arg3: memref<2x168x96xf32, #tpu.memory_space<vmem>>, %arg4: memref<8x32xf32, #tpu.memory_space<vmem>>, %arg5: memref<8x8x32xf32, #tpu.memory_space<vmem>>) attributes {dimension_semantics = [#tpu.dimension_semantics<parallel>], iteration_bounds = array<i64: 2>, scalar_prefetch = 0 : i64, scratch_operands = 1 : i64, tpu.core_type = #tpu.core_type<tc>, window_params = [{transform_indices = @transform_0, window_bounds = array<i64: 64, 1>}, {pipeline_mode = #tpu.pipeline_mode<synchronous>, transform_indices = @transform_1, window_bounds = array<i64: 192, 32>}, {pipeline_mode = #tpu.pipeline_mode<synchronous>, transform_indices = @transform_2, window_bounds = array<i64: 2, 168, 96>}, {transform_indices = @transform_3, window_bounds = array<i64: 8, 32>}]} {
    %c0 = arith.constant 0 : index
    %c0_0 = arith.constant 0 : index
    %0 = vector.load %arg1[%c0, %c0_0] : memref<64x1xi32, #tpu.memory_space<vmem>>, vector<64x1xi32>
    %1 = tpu.iota {dimensions = array<i32: 1>} : vector<64x128xi32>
    %2 = vector.broadcast %0 : vector<64x1xi32> to vector<64x128xi32>
    %3 = arith.cmpi eq, %2, %1 : vector<64x128xi32>
    %4 = arith.extui %3 : vector<64x128xi1> to vector<64x128xi32>
    %5 = arith.sitofp %4 : vector<64x128xi32> to vector<64x128xf32>
    %c0_1 = arith.constant 0 : index
    %c0_2 = arith.constant 0 : index
    %6 = vector.load %arg2[%c0_1, %c0_2] : memref<192x32xf32, #tpu.memory_space<vmem>>, vector<128x32xf32>
    %cst = arith.constant dense<0.000000e+00> : vector<64x32xf32>
    %7 = tpu.matmul %5, %6, %cst {dimension_numbers = #tpu.dot_dimension_numbers<[1], [0], [0], [1], [0, 0, 1, 1], [], []>} : vector<64x128xf32>, vector<128x32xf32>, vector<64x32xf32> -> vector<64x32xf32>
    %c128 = arith.constant 128 : index
    %c0_3 = arith.constant 0 : index
    %8 = vector.load %arg2[%c128, %c0_3] : memref<192x32xf32, #tpu.memory_space<vmem>>, vector<64x32xf32>
    %9 = arith.addf %7, %8 : vector<64x32xf32>
    %c0_4 = arith.constant 0 : index
    %c0_5 = arith.constant 0 : index
    %c0_6 = arith.constant 0 : index
    %10 = vector.load %arg3[%c0_4, %c0_5, %c0_6] : memref<2x168x96xf32, #tpu.memory_space<vmem>>, vector<1x32x96xf32>
    %11 = vector.shape_cast %10 : vector<1x32x96xf32> to vector<32x96xf32>
    %c0_7 = arith.constant 0 : index
    %c32 = arith.constant 32 : index
    %c0_8 = arith.constant 0 : index
    %12 = vector.load %arg3[%c0_7, %c32, %c0_8] : memref<2x168x96xf32, #tpu.memory_space<vmem>>, vector<1x32x32xf32>
    %13 = vector.shape_cast %12 : vector<1x32x32xf32> to vector<32x32xf32>
    %c0_9 = arith.constant 0 : index
    %c64 = arith.constant 64 : index
    %c0_10 = arith.constant 0 : index
    %14 = vector.load %arg3[%c0_9, %c64, %c0_10] : memref<2x168x96xf32, #tpu.memory_space<vmem>>, vector<1x32x64xf32>
    %15 = vector.shape_cast %14 : vector<1x32x64xf32> to vector<32x64xf32>
    %c0_11 = arith.constant 0 : index
    %c96 = arith.constant 96 : index
    %c0_12 = arith.constant 0 : index
    %16 = vector.load %arg3[%c0_11, %c96, %c0_12] : memref<2x168x96xf32, #tpu.memory_space<vmem>>, vector<1x64x32xf32>
    %17 = vector.shape_cast %16 : vector<1x64x32xf32> to vector<64x32xf32>
    %c0_13 = arith.constant 0 : index
    %c160 = arith.constant 160 : index
    %c0_14 = arith.constant 0 : index
    %18 = vector.load %arg3[%c0_13, %c160, %c0_14] : memref<2x168x96xf32, #tpu.memory_space<vmem>>, vector<1x1x96xf32>
    %19 = vector.shape_cast %18 : vector<1x1x96xf32> to vector<1x96xf32>
    %c0_15 = arith.constant 0 : index
    %c161 = arith.constant 161 : index
    %c0_16 = arith.constant 0 : index
    %20 = vector.load %arg3[%c0_15, %c161, %c0_16] : memref<2x168x96xf32, #tpu.memory_space<vmem>>, vector<1x1x32xf32>
    %21 = vector.shape_cast %20 : vector<1x1x32xf32> to vector<1x32xf32>
    %c0_17 = arith.constant 0 : index
    %c162 = arith.constant 162 : index
    %c0_18 = arith.constant 0 : index
    %22 = vector.load %arg3[%c0_17, %c162, %c0_18] : memref<2x168x96xf32, #tpu.memory_space<vmem>>, vector<1x1x32xf32>
    %23 = vector.shape_cast %22 : vector<1x1x32xf32> to vector<1x32xf32>
    %c0_19 = arith.constant 0 : index
    %c163 = arith.constant 163 : index
    %c0_20 = arith.constant 0 : index
    %24 = vector.load %arg3[%c0_19, %c163, %c0_20] : memref<2x168x96xf32, #tpu.memory_space<vmem>>, vector<1x1x32xf32>
    %25 = vector.shape_cast %24 : vector<1x1x32xf32> to vector<1x32xf32>
    %c0_21 = arith.constant 0 : index
    %c164 = arith.constant 164 : index
    %c0_22 = arith.constant 0 : index
    %26 = vector.load %arg3[%c0_21, %c164, %c0_22] : memref<2x168x96xf32, #tpu.memory_space<vmem>>, vector<1x1x64xf32>
    %27 = vector.shape_cast %26 : vector<1x1x64xf32> to vector<1x64xf32>
    %c0_23 = arith.constant 0 : index
    %c165 = arith.constant 165 : index
    %c0_24 = arith.constant 0 : index
    %28 = vector.load %arg3[%c0_23, %c165, %c0_24] : memref<2x168x96xf32, #tpu.memory_space<vmem>>, vector<1x1x32xf32>
    %29 = vector.shape_cast %28 : vector<1x1x32xf32> to vector<1x32xf32>
    %c0_25 = arith.constant 0 : index
    %c166 = arith.constant 166 : index
    %c0_26 = arith.constant 0 : index
    %30 = vector.load %arg3[%c0_25, %c166, %c0_26] : memref<2x168x96xf32, #tpu.memory_space<vmem>>, vector<1x1x32xf32>
    %31 = vector.shape_cast %30 : vector<1x1x32xf32> to vector<1x32xf32>
    %c0_27 = arith.constant 0 : index
    %c167 = arith.constant 167 : index
    %c0_28 = arith.constant 0 : index
    %32 = vector.load %arg3[%c0_27, %c167, %c0_28] : memref<2x168x96xf32, #tpu.memory_space<vmem>>, vector<1x1x32xf32>
    %33 = vector.shape_cast %32 : vector<1x1x32xf32> to vector<1x32xf32>
    %cst_29 = arith.constant dense<0.000000e+00> : vector<64x96xf32>
    %34 = tpu.matmul %9, %11, %cst_29 {dimension_numbers = #tpu.dot_dimension_numbers<[1], [0], [0], [1], [0, 0, 1, 1], [], []>} : vector<64x32xf32>, vector<32x96xf32>, vector<64x96xf32> -> vector<64x96xf32>
    %35 = vector.broadcast %19 : vector<1x96xf32> to vector<64x96xf32>
    %36 = arith.addf %34, %35 : vector<64x96xf32>
    %37 = vector.shape_cast %36 : vector<64x96xf32> to vector<8x8x96xf32>
    %38 = vector.extract_strided_slice %37 {offsets = [0, 0, 0], sizes = [8, 8, 8], strides = [1, 1, 1]} : vector<8x8x96xf32> to vector<8x8x8xf32>
    %39 = vector.extract_strided_slice %37 {offsets = [0, 0, 32], sizes = [8, 8, 8], strides = [1, 1, 1]} : vector<8x8x96xf32> to vector<8x8x8xf32>
    %40 = vector.extract_strided_slice %37 {offsets = [0, 0, 64], sizes = [8, 8, 8], strides = [1, 1, 1]} : vector<8x8x96xf32> to vector<8x8x8xf32>
    "tpu.trace_start"() <{level = 10 : i32, message = "bqd,bkd->bqk"}> : () -> ()
    %cst_30 = arith.constant dense<0.000000e+00> : vector<8x8x8xf32>
    %41 = tpu.matmul %38, %39, %cst_30 {dimension_numbers = #tpu.dot_dimension_numbers<[2], [2], [1], [1], [0, 0, 0, 1, 1, 1], [0], [0]>} : vector<8x8x8xf32>, vector<8x8x8xf32>, vector<8x8x8xf32> -> vector<8x8x8xf32>
    "tpu.trace_stop"() : () -> ()
    %42 = math.exp %41 : vector<8x8x8xf32>
    %cst_31 = arith.constant dense<0.000000e+00> : vector<8x8xf32>
    %43 = vector.multi_reduction <add>, %42, %cst_31 [2] : vector<8x8x8xf32> to vector<8x8xf32>
    %44 = vector.shape_cast %43 : vector<8x8xf32> to vector<8x8x1xf32>
    %45 = tpu.reciprocal %44 {approx = true} : vector<8x8x1xf32> -> vector<8x8x1xf32>
    %46 = vector.broadcast %45 : vector<8x8x1xf32> to vector<8x8x8xf32>
    %47 = arith.mulf %42, %46 : vector<8x8x8xf32>
    "tpu.trace_start"() <{level = 10 : i32, message = "bqk,bkd->bqd"}> : () -> ()
    %cst_32 = arith.constant dense<0.000000e+00> : vector<8x8x8xf32>
    %48 = tpu.matmul %47, %40, %cst_32 {dimension_numbers = #tpu.dot_dimension_numbers<[2], [1], [1], [2], [0, 0, 0, 1, 1, 2], [0], [0]>} : vector<8x8x8xf32>, vector<8x8x8xf32>, vector<8x8x8xf32> -> vector<8x8x8xf32>
    "tpu.trace_stop"() : () -> ()
    %c0_33 = arith.constant 0 : index
    %c0_34 = arith.constant 0 : index
    %c0_35 = arith.constant 0 : index
    %49 = vector.load %arg5[%c0_33, %c0_34, %c0_35] : memref<8x8x32xf32, #tpu.memory_space<vmem>>, vector<8x8x8xf32>
    tpu.vector_store %arg5[%c0_33, %c0_34, %c0_35], %48 {strides = array<i32>} : memref<8x8x32xf32, #tpu.memory_space<vmem>>, vector<8x8x8xf32>,
    %50 = vector.extract_strided_slice %37 {offsets = [0, 0, 8], sizes = [8, 8, 8], strides = [1, 1, 1]} : vector<8x8x96xf32> to vector<8x8x8xf32>
    %51 = vector.extract_strided_slice %37 {offsets = [0, 0, 40], sizes = [8, 8, 8], strides = [1, 1, 1]} : vector<8x8x96xf32> to vector<8x8x8xf32>
    %52 = vector.extract_strided_slice %37 {offsets = [0, 0, 72], sizes = [8, 8, 8], strides = [1, 1, 1]} : vector<8x8x96xf32> to vector<8x8x8xf32>
    "tpu.trace_start"() <{level = 10 : i32, message = "bqd,bkd->bqk"}> : () -> ()
    %cst_36 = arith.constant dense<0.000000e+00> : vector<8x8x8xf32>
    %53 = tpu.matmul %50, %51, %cst_36 {dimension_numbers = #tpu.dot_dimension_numbers<[2], [2], [1], [1], [0, 0, 0, 1, 1, 1], [0], [0]>} : vector<8x8x8xf32>, vector<8x8x8xf32>, vector<8x8x8xf32> -> vector<8x8x8xf32>
    "tpu.trace_stop"() : () -> ()
    %54 = math.exp %53 : vector<8x8x8xf32>
    %cst_37 = arith.constant dense<0.000000e+00> : vector<8x8xf32>
    %55 = vector.multi_reduction <add>, %54, %cst_37 [2] : vector<8x8x8xf32> to vector<8x8xf32>
    %56 = vector.shape_cast %55 : vector<8x8xf32> to vector<8x8x1xf32>
    %57 = tpu.reciprocal %56 {approx = true} : vector<8x8x1xf32> -> vector<8x8x1xf32>
    %58 = vector.broadcast %57 : vector<8x8x1xf32> to vector<8x8x8xf32>
    %59 = arith.mulf %54, %58 : vector<8x8x8xf32>
    "tpu.trace_start"() <{level = 10 : i32, message = "bqk,bkd->bqd"}> : () -> ()
    %cst_38 = arith.constant dense<0.000000e+00> : vector<8x8x8xf32>
    %60 = tpu.matmul %59, %52, %cst_38 {dimension_numbers = #tpu.dot_dimension_numbers<[2], [1], [1], [2], [0, 0, 0, 1, 1, 2], [0], [0]>} : vector<8x8x8xf32>, vector<8x8x8xf32>, vector<8x8x8xf32> -> vector<8x8x8xf32>
    "tpu.trace_stop"() : () -> ()
    %c0_39 = arith.constant 0 : index
    %c0_40 = arith.constant 0 : index
    %c8 = arith.constant 8 : index
    %61 = vector.load %arg5[%c0_39, %c0_40, %c8] : memref<8x8x32xf32, #tpu.memory_space<vmem>>, vector<8x8x8xf32>
    tpu.vector_store %arg5[%c0_39, %c0_40, %c8], %60 {strides = array<i32>} : memref<8x8x32xf32, #tpu.memory_space<vmem>>, vector<8x8x8xf32>,
    %62 = vector.extract_strided_slice %37 {offsets = [0, 0, 16], sizes = [8, 8, 8], strides = [1, 1, 1]} : vector<8x8x96xf32> to vector<8x8x8xf32>
    %63 = vector.extract_strided_slice %37 {offsets = [0, 0, 48], sizes = [8, 8, 8], strides = [1, 1, 1]} : vector<8x8x96xf32> to vector<8x8x8xf32>
    %64 = vector.extract_strided_slice %37 {offsets = [0, 0, 80], sizes = [8, 8, 8], strides = [1, 1, 1]} : vector<8x8x96xf32> to vector<8x8x8xf32>
    "tpu.trace_start"() <{level = 10 : i32, message = "bqd,bkd->bqk"}> : () -> ()
    %cst_41 = arith.constant dense<0.000000e+00> : vector<8x8x8xf32>
    %65 = tpu.matmul %62, %63, %cst_41 {dimension_numbers = #tpu.dot_dimension_numbers<[2], [2], [1], [1], [0, 0, 0, 1, 1, 1], [0], [0]>} : vector<8x8x8xf32>, vector<8x8x8xf32>, vector<8x8x8xf32> -> vector<8x8x8xf32>
    "tpu.trace_stop"() : () -> ()
    %66 = math.exp %65 : vector<8x8x8xf32>
    %cst_42 = arith.constant dense<0.000000e+00> : vector<8x8xf32>
    %67 = vector.multi_reduction <add>, %66, %cst_42 [2] : vector<8x8x8xf32> to vector<8x8xf32>
    %68 = vector.shape_cast %67 : vector<8x8xf32> to vector<8x8x1xf32>
    %69 = tpu.reciprocal %68 {approx = true} : vector<8x8x1xf32> -> vector<8x8x1xf32>
    %70 = vector.broadcast %69 : vector<8x8x1xf32> to vector<8x8x8xf32>
    %71 = arith.mulf %66, %70 : vector<8x8x8xf32>
    "tpu.trace_start"() <{level = 10 : i32, message = "bqk,bkd->bqd"}> : () -> ()
    %cst_43 = arith.constant dense<0.000000e+00> : vector<8x8x8xf32>
    %72 = tpu.matmul %71, %64, %cst_43 {dimension_numbers = #tpu.dot_dimension_numbers<[2], [1], [1], [2], [0, 0, 0, 1, 1, 2], [0], [0]>} : vector<8x8x8xf32>, vector<8x8x8xf32>, vector<8x8x8xf32> -> vector<8x8x8xf32>
    "tpu.trace_stop"() : () -> ()
    %c0_44 = arith.constant 0 : index
    %c0_45 = arith.constant 0 : index
    %c16 = arith.constant 16 : index
    %73 = vector.load %arg5[%c0_44, %c0_45, %c16] : memref<8x8x32xf32, #tpu.memory_space<vmem>>, vector<8x8x8xf32>
    tpu.vector_store %arg5[%c0_44, %c0_45, %c16], %72 {strides = array<i32>} : memref<8x8x32xf32, #tpu.memory_space<vmem>>, vector<8x8x8xf32>,
    %74 = vector.extract_strided_slice %37 {offsets = [0, 0, 24], sizes = [8, 8, 8], strides = [1, 1, 1]} : vector<8x8x96xf32> to vector<8x8x8xf32>
    %75 = vector.extract_strided_slice %37 {offsets = [0, 0, 56], sizes = [8, 8, 8], strides = [1, 1, 1]} : vector<8x8x96xf32> to vector<8x8x8xf32>
    %76 = vector.extract_strided_slice %37 {offsets = [0, 0, 88], sizes = [8, 8, 8], strides = [1, 1, 1]} : vector<8x8x96xf32> to vector<8x8x8xf32>
    "tpu.trace_start"() <{level = 10 : i32, message = "bqd,bkd->bqk"}> : () -> ()
    %cst_46 = arith.constant dense<0.000000e+00> : vector<8x8x8xf32>
    %77 = tpu.matmul %74, %75, %cst_46 {dimension_numbers = #tpu.dot_dimension_numbers<[2], [2], [1], [1], [0, 0, 0, 1, 1, 1], [0], [0]>} : vector<8x8x8xf32>, vector<8x8x8xf32>, vector<8x8x8xf32> -> vector<8x8x8xf32>
    "tpu.trace_stop"() : () -> ()
    %78 = math.exp %77 : vector<8x8x8xf32>
    %cst_47 = arith.constant dense<0.000000e+00> : vector<8x8xf32>
    %79 = vector.multi_reduction <add>, %78, %cst_47 [2] : vector<8x8x8xf32> to vector<8x8xf32>
    %80 = vector.shape_cast %79 : vector<8x8xf32> to vector<8x8x1xf32>
    %81 = tpu.reciprocal %80 {approx = true} : vector<8x8x1xf32> -> vector<8x8x1xf32>
    %82 = vector.broadcast %81 : vector<8x8x1xf32> to vector<8x8x8xf32>
    %83 = arith.mulf %78, %82 : vector<8x8x8xf32>
    "tpu.trace_start"() <{level = 10 : i32, message = "bqk,bkd->bqd"}> : () -> ()
    %cst_48 = arith.constant dense<0.000000e+00> : vector<8x8x8xf32>
    %84 = tpu.matmul %83, %76, %cst_48 {dimension_numbers = #tpu.dot_dimension_numbers<[2], [1], [1], [2], [0, 0, 0, 1, 1, 2], [0], [0]>} : vector<8x8x8xf32>, vector<8x8x8xf32>, vector<8x8x8xf32> -> vector<8x8x8xf32>
    "tpu.trace_stop"() : () -> ()
    %c0_49 = arith.constant 0 : index
    %c0_50 = arith.constant 0 : index
    %c24 = arith.constant 24 : index
    %85 = vector.load %arg5[%c0_49, %c0_50, %c24] : memref<8x8x32xf32, #tpu.memory_space<vmem>>, vector<8x8x8xf32>
    tpu.vector_store %arg5[%c0_49, %c0_50, %c24], %84 {strides = array<i32>} : memref<8x8x32xf32, #tpu.memory_space<vmem>>, vector<8x8x8xf32>,
    %c0_51 = arith.constant 0 : index
    %c0_52 = arith.constant 0 : index
    %c0_53 = arith.constant 0 : index
    %86 = vector.load %arg5[%c0_51, %c0_52, %c0_53] : memref<8x8x32xf32, #tpu.memory_space<vmem>>, vector<8x8x32xf32>
    %87 = vector.shape_cast %86 : vector<8x8x32xf32> to vector<64x32xf32>
    %cst_54 = arith.constant dense<0.000000e+00> : vector<64x32xf32>
    %88 = tpu.matmul %87, %13, %cst_54 {dimension_numbers = #tpu.dot_dimension_numbers<[1], [0], [0], [1], [0, 0, 1, 1], [], []>} : vector<64x32xf32>, vector<32x32xf32>, vector<64x32xf32> -> vector<64x32xf32>
    %89 = vector.broadcast %21 : vector<1x32xf32> to vector<64x32xf32>
    %90 = arith.addf %88, %89 : vector<64x32xf32>
    %91 = arith.addf %9, %90 : vector<64x32xf32>
    %cst_55 = arith.constant dense<0.000000e+00> : vector<64xf32>
    %92 = vector.multi_reduction <add>, %91, %cst_55 [1] : vector<64x32xf32> to vector<64xf32>
    %93 = vector.shape_cast %92 : vector<64xf32> to vector<64x1xf32>
    %cst_56 = arith.constant 3.200000e+01 : f32
    %94 = vector.broadcast %cst_56 : f32 to vector<64x1xf32>
    %95 = arith.divf %93, %94 : vector<64x1xf32>
    %96 = arith.mulf %91, %91 : vector<64x32xf32>
    %cst_57 = arith.constant dense<0.000000e+00> : vector<64xf32>
    %97 = vector.multi_reduction <add>, %96, %cst_57 [1] : vector<64x32xf32> to vector<64xf32>
    %98 = vector.shape_cast %97 : vector<64xf32> to vector<64x1xf32>
    %cst_58 = arith.constant 3.200000e+01 : f32
    %99 = vector.broadcast %cst_58 : f32 to vector<64x1xf32>
    %100 = arith.divf %98, %99 : vector<64x1xf32>
    %101 = arith.mulf %95, %95 : vector<64x1xf32>
    %102 = arith.subf %100, %101 : vector<64x1xf32>
    %103 = vector.broadcast %95 : vector<64x1xf32> to vector<64x32xf32>
    %104 = arith.subf %91, %103 : vector<64x32xf32>
    %cst_59 = arith.constant 9.99999974E-6 : f32
    %105 = vector.broadcast %cst_59 : f32 to vector<64x1xf32>
    %106 = arith.addf %102, %105 : vector<64x1xf32>
    %107 = math.rsqrt %106 : vector<64x1xf32>
    %108 = vector.broadcast %107 : vector<64x1xf32> to vector<64x32xf32>
    %109 = arith.mulf %104, %108 : vector<64x32xf32>
    %110 = vector.broadcast %23 : vector<1x32xf32> to vector<64x32xf32>
    %111 = arith.mulf %109, %110 : vector<64x32xf32>
    %112 = vector.broadcast %25 : vector<1x32xf32> to vector<64x32xf32>
    %113 = arith.addf %111, %112 : vector<64x32xf32>
    %cst_60 = arith.constant dense<0.000000e+00> : vector<64x64xf32>
    %114 = tpu.matmul %113, %15, %cst_60 {dimension_numbers = #tpu.dot_dimension_numbers<[1], [0], [0], [1], [0, 0, 1, 1], [], []>} : vector<64x32xf32>, vector<32x64xf32>, vector<64x64xf32> -> vector<64x64xf32>
    %115 = vector.broadcast %27 : vector<1x64xf32> to vector<64x64xf32>
    %116 = arith.addf %114, %115 : vector<64x64xf32>
    %cst_61 = arith.constant 0.000000e+00 : f32
    %117 = vector.broadcast %cst_61 : f32 to vector<64x64xf32>
    %118 = arith.maximumf %116, %117 : vector<64x64xf32>
    %cst_62 = arith.constant dense<0.000000e+00> : vector<64x32xf32>
    %119 = tpu.matmul %118, %17, %cst_62 {dimension_numbers = #tpu.dot_dimension_numbers<[1], [0], [0], [1], [0, 0, 1, 1], [], []>} : vector<64x64xf32>, vector<64x32xf32>, vector<64x32xf32> -> vector<64x32xf32>
    %120 = vector.broadcast %29 : vector<1x32xf32> to vector<64x32xf32>
    %121 = arith.addf %119, %120 : vector<64x32xf32>
    %122 = arith.addf %113, %121 : vector<64x32xf32>
    %cst_63 = arith.constant dense<0.000000e+00> : vector<64xf32>
    %123 = vector.multi_reduction <add>, %122, %cst_63 [1] : vector<64x32xf32> to vector<64xf32>
    %124 = vector.shape_cast %123 : vector<64xf32> to vector<64x1xf32>
    %cst_64 = arith.constant 3.200000e+01 : f32
    %125 = vector.broadcast %cst_64 : f32 to vector<64x1xf32>
    %126 = arith.divf %124, %125 : vector<64x1xf32>
    %127 = arith.mulf %122, %122 : vector<64x32xf32>
    %cst_65 = arith.constant dense<0.000000e+00> : vector<64xf32>
    %128 = vector.multi_reduction <add>, %127, %cst_65 [1] : vector<64x32xf32> to vector<64xf32>
    %129 = vector.shape_cast %128 : vector<64xf32> to vector<64x1xf32>
    %cst_66 = arith.constant 3.200000e+01 : f32
    %130 = vector.broadcast %cst_66 : f32 to vector<64x1xf32>
    %131 = arith.divf %129, %130 : vector<64x1xf32>
    %132 = arith.mulf %126, %126 : vector<64x1xf32>
    %133 = arith.subf %131, %132 : vector<64x1xf32>
    %134 = vector.broadcast %126 : vector<64x1xf32> to vector<64x32xf32>
    %135 = arith.subf %122, %134 : vector<64x32xf32>
    %cst_67 = arith.constant 9.99999974E-6 : f32
    %136 = vector.broadcast %cst_67 : f32 to vector<64x1xf32>
    %137 = arith.addf %133, %136 : vector<64x1xf32>
    %138 = math.rsqrt %137 : vector<64x1xf32>
    %139 = vector.broadcast %138 : vector<64x1xf32> to vector<64x32xf32>
    %140 = arith.mulf %135, %139 : vector<64x32xf32>
    %141 = vector.broadcast %31 : vector<1x32xf32> to vector<64x32xf32>
    %142 = arith.mulf %140, %141 : vector<64x32xf32>
    %143 = vector.broadcast %33 : vector<1x32xf32> to vector<64x32xf32>
    %144 = arith.addf %142, %143 : vector<64x32xf32>
    %c1 = arith.constant 1 : index
    %c0_68 = arith.constant 0 : index
    %c0_69 = arith.constant 0 : index
    %145 = vector.load %arg3[%c1, %c0_68, %c0_69] : memref<2x168x96xf32, #tpu.memory_space<vmem>>, vector<1x32x96xf32>
    %146 = vector.shape_cast %145 : vector<1x32x96xf32> to vector<32x96xf32>
    %c1_70 = arith.constant 1 : index
    %c32_71 = arith.constant 32 : index
    %c0_72 = arith.constant 0 : index
    %147 = vector.load %arg3[%c1_70, %c32_71, %c0_72] : memref<2x168x96xf32, #tpu.memory_space<vmem>>, vector<1x32x32xf32>
    %148 = vector.shape_cast %147 : vector<1x32x32xf32> to vector<32x32xf32>
    %c1_73 = arith.constant 1 : index
    %c64_74 = arith.constant 64 : index
    %c0_75 = arith.constant 0 : index
    %149 = vector.load %arg3[%c1_73, %c64_74, %c0_75] : memref<2x168x96xf32, #tpu.memory_space<vmem>>, vector<1x32x64xf32>
    %150 = vector.shape_cast %149 : vector<1x32x64xf32> to vector<32x64xf32>
    %c1_76 = arith.constant 1 : index
    %c96_77 = arith.constant 96 : index
    %c0_78 = arith.constant 0 : index
    %151 = vector.load %arg3[%c1_76, %c96_77, %c0_78] : memref<2x168x96xf32, #tpu.memory_space<vmem>>, vector<1x64x32xf32>
    %152 = vector.shape_cast %151 : vector<1x64x32xf32> to vector<64x32xf32>
    %c1_79 = arith.constant 1 : index
    %c160_80 = arith.constant 160 : index
    %c0_81 = arith.constant 0 : index
    %153 = vector.load %arg3[%c1_79, %c160_80, %c0_81] : memref<2x168x96xf32, #tpu.memory_space<vmem>>, vector<1x1x96xf32>
    %154 = vector.shape_cast %153 : vector<1x1x96xf32> to vector<1x96xf32>
    %c1_82 = arith.constant 1 : index
    %c161_83 = arith.constant 161 : index
    %c0_84 = arith.constant 0 : index
    %155 = vector.load %arg3[%c1_82, %c161_83, %c0_84] : memref<2x168x96xf32, #tpu.memory_space<vmem>>, vector<1x1x32xf32>
    %156 = vector.shape_cast %155 : vector<1x1x32xf32> to vector<1x32xf32>
    %c1_85 = arith.constant 1 : index
    %c162_86 = arith.constant 162 : index
    %c0_87 = arith.constant 0 : index
    %157 = vector.load %arg3[%c1_85, %c162_86, %c0_87] : memref<2x168x96xf32, #tpu.memory_space<vmem>>, vector<1x1x32xf32>
    %158 = vector.shape_cast %157 : vector<1x1x32xf32> to vector<1x32xf32>
    %c1_88 = arith.constant 1 : index
    %c163_89 = arith.constant 163 : index
    %c0_90 = arith.constant 0 : index
    %159 = vector.load %arg3[%c1_88, %c163_89, %c0_90] : memref<2x168x96xf32, #tpu.memory_space<vmem>>, vector<1x1x32xf32>
    %160 = vector.shape_cast %159 : vector<1x1x32xf32> to vector<1x32xf32>
    %c1_91 = arith.constant 1 : index
    %c164_92 = arith.constant 164 : index
    %c0_93 = arith.constant 0 : index
    %161 = vector.load %arg3[%c1_91, %c164_92, %c0_93] : memref<2x168x96xf32, #tpu.memory_space<vmem>>, vector<1x1x64xf32>
    %162 = vector.shape_cast %161 : vector<1x1x64xf32> to vector<1x64xf32>
    %c1_94 = arith.constant 1 : index
    %c165_95 = arith.constant 165 : index
    %c0_96 = arith.constant 0 : index
    %163 = vector.load %arg3[%c1_94, %c165_95, %c0_96] : memref<2x168x96xf32, #tpu.memory_space<vmem>>, vector<1x1x32xf32>
    %164 = vector.shape_cast %163 : vector<1x1x32xf32> to vector<1x32xf32>
    %c1_97 = arith.constant 1 : index
    %c166_98 = arith.constant 166 : index
    %c0_99 = arith.constant 0 : index
    %165 = vector.load %arg3[%c1_97, %c166_98, %c0_99] : memref<2x168x96xf32, #tpu.memory_space<vmem>>, vector<1x1x32xf32>
    %166 = vector.shape_cast %165 : vector<1x1x32xf32> to vector<1x32xf32>
    %c1_100 = arith.constant 1 : index
    %c167_101 = arith.constant 167 : index
    %c0_102 = arith.constant 0 : index
    %167 = vector.load %arg3[%c1_100, %c167_101, %c0_102] : memref<2x168x96xf32, #tpu.memory_space<vmem>>, vector<1x1x32xf32>
    %168 = vector.shape_cast %167 : vector<1x1x32xf32> to vector<1x32xf32>
    %cst_103 = arith.constant dense<0.000000e+00> : vector<64x96xf32>
    %169 = tpu.matmul %144, %146, %cst_103 {dimension_numbers = #tpu.dot_dimension_numbers<[1], [0], [0], [1], [0, 0, 1, 1], [], []>} : vector<64x32xf32>, vector<32x96xf32>, vector<64x96xf32> -> vector<64x96xf32>
    %170 = vector.broadcast %154 : vector<1x96xf32> to vector<64x96xf32>
    %171 = arith.addf %169, %170 : vector<64x96xf32>
    %172 = vector.shape_cast %171 : vector<64x96xf32> to vector<8x8x96xf32>
    %173 = vector.extract_strided_slice %172 {offsets = [0, 0, 0], sizes = [8, 8, 8], strides = [1, 1, 1]} : vector<8x8x96xf32> to vector<8x8x8xf32>
    %174 = vector.extract_strided_slice %172 {offsets = [0, 0, 32], sizes = [8, 8, 8], strides = [1, 1, 1]} : vector<8x8x96xf32> to vector<8x8x8xf32>
    %175 = vector.extract_strided_slice %172 {offsets = [0, 0, 64], sizes = [8, 8, 8], strides = [1, 1, 1]} : vector<8x8x96xf32> to vector<8x8x8xf32>
    "tpu.trace_start"() <{level = 10 : i32, message = "bqd,bkd->bqk"}> : () -> ()
    %cst_104 = arith.constant dense<0.000000e+00> : vector<8x8x8xf32>
    %176 = tpu.matmul %173, %174, %cst_104 {dimension_numbers = #tpu.dot_dimension_numbers<[2], [2], [1], [1], [0, 0, 0, 1, 1, 1], [0], [0]>} : vector<8x8x8xf32>, vector<8x8x8xf32>, vector<8x8x8xf32> -> vector<8x8x8xf32>
    "tpu.trace_stop"() : () -> ()
    %177 = math.exp %176 : vector<8x8x8xf32>
    %cst_105 = arith.constant dense<0.000000e+00> : vector<8x8xf32>
    %178 = vector.multi_reduction <add>, %177, %cst_105 [2] : vector<8x8x8xf32> to vector<8x8xf32>
    %179 = vector.shape_cast %178 : vector<8x8xf32> to vector<8x8x1xf32>
    %180 = tpu.reciprocal %179 {approx = true} : vector<8x8x1xf32> -> vector<8x8x1xf32>
    %181 = vector.broadcast %180 : vector<8x8x1xf32> to vector<8x8x8xf32>
    %182 = arith.mulf %177, %181 : vector<8x8x8xf32>
    "tpu.trace_start"() <{level = 10 : i32, message = "bqk,bkd->bqd"}> : () -> ()
    %cst_106 = arith.constant dense<0.000000e+00> : vector<8x8x8xf32>
    %183 = tpu.matmul %182, %175, %cst_106 {dimension_numbers = #tpu.dot_dimension_numbers<[2], [1], [1], [2], [0, 0, 0, 1, 1, 2], [0], [0]>} : vector<8x8x8xf32>, vector<8x8x8xf32>, vector<8x8x8xf32> -> vector<8x8x8xf32>
    "tpu.trace_stop"() : () -> ()
    %c0_107 = arith.constant 0 : index
    %c0_108 = arith.constant 0 : index
    %c0_109 = arith.constant 0 : index
    %184 = vector.load %arg5[%c0_107, %c0_108, %c0_109] : memref<8x8x32xf32, #tpu.memory_space<vmem>>, vector<8x8x8xf32>
    tpu.vector_store %arg5[%c0_107, %c0_108, %c0_109], %183 {strides = array<i32>} : memref<8x8x32xf32, #tpu.memory_space<vmem>>, vector<8x8x8xf32>,
    %185 = vector.extract_strided_slice %172 {offsets = [0, 0, 8], sizes = [8, 8, 8], strides = [1, 1, 1]} : vector<8x8x96xf32> to vector<8x8x8xf32>
    %186 = vector.extract_strided_slice %172 {offsets = [0, 0, 40], sizes = [8, 8, 8], strides = [1, 1, 1]} : vector<8x8x96xf32> to vector<8x8x8xf32>
    %187 = vector.extract_strided_slice %172 {offsets = [0, 0, 72], sizes = [8, 8, 8], strides = [1, 1, 1]} : vector<8x8x96xf32> to vector<8x8x8xf32>
    "tpu.trace_start"() <{level = 10 : i32, message = "bqd,bkd->bqk"}> : () -> ()
    %cst_110 = arith.constant dense<0.000000e+00> : vector<8x8x8xf32>
    %188 = tpu.matmul %185, %186, %cst_110 {dimension_numbers = #tpu.dot_dimension_numbers<[2], [2], [1], [1], [0, 0, 0, 1, 1, 1], [0], [0]>} : vector<8x8x8xf32>, vector<8x8x8xf32>, vector<8x8x8xf32> -> vector<8x8x8xf32>
    "tpu.trace_stop"() : () -> ()
    %189 = math.exp %188 : vector<8x8x8xf32>
    %cst_111 = arith.constant dense<0.000000e+00> : vector<8x8xf32>
    %190 = vector.multi_reduction <add>, %189, %cst_111 [2] : vector<8x8x8xf32> to vector<8x8xf32>
    %191 = vector.shape_cast %190 : vector<8x8xf32> to vector<8x8x1xf32>
    %192 = tpu.reciprocal %191 {approx = true} : vector<8x8x1xf32> -> vector<8x8x1xf32>
    %193 = vector.broadcast %192 : vector<8x8x1xf32> to vector<8x8x8xf32>
    %194 = arith.mulf %189, %193 : vector<8x8x8xf32>
    "tpu.trace_start"() <{level = 10 : i32, message = "bqk,bkd->bqd"}> : () -> ()
    %cst_112 = arith.constant dense<0.000000e+00> : vector<8x8x8xf32>
    %195 = tpu.matmul %194, %187, %cst_112 {dimension_numbers = #tpu.dot_dimension_numbers<[2], [1], [1], [2], [0, 0, 0, 1, 1, 2], [0], [0]>} : vector<8x8x8xf32>, vector<8x8x8xf32>, vector<8x8x8xf32> -> vector<8x8x8xf32>
    "tpu.trace_stop"() : () -> ()
    %c0_113 = arith.constant 0 : index
    %c0_114 = arith.constant 0 : index
    %c8_115 = arith.constant 8 : index
    %196 = vector.load %arg5[%c0_113, %c0_114, %c8_115] : memref<8x8x32xf32, #tpu.memory_space<vmem>>, vector<8x8x8xf32>
    tpu.vector_store %arg5[%c0_113, %c0_114, %c8_115], %195 {strides = array<i32>} : memref<8x8x32xf32, #tpu.memory_space<vmem>>, vector<8x8x8xf32>,
    %197 = vector.extract_strided_slice %172 {offsets = [0, 0, 16], sizes = [8, 8, 8], strides = [1, 1, 1]} : vector<8x8x96xf32> to vector<8x8x8xf32>
    %198 = vector.extract_strided_slice %172 {offsets = [0, 0, 48], sizes = [8, 8, 8], strides = [1, 1, 1]} : vector<8x8x96xf32> to vector<8x8x8xf32>
    %199 = vector.extract_strided_slice %172 {offsets = [0, 0, 80], sizes = [8, 8, 8], strides = [1, 1, 1]} : vector<8x8x96xf32> to vector<8x8x8xf32>
    "tpu.trace_start"() <{level = 10 : i32, message = "bqd,bkd->bqk"}> : () -> ()
    %cst_116 = arith.constant dense<0.000000e+00> : vector<8x8x8xf32>
    %200 = tpu.matmul %197, %198, %cst_116 {dimension_numbers = #tpu.dot_dimension_numbers<[2], [2], [1], [1], [0, 0, 0, 1, 1, 1], [0], [0]>} : vector<8x8x8xf32>, vector<8x8x8xf32>, vector<8x8x8xf32> -> vector<8x8x8xf32>
    "tpu.trace_stop"() : () -> ()
    %201 = math.exp %200 : vector<8x8x8xf32>
    %cst_117 = arith.constant dense<0.000000e+00> : vector<8x8xf32>
    %202 = vector.multi_reduction <add>, %201, %cst_117 [2] : vector<8x8x8xf32> to vector<8x8xf32>
    %203 = vector.shape_cast %202 : vector<8x8xf32> to vector<8x8x1xf32>
    %204 = tpu.reciprocal %203 {approx = true} : vector<8x8x1xf32> -> vector<8x8x1xf32>
    %205 = vector.broadcast %204 : vector<8x8x1xf32> to vector<8x8x8xf32>
    %206 = arith.mulf %201, %205 : vector<8x8x8xf32>
    "tpu.trace_start"() <{level = 10 : i32, message = "bqk,bkd->bqd"}> : () -> ()
    %cst_118 = arith.constant dense<0.000000e+00> : vector<8x8x8xf32>
    %207 = tpu.matmul %206, %199, %cst_118 {dimension_numbers = #tpu.dot_dimension_numbers<[2], [1], [1], [2], [0, 0, 0, 1, 1, 2], [0], [0]>} : vector<8x8x8xf32>, vector<8x8x8xf32>, vector<8x8x8xf32> -> vector<8x8x8xf32>
    "tpu.trace_stop"() : () -> ()
    %c0_119 = arith.constant 0 : index
    %c0_120 = arith.constant 0 : index
    %c16_121 = arith.constant 16 : index
    %208 = vector.load %arg5[%c0_119, %c0_120, %c16_121] : memref<8x8x32xf32, #tpu.memory_space<vmem>>, vector<8x8x8xf32>
    tpu.vector_store %arg5[%c0_119, %c0_120, %c16_121], %207 {strides = array<i32>} : memref<8x8x32xf32, #tpu.memory_space<vmem>>, vector<8x8x8xf32>,
    %209 = vector.extract_strided_slice %172 {offsets = [0, 0, 24], sizes = [8, 8, 8], strides = [1, 1, 1]} : vector<8x8x96xf32> to vector<8x8x8xf32>
    %210 = vector.extract_strided_slice %172 {offsets = [0, 0, 56], sizes = [8, 8, 8], strides = [1, 1, 1]} : vector<8x8x96xf32> to vector<8x8x8xf32>
    %211 = vector.extract_strided_slice %172 {offsets = [0, 0, 88], sizes = [8, 8, 8], strides = [1, 1, 1]} : vector<8x8x96xf32> to vector<8x8x8xf32>
    "tpu.trace_start"() <{level = 10 : i32, message = "bqd,bkd->bqk"}> : () -> ()
    %cst_122 = arith.constant dense<0.000000e+00> : vector<8x8x8xf32>
    %212 = tpu.matmul %209, %210, %cst_122 {dimension_numbers = #tpu.dot_dimension_numbers<[2], [2], [1], [1], [0, 0, 0, 1, 1, 1], [0], [0]>} : vector<8x8x8xf32>, vector<8x8x8xf32>, vector<8x8x8xf32> -> vector<8x8x8xf32>
    "tpu.trace_stop"() : () -> ()
    %213 = math.exp %212 : vector<8x8x8xf32>
    %cst_123 = arith.constant dense<0.000000e+00> : vector<8x8xf32>
    %214 = vector.multi_reduction <add>, %213, %cst_123 [2] : vector<8x8x8xf32> to vector<8x8xf32>
    %215 = vector.shape_cast %214 : vector<8x8xf32> to vector<8x8x1xf32>
    %216 = tpu.reciprocal %215 {approx = true} : vector<8x8x1xf32> -> vector<8x8x1xf32>
    %217 = vector.broadcast %216 : vector<8x8x1xf32> to vector<8x8x8xf32>
    %218 = arith.mulf %213, %217 : vector<8x8x8xf32>
    "tpu.trace_start"() <{level = 10 : i32, message = "bqk,bkd->bqd"}> : () -> ()
    %cst_124 = arith.constant dense<0.000000e+00> : vector<8x8x8xf32>
    %219 = tpu.matmul %218, %211, %cst_124 {dimension_numbers = #tpu.dot_dimension_numbers<[2], [1], [1], [2], [0, 0, 0, 1, 1, 2], [0], [0]>} : vector<8x8x8xf32>, vector<8x8x8xf32>, vector<8x8x8xf32> -> vector<8x8x8xf32>
    "tpu.trace_stop"() : () -> ()
    %c0_125 = arith.constant 0 : index
    %c0_126 = arith.constant 0 : index
    %c24_127 = arith.constant 24 : index
    %220 = vector.load %arg5[%c0_125, %c0_126, %c24_127] : memref<8x8x32xf32, #tpu.memory_space<vmem>>, vector<8x8x8xf32>
    tpu.vector_store %arg5[%c0_125, %c0_126, %c24_127], %219 {strides = array<i32>} : memref<8x8x32xf32, #tpu.memory_space<vmem>>, vector<8x8x8xf32>,
    %c0_128 = arith.constant 0 : index
    %c0_129 = arith.constant 0 : index
    %c0_130 = arith.constant 0 : index
    %221 = vector.load %arg5[%c0_128, %c0_129, %c0_130] : memref<8x8x32xf32, #tpu.memory_space<vmem>>, vector<8x8x32xf32>
    %222 = vector.shape_cast %221 : vector<8x8x32xf32> to vector<64x32xf32>
    %cst_131 = arith.constant dense<0.000000e+00> : vector<64x32xf32>
    %223 = tpu.matmul %222, %148, %cst_131 {dimension_numbers = #tpu.dot_dimension_numbers<[1], [0], [0], [1], [0, 0, 1, 1], [], []>} : vector<64x32xf32>, vector<32x32xf32>, vector<64x32xf32> -> vector<64x32xf32>
    %224 = vector.broadcast %156 : vector<1x32xf32> to vector<64x32xf32>
    %225 = arith.addf %223, %224 : vector<64x32xf32>
    %226 = arith.addf %144, %225 : vector<64x32xf32>
    %cst_132 = arith.constant dense<0.000000e+00> : vector<64xf32>
    %227 = vector.multi_reduction <add>, %226, %cst_132 [1] : vector<64x32xf32> to vector<64xf32>
    %228 = vector.shape_cast %227 : vector<64xf32> to vector<64x1xf32>
    %cst_133 = arith.constant 3.200000e+01 : f32
    %229 = vector.broadcast %cst_133 : f32 to vector<64x1xf32>
    %230 = arith.divf %228, %229 : vector<64x1xf32>
    %231 = arith.mulf %226, %226 : vector<64x32xf32>
    %cst_134 = arith.constant dense<0.000000e+00> : vector<64xf32>
    %232 = vector.multi_reduction <add>, %231, %cst_134 [1] : vector<64x32xf32> to vector<64xf32>
    %233 = vector.shape_cast %232 : vector<64xf32> to vector<64x1xf32>
    %cst_135 = arith.constant 3.200000e+01 : f32
    %234 = vector.broadcast %cst_135 : f32 to vector<64x1xf32>
    %235 = arith.divf %233, %234 : vector<64x1xf32>
    %236 = arith.mulf %230, %230 : vector<64x1xf32>
    %237 = arith.subf %235, %236 : vector<64x1xf32>
    %238 = vector.broadcast %230 : vector<64x1xf32> to vector<64x32xf32>
    %239 = arith.subf %226, %238 : vector<64x32xf32>
    %cst_136 = arith.constant 9.99999974E-6 : f32
    %240 = vector.broadcast %cst_136 : f32 to vector<64x1xf32>
    %241 = arith.addf %237, %240 : vector<64x1xf32>
    %242 = math.rsqrt %241 : vector<64x1xf32>
    %243 = vector.broadcast %242 : vector<64x1xf32> to vector<64x32xf32>
    %244 = arith.mulf %239, %243 : vector<64x32xf32>
    %245 = vector.broadcast %158 : vector<1x32xf32> to vector<64x32xf32>
    %246 = arith.mulf %244, %245 : vector<64x32xf32>
    %247 = vector.broadcast %160 : vector<1x32xf32> to vector<64x32xf32>
    %248 = arith.addf %246, %247 : vector<64x32xf32>
    %cst_137 = arith.constant dense<0.000000e+00> : vector<64x64xf32>
    %249 = tpu.matmul %248, %150, %cst_137 {dimension_numbers = #tpu.dot_dimension_numbers<[1], [0], [0], [1], [0, 0, 1, 1], [], []>} : vector<64x32xf32>, vector<32x64xf32>, vector<64x64xf32> -> vector<64x64xf32>
    %250 = vector.broadcast %162 : vector<1x64xf32> to vector<64x64xf32>
    %251 = arith.addf %249, %250 : vector<64x64xf32>
    %cst_138 = arith.constant 0.000000e+00 : f32
    %252 = vector.broadcast %cst_138 : f32 to vector<64x64xf32>
    %253 = arith.maximumf %251, %252 : vector<64x64xf32>
    %cst_139 = arith.constant dense<0.000000e+00> : vector<64x32xf32>
    %254 = tpu.matmul %253, %152, %cst_139 {dimension_numbers = #tpu.dot_dimension_numbers<[1], [0], [0], [1], [0, 0, 1, 1], [], []>} : vector<64x64xf32>, vector<64x32xf32>, vector<64x32xf32> -> vector<64x32xf32>
    %255 = vector.broadcast %164 : vector<1x32xf32> to vector<64x32xf32>
    %256 = arith.addf %254, %255 : vector<64x32xf32>
    %257 = arith.addf %248, %256 : vector<64x32xf32>
    %cst_140 = arith.constant dense<0.000000e+00> : vector<64xf32>
    %258 = vector.multi_reduction <add>, %257, %cst_140 [1] : vector<64x32xf32> to vector<64xf32>
    %259 = vector.shape_cast %258 : vector<64xf32> to vector<64x1xf32>
    %cst_141 = arith.constant 3.200000e+01 : f32
    %260 = vector.broadcast %cst_141 : f32 to vector<64x1xf32>
    %261 = arith.divf %259, %260 : vector<64x1xf32>
    %262 = arith.mulf %257, %257 : vector<64x32xf32>
    %cst_142 = arith.constant dense<0.000000e+00> : vector<64xf32>
    %263 = vector.multi_reduction <add>, %262, %cst_142 [1] : vector<64x32xf32> to vector<64xf32>
    %264 = vector.shape_cast %263 : vector<64xf32> to vector<64x1xf32>
    %cst_143 = arith.constant 3.200000e+01 : f32
    %265 = vector.broadcast %cst_143 : f32 to vector<64x1xf32>
    %266 = arith.divf %264, %265 : vector<64x1xf32>
    %267 = arith.mulf %261, %261 : vector<64x1xf32>
    %268 = arith.subf %266, %267 : vector<64x1xf32>
    %269 = vector.broadcast %261 : vector<64x1xf32> to vector<64x32xf32>
    %270 = arith.subf %257, %269 : vector<64x32xf32>
    %cst_144 = arith.constant 9.99999974E-6 : f32
    %271 = vector.broadcast %cst_144 : f32 to vector<64x1xf32>
    %272 = arith.addf %268, %271 : vector<64x1xf32>
    %273 = math.rsqrt %272 : vector<64x1xf32>
    %274 = vector.broadcast %273 : vector<64x1xf32> to vector<64x32xf32>
    %275 = arith.mulf %270, %274 : vector<64x32xf32>
    %276 = vector.broadcast %166 : vector<1x32xf32> to vector<64x32xf32>
    %277 = arith.mulf %275, %276 : vector<64x32xf32>
    %278 = vector.broadcast %168 : vector<1x32xf32> to vector<64x32xf32>
    %279 = arith.addf %277, %278 : vector<64x32xf32>
    %280 = vector.shape_cast %279 : vector<64x32xf32> to vector<8x8x32xf32>
    %cst_145 = arith.constant dense<0.000000e+00> : vector<8x32xf32>
    %281 = vector.multi_reduction <add>, %280, %cst_145 [1] : vector<8x8x32xf32> to vector<8x32xf32>
    %cst_146 = arith.constant 8.000000e+00 : f32
    %282 = vector.broadcast %cst_146 : f32 to vector<8x32xf32>
    %283 = arith.divf %281, %282 : vector<8x32xf32>
    %c0_147 = arith.constant 0 : index
    %c0_148 = arith.constant 0 : index
    %284 = vector.load %arg4[%c0_147, %c0_148] : memref<8x32xf32, #tpu.memory_space<vmem>>, vector<8x32xf32>
    tpu.vector_store %arg4[%c0_147, %c0_148], %283 {strides = array<i32>} : memref<8x32xf32, #tpu.memory_space<vmem>>, vector<8x32xf32>,
    return
  }
  func.func @transform_0(%arg0: i32) -> (i32, i32) {
    %c0_i32 = arith.constant 0 : i32
    %c0_i32_0 = arith.constant 0 : i32
    return %arg0, %c0_i32 : i32, i32
  }
  func.func @transform_1(%arg0: i32) -> (i32, i32) {
    %c0_i32 = arith.constant 0 : i32
    %c0_i32_0 = arith.constant 0 : i32
    %c0_i32_1 = arith.constant 0 : i32
    return %c0_i32, %c0_i32_0 : i32, i32
  }
  func.func @transform_2(%arg0: i32) -> (i32, i32, i32) {
    %c0_i32 = arith.constant 0 : i32
    %c0_i32_0 = arith.constant 0 : i32
    %c0_i32_1 = arith.constant 0 : i32
    %c0_i32_2 = arith.constant 0 : i32
    return %c0_i32, %c0_i32_0, %c0_i32_1 : i32, i32, i32
  }
  func.func @transform_3(%arg0: i32) -> (i32, i32) {
    %c0_i32 = arith.constant 0 : i32
    %c0_i32_0 = arith.constant 0 : i32
    return %arg0, %c0_i32 : i32, i32
  }
}

</mosaic_0001>

<bundles_post_ra>
// kernel: transformer_text_encoder.1
= control target key start
LH: loop header
LB: loop body
LE: loop exit
PB: predicated region body
PF: predicated region fallthrough
CT: control target
= control target key end

     0   :  { %8 = vsyncpa [#allocation4], 0  ;;  %s17570_s0 = inlined_call_operand.vmem [shape: s32[128,1], index: 0, kind: input, shape index: {}]   ;;  %s17571_s1 = inlined_call_operand.vmem [shape: f32[192,32], index: 1, kind: input, shape index: {}]   ;;  %s17572_s2 = inlined_call_operand.vmem [shape: f32[2,168,96], index: 2, kind: input, shape index: {}]   ;;  %s17573_s3 = inlined_call_operand.hbm [shape: f32[16,32], index: 3, kind: output, shape index: {}]  }
   0x1   :  { %10 = vsyncpa [#allocation4 + $0x1], 0  ;;  %s15005_s12 = smov 0   ;;  %s15007_s13 = smov 0  }
   0x2   :  { %s15009_s14 = smov 0   ;;  %s15011_s15 = smov 0  }
   0x3 LB: > { %s15026_s16 = sadd.s32 4294967295, %s14964_s15   ;;  %s12832_s17 = sadd.s32 4294967294, %s14964_s15   ;;  %s14964_s15 = sphi %s15011_s15, %s17597_s15   ;;  %s14960_s14 = sphi %s15009_s14, %s17596_s14   ;;  %s14956_s13 = sphi %s15007_s13, %s17595_s13   ;;  %s14952_s12 = sphi %s15005_s12, %s17594_s12  }
   0x4   : > { %s15030_s18 = sadd.s32 1, %s14964_s15   ;;  %s91_s19 = sadd.s32 1, %s14960_s14 }
   0x5   : > { %s88_s20 = ssub.s32 %s14964_s15, %s15030_s18  ;;  %p101_p0 = scmp.ne.s32.totalorder %s14960_s14, %s14956_s13 }
   0x6   : > { %p89_p1 = scmp.eq.s32.totalorder %s88_s20, 0  ;;  %p102_p2 = scmp.eq.s32.totalorder %s15026_s16, 1 }
   0x7   : > { %p107_p3 = scmp.ne.s32.totalorder %s14956_s13, %s14952_s12  ;;  %p108_p4 = scmp.eq.s32.totalorder %s12832_s17, 1 }
   0x8   : > { %s15041_s21 = scalar_select %p89_p1, %s14960_s14, %s91_s19  }
   0x9   : > { %p15043_p5 = por %p102_p2, %p101_p0  ;;  %p15047_p6 = por %p108_p4, %p107_p3 }
   0xa   : > { %p12835_p7 = scmp.ge.s32.totalorder %s14964_s15, 1  ;;  %p141_p8 = scmp.lt.s32.totalorder %s14964_s15, 3 }
   0xc   : > { %p142_p9 = pnand %p12835_p7, %p141_p8 }
   0xd   : > { %s12837_s24 = sshll.u32 (!%p142_p9), %s15026_s16, 3  ;;  %v229_v0 = vld [vmem:[%s17571_s1] sm:$0xff] (!%p142_p9)  ;;  %v230_v1 = vld [vmem:[%s17571_s1 + $0x8] sm:$0xff] (!%p142_p9)  ;;  %v231_v2 = vld [vmem:[%s17571_s1 + $0x10] sm:$0xff] (!%p142_p9)  ;;  %v14966_v3 = vmov (!%p142_p9), 0   ;;  %v179_v36 = vlaneseq (!%p142_p9)  ;;  %v14967_v40 = vmov (!%p142_p9), 1.0  }
   0xe   : > { %145 = sbr.rel (%p142_p9) target bundleno = 7089 (0x1bb1), region = 32  ;;  %14581 = vset.pattern.permute.xlu1 (!%p142_p9), %v14966_v3  ;;  %14580 = vset.pattern.permute.xlu0 (!%p142_p9), %v14966_v3  ;;  %p166_p10 = scmp.lt.s32.totalorder (!%p142_p9), %s12837_s24, 15  ;;  %v14403_v4 = vpack.c.bf16 (!%p142_p9), %v230_v1, %v229_v0  ;;  %v232_v5 = vld [vmem:[%s17571_s1 + $0x18] sm:$0xff] (!%p142_p9)  ;;  %v233_v7 = vld [vmem:[%s17571_s1 + $0x20] sm:$0xff] (!%p142_p9)  ;;  %v234_v8 = vld [vmem:[%s17571_s1 + $0x28] sm:$0xff] (!%p142_p9)  ;;  %vm390_vm8 = vcmask (!%p142_p9), 261120  }
   0xf   : > { %v14407_v6 = vpack.c.bf16 (!%p142_p9), %v232_v5, %v231_v2  ;;  %v14411_v9 = vpack.c.bf16 (!%p142_p9), %v234_v8, %v233_v7  ;;  %v235_v10 = vld [vmem:[%s17571_s1 + $0x30] sm:$0xff] (!%p142_p9)  ;;  %v236_v13 = vld [vmem:[%s17571_s1 + $0x38] sm:$0xff] (!%p142_p9)  ;;  %v237_v17 = vld [vmem:[%s17571_s1 + $0x40] sm:$0xff] (!%p142_p9)  ;;  %v180_v37 = vand.u32 (!%p142_p9), 127, %v179_v36  ;;  %vm14969_vm9 = vmmov (!%p142_p9), 0   ;;  %s14970_s6 = smov (!%p142_p9), 96  }
  0x10   : > { %14404 = vmatprep.subr.bf16.mxu0 (!%p142_p9), %v14403_v4  ;;  %v14415_v16 = vpack.c.bf16 (!%p142_p9), %v236_v13, %v235_v10  ;;  %v238_v18 = vld [vmem:[%s17571_s1 + $0x48] sm:$0xff] (!%p142_p9)  ;;  %v239_v22 = vld [vmem:[%s17571_s1 + $0x50] sm:$0xff] (!%p142_p9)  ;;  %v240_v23 = vld [vmem:[%s17571_s1 + $0x58] sm:$0xff] (!%p142_p9)  ;;  %v14968_v10 = vmov (!%p142_p9), 0.0   ;;  %s14971_s7 = smov (!%p142_p9), 64   ;;  %s14972_s8 = smov (!%p142_p9), 88  }
  0x11   : > { %14406 = vmatpush3.bf16.msra.mxu0 (!%p142_p9), %v14403_v4  ;;  %v14419_v21 = vpack.c.bf16 (!%p142_p9), %v238_v18, %v237_v17  ;;  %v14423_v26 = vpack.c.bf16 (!%p142_p9), %v240_v23, %v239_v22  ;;  %v241_v27 = vld [vmem:[%s17571_s1 + $0x60] sm:$0xff] (!%p142_p9)  ;;  %v242_v28 = vld [vmem:[%s17571_s1 + $0x68] sm:$0xff] (!%p142_p9)  ;;  %v243_v30 = vld [vmem:[%s17571_s1 + $0x70] sm:$0xff] (!%p142_p9)  ;;  %s14973_s9 = smov (!%p142_p9), 120   ;;  %vm523_vm10 = vcmask (!%p142_p9), 64512   ;;  %s14975_s11 = smov (!%p142_p9), 80  }
  0x12   : > { %14408 = vmatprep.subr.bf16.mxu0 (!%p142_p9), %v14407_v6  ;;  %v14427_v29 = vpack.c.bf16 (!%p142_p9), %v242_v28, %v241_v27  ;;  %v244_v31 = vld [vmem:[%s17571_s1 + $0x78] sm:$0xff] (!%p142_p9)  ;;  %v358_v32 = vld [vmem:[%s17572_s2] sm:$0xff] (!%p142_p9)  ;;  %v359_v33 = vld [vmem:[%s17572_s2 + $0x8] sm:$0xff] (!%p142_p9)  ;;  %s14976_s17 = smov (!%p142_p9), 112   ;;  %s14977_s20 = smov (!%p142_p9), 48   ;;  %vm3129_vm11 = vcmask (!%p142_p9), 130112  }
  0x13   : > { %v14431_v34 = vpack.c.bf16 (!%p142_p9), %v244_v31, %v243_v30  ;;  %v14435_v35 = vpack.c.bf16 (!%p142_p9), %v359_v33, %v358_v32  ;;  %v360_v47 = vld [vmem:[%s17572_s2 + $0x10] sm:$0xff] (!%p142_p9)  ;;  %v361_v48 = vld [vmem:[%s17572_s2 + $0x18] sm:$0xff] (!%p142_p9)  ;;  %v245_v50 = vld [vmem:[%s17571_s1 + $0x80] sm:$0xff] (!%p142_p9)  ;;  %s17578_s25 = smov (!%p142_p9), 104   ;;  %s17576_s26 = smov (!%p142_p9), 40   ;;  %vm4458_vm12 = vcmask (!%p142_p9), 195712  }
  0x14   : > { %v14439_v49 = vpack.c.bf16 (!%p142_p9), %v361_v48, %v360_v47  ;;  %v246_v51 = vld [vmem:[%s17571_s1 + $0x88] sm:$0xff] (!%p142_p9)  ;;  %v247_v56 = vld [vmem:[%s17571_s1 + $0x90] sm:$0xff] (!%p142_p9)  ;;  %v248_v57 = vld [vmem:[%s17571_s1 + $0x98] sm:$0xff] (!%p142_p9)  ;;  %s17574_s27 = smov (!%p142_p9), 8   ;;  %s17580_s28 = smov (!%p142_p9), 24   ;;  %vm5787_vm13 = vcmask (!%p142_p9), 261312  }
  0x15   : > { %s17599_s24 = smov (!%p166_p10, %s12837_s24), 15  ;;  %14410 = vmatpush3.bf16.msra.mxu0 %v14407_v6  ;;  %14436 = vmatprep.subr.bf16.mxu1 %v14435_v35  ;;  %v249_v62 = vld [vmem:[%s17571_s1 + $0xa0] sm:$0xff]  ;;  %v250_v63 = vld [vmem:[%s17571_s1 + $0xa8] sm:$0xff]  ;;  %v251_v4 = vld [vmem:[%s17571_s1 + $0xb0] sm:$0xff]  ;;  %vm6235_vm14 = vcmask 523264   ;;  %s162_s5 = sand.u32 1, %s14956_s13  }
  0x16   : > { %s12838_s10 = sshll.u32 %s17599_s24, 3  ;;  %14412 = vmatprep.subr.bf16.mxu0 %v14411_v9  ;;  %14438 = vmatpush3.bf16.msra.mxu1 %v14435_v35  ;;  %v252_v5 = vld [vmem:[%s17571_s1 + $0xb8] sm:$0xff]  ;;  %s17582_s24 = smov 16   ;;  %vm12743_vm15 = vcmask 1041409  }
  0x17   : > { %s169_s19 = scalar_lea.vmem %s17570_s0, %s12838_s10  ;;  %14440 = vmatprep.subr.bf16.mxu1 %v14439_v49  ;;  %s14974_s10 = smov 56  }
  0x18   : > { %v173_v11 = vld [vmem:[%s169_s19 + $0x10] sm:$0xff]  ;;  %v171_v12 = vld [vmem:[%s169_s19] sm:$0xff]  ;;  %v174_v14 = vld [vmem:[%s169_s19 + $0x18] sm:$0xff] }
  0x19   : > { %188 = vperm.xlu1 %14581, %v173_v11   ;;  %182 = vperm.xlu0 %14580, %v171_v12   ;;  %v172_v15 = vld [vmem:[%s169_s19 + $0x8] sm:$0xff]  ;;  %v175_v20 = vld [vmem:[%s169_s19 + $0x20] sm:$0xff]  ;;  %v178_v24 = vld [vmem:[%s169_s19 + $0x38] sm:$0xff] }
  0x1a   : > { %v176_v19 = vld [vmem:[%s169_s19 + $0x28] sm:$0xff]  ;;  %14414 = vmatpush3.bf16.msra.mxu0 %v14411_v9  ;;  %v177_v25 = vld [vmem:[%s169_s19 + $0x30] sm:$0xff]  ;;  %14442 = vmatpush3.bf16.msra.mxu1 %v14439_v49  ;;  %v12855_v11 = vld [vmem:[%s17572_s2 + $0xa0] ss:$0 sm:$0xff]  ;;  %s17584_s19 = smov 72  }
  0x1b   : > { %14416 = vmatprep.subr.bf16.mxu0 %v14415_v16  ;;  %13607 = vmatprep.subr.mxu1 %v14968_v10 }
  0x1d   : > { %191 = vperm.xlu1 %14581, %v174_v14   ;;  %185 = vperm.xlu0 %14580, %v172_v15  }
  0x1e   : > { %14418 = vmatpush3.bf16.msra.mxu0 %v14415_v16 }
  0x1f   : > { %14420 = vmatprep.subr.bf16.mxu0 %v14419_v21 }
  0x21   : > { %197 = vperm.xlu1 %14581, %v176_v19   ;;  %194 = vperm.xlu0 %14580, %v175_v20  }
  0x22   : > { %14422 = vmatpush3.bf16.msra.mxu0 %v14419_v21 }
  0x23   : > { %14424 = vmatprep.subr.bf16.mxu0 %v14423_v26 }
  0x25   : > { %203 = vperm.xlu1 %14581, %v178_v24   ;;  %200 = vperm.xlu0 %14580, %v177_v25  }
  0x26   : > { %14426 = vmatpush3.bf16.msra.mxu0 %v14423_v26 }
  0x27   : > { %14428 = vmatprep.subr.bf16.mxu0 %v14427_v29 }
  0x2a   : > { %14430 = vmatpush3.bf16.msra.mxu0 %v14427_v29 }
  0x2b   : > { %14432 = vmatprep.subr.bf16.mxu0 %v14431_v34 }
  0x2e   : > { %14434 = vmatpush3.bf16.msra.mxu0 %v14431_v34 }
  0x2f   : > { %13637 = vmatprep.subr.mxu0 %v14968_v10 }
  0x98   : > { %v189_v38 = vpop.permute.xlu1 %188  ;;  %v183_v39 = vpop.permute.xlu0 %182 }
  0x99   : > { %vm205_vm0 = vcmp.eq.s32.totalorder %v183_v39, %v180_v37  ;;  %vm207_vm1 = vcmp.eq.s32.totalorder %v189_v38, %v180_v37 }
  0x9a   : > { %13575 = vmatprep.mubr.msk.f32.mxu0 %vm205_vm0, %v14967_v40  ;;  %vm12745_vm0 = vcmask 1042434  }
  0x9c   : > { %v192_v41 = vpop.permute.xlu1 %191  ;;  %v186_v42 = vpop.permute.xlu0 %185 }
  0x9d   : > { %vm206_vm2 = vcmp.eq.s32.totalorder %v186_v42, %v180_v37  ;;  %vm208_vm3 = vcmp.eq.s32.totalorder %v192_v41, %v180_v37 }
  0x9e   : > { %13576 = vmatmul.mubr.msk.f32.vlgmr.msra.gmra.mrb[0].mxu0 %vm206_vm2, %v14967_v40  ;;  %vm12749_vm2 = vcmask 1044484  }
  0x9f   : > { %13578 = vmatprep.mubr.msk.f32.mxu0 %vm207_vm1, %v14967_v40  ;;  %vm12747_vm1 = vcmask 1043459  }
  0xa0   : > { %v198_v43 = vpop.permute.xlu1 %197  ;;  %v195_v44 = vpop.permute.xlu0 %194 }
  0xa1   : > { %vm209_vm4 = vcmp.eq.s32.totalorder %v195_v44, %v180_v37  ;;  %vm210_vm5 = vcmp.eq.s32.totalorder %v198_v43, %v180_v37 }
  0xa2   : > { %13579 = vmatmul.mubr.msk.f32.gmra.mrb[2].mxu0 %vm208_vm3, %v14967_v40  ;;  %vm12751_vm3 = vcmask 1045509  }
  0xa3   : > { %13581 = vmatprep.mubr.msk.f32.mxu0 %vm209_vm4, %v14967_v40  ;;  %vm12753_vm4 = vcmask 1046534  }
  0xa4   : > { %v201_v45 = vpop.permute.xlu0 %200  ;;  %v204_v46 = vpop.permute.xlu1 %203 }
  0xa5   : > { %vm211_vm6 = vcmp.eq.s32.totalorder %v201_v45, %v180_v37  ;;  %vm212_vm7 = vcmp.eq.s32.totalorder %v204_v46, %v180_v37 }
  0xa6   : > { %13582 = vmatmul.mubr.msk.f32.gmra.mrb[4].mxu0 %vm210_vm5, %v14967_v40  ;;  %vm12755_vm5 = vcmask 1047559  }
  0xa7   : > { %13584 = vmatprep.mubr.msk.f32.mxu0 %vm211_vm6, %v14967_v40 }
  0xaa   : > { %13585 = vmatmul.mubr.msk.f32.gmra.mrb[6].mxu0 %vm212_vm7, %v14967_v40 }
  0xab   : > { %13639 = vmatprep.mubr.msk.f32.mxu0 %vm14969_vm9, %v14968_v10 }
 0x171   : > { %v13577_v52 = vpop.f32.mrb[0].mxu0 }
 0x172   : > { %v319_v53 = vpop.f32.mrb[1].mxu0  ;;  %v15125_v55 = vadd.f32 %v13577_v52, %v246_v51 }
 0x173   : > { %v15123_v54 = vadd.f32 %v319_v53, %v245_v50 }
 0x175   : > { %v13580_v58 = vpop.f32.mrb[2].mxu0  ;;  %13595 = vmatprep.mubr.msk.f32.mxu1 %vm390_vm8, %v15123_v54 }
 0x176   : > { %v329_v59 = vpop.f32.mrb[3].mxu0  ;;  %13596 = vmatmul.mubr.msk.f32.vlgmr.msra.gmra.mrb[0].mxu1 %vm390_vm8, %v15125_v55  ;;  %v15139_v61 = vadd.f32 %v13580_v58, %v248_v57 }
 0x177   : > { %v15137_v60 = vadd.f32 %v329_v59, %v247_v56 }
 0x179   : > { %v13583_v0 = vpop.f32.mrb[4].mxu0  ;;  %13598 = vmatprep.mubr.msk.f32.mxu1 %vm390_vm8, %v15137_v60 }
 0x17a   : > { %v339_v1 = vpop.f32.mrb[5].mxu0  ;;  %13599 = vmatmul.mubr.msk.f32.gmra.mrb[2].mxu1 %vm390_vm8, %v15139_v61  ;;  %v15153_v3 = vadd.f32 %v13583_v0, %v250_v63 }
 0x17b   : > { %v15151_v2 = vadd.f32 %v339_v1, %v249_v62 }
 0x17d   : > { %v13586_v6 = vpop.f32.mrb[6].mxu0  ;;  %13601 = vmatprep.mubr.msk.f32.mxu1 %vm390_vm8, %v15151_v2 }
 0x17e   : > { %v349_v7 = vpop.f32.mrb[7].mxu0  ;;  %13602 = vmatmul.mubr.msk.f32.gmra.mrb[4].mxu1 %vm390_vm8, %v15153_v3  ;;  %v15167_v9 = vadd.f32 %v13586_v6, %v252_v5 }
 0x17f   : > { %v15165_v8 = vadd.f32 %v349_v7, %v251_v4 }
 0x181   : > { %13604 = vmatprep.mubr.msk.f32.mxu1 %vm390_vm8, %v15165_v8 }
 0x182   : > { %13605 = vmatmul.mubr.msk.f32.gmra.mrb[6].mxu1 %vm390_vm8, %v15167_v9 }
 0x183   : > { %13609 = vmatprep.mubr.msk.f32.mxu1 %vm14969_vm9, %v14968_v10 }
 0x249   : > { %v13597_v12 = vpop.f32.mrb[0].mxu1 }
 0x24a   : > { %v15182_v13 = vadd.f32 %v13597_v12, %v12855_v11  ;;  %v481_v14 = vpop.f32.mrb[1].mxu1 }
 0x24b   : > { %v15184_v15 = vadd.f32 %v12855_v11, %v481_v14 }
 0x24c   : > { %599 = vrot.lane.b32.xlu1 %v15182_v13, %s14970_s6 }
 0x24d   : > { %v13600_v16 = vpop.f32.mrb[2].mxu1  ;;  %521 = vrot.lane.b32.xlu0 %v15184_v15, %s14970_s6 }
 0x24e   : > { %v15190_v17 = vadd.f32 %v13600_v16, %v12855_v11  ;;  %v491_v18 = vpop.f32.mrb[3].mxu1 }
 0x24f   : > { %v15192_v19 = vadd.f32 %v12855_v11, %v491_v18 }
 0x250   : > { %753 = vrot.lane.b32.xlu1 %v15190_v17, %s14970_s6 }
 0x251   : > { %676 = vrot.lane.b32.xlu0 %v15192_v19, %s14970_s6  ;;  %v13603_v20 = vpop.f32.mrb[4].mxu1 }
 0x252   : > { %v15198_v21 = vadd.f32 %v13603_v20, %v12855_v11  ;;  %v501_v22 = vpop.f32.mrb[5].mxu1 }
 0x253   : > { %v15200_v23 = vadd.f32 %v12855_v11, %v501_v22 }
 0x254   : > { %907 = vrot.lane.b32.xlu1 %v15198_v21, %s14970_s6 }
 0x255   : > { %830 = vrot.lane.b32.xlu0 %v15200_v23, %s14970_s6  ;;  %v13606_v24 = vpop.f32.mrb[6].mxu1 }
 0x256   : > { %v15206_v25 = vadd.f32 %v13606_v24, %v12855_v11  ;;  %v511_v26 = vpop.f32.mrb[7].mxu1 }
 0x257   : > { %v15208_v27 = vadd.f32 %v12855_v11, %v511_v26 }
 0x258   : > { %1061 = vrot.lane.b32.xlu1 %v15206_v25, %s14970_s6 }
 0x259   : > { %984 = vrot.lane.b32.xlu0 %v15208_v27, %s14970_s6 }
 0x25c   : > { %1193 = vrot.lane.b32.xlu1 %v15184_v15, %s14971_s7 }
 0x25d   : > { %1269 = vrot.lane.b32.xlu0 %v15182_v13, %s14971_s7 }
 0x260   : > { %1345 = vrot.lane.b32.xlu1 %v15192_v19, %s14971_s7 }
 0x261   : > { %1497 = vrot.lane.b32.xlu0 %v15200_v23, %s14971_s7 }
 0x264   : > { %1421 = vrot.lane.b32.xlu1 %v15190_v17, %s14971_s7 }
 0x265   : > { %1811 = vrot.lane.b32.xlu0 %v15184_v15, %s14972_s8 }
 0x268   : > { %1573 = vrot.lane.b32.xlu1 %v15198_v21, %s14971_s7 }
 0x269   : > { %1809 = vrot.lane.b32.xlu0 %v15184_v15, %s14973_s9 }
 0x26c   : > { %1725 = vrot.lane.b32.xlu1 %v15206_v25, %s14971_s7 }
 0x26d   : > { %1967 = vrot.lane.b32.xlu0 %v15192_v19, %s14972_s8 }
 0x270   : > { %1889 = vrot.lane.b32.xlu1 %v15182_v13, %s14972_s8 }
 0x271   : > { %1649 = vrot.lane.b32.xlu0 %v15208_v27, %s14971_s7 }
 0x274   : > { %1887 = vrot.lane.b32.xlu1 %v15182_v13, %s14973_s9 }
 0x278   : > { %2045 = vrot.lane.b32.xlu1 %v15190_v17, %s14972_s8 }
 0x2be   : > { %v600_v28 = vpop.permute.xlu1 %599 }
 0x2bf   : > { %v522_v29 = vpop.permute.xlu0 %521 }
 0x2c0   : > { %13608 = vmatpush3.xpose.msk.msra.mxu1 %vm523_vm10, %v522_v29 }
 0x2c1   : > { %13612 = vmatprep.subr.mxu1 %v14968_v10 }
 0x2c2   : > { %v754_v30 = vpop.permute.xlu1 %753 }
 0x2c3   : > { %13610 = vmatmul.mubr.msk.f32.vlgmr.msra.gmra.mrb[8].mxu1 %vm523_vm10, %v15184_v15  ;;  %v677_v31 = vpop.permute.xlu0 %676 }
 0x2c4   : > { %13613 = vmatpush3.xpose.msk.msra.mxu1 %vm523_vm10, %v600_v28  ;;  %13614 = vmatprep.mubr.msk.f32.mxu1 %vm14969_vm9, %v14968_v10 }
 0x2c5   : > { %13617 = vmatprep.subr.mxu1 %v14968_v10 }
 0x2c6   : > { %v908_v32 = vpop.permute.xlu1 %907 }
 0x2c7   : > { %13615 = vmatmul.mubr.msk.f32.vlgmr.msra.gmra.mrb[10].mxu1 %vm523_vm10, %v15182_v13  ;;  %v831_v33 = vpop.permute.xlu0 %830 }
 0x2c8   : > { %13618 = vmatpush3.xpose.msk.msra.mxu1 %vm523_vm10, %v677_v31  ;;  %13619 = vmatprep.mubr.msk.f32.mxu1 %vm14969_vm9, %v14968_v10 }
 0x2c9   : > { %13622 = vmatprep.subr.mxu1 %v14968_v10 }
 0x2ca   : > { %v1062_v34 = vpop.permute.xlu1 %1061 }
 0x2cb   : > { %13620 = vmatmul.mubr.msk.f32.vlgmr.msra.gmra.mrb[12].mxu1 %vm523_vm10, %v15192_v19  ;;  %v985_v35 = vpop.permute.xlu0 %984 }
 0x2cc   : > { %13623 = vmatpush3.xpose.msk.msra.mxu1 %vm523_vm10, %v754_v30  ;;  %13638 = vmatpush3.xpose.msk.msra.mxu0 %vm523_vm10, %v985_v35 }
 0x2cd   : > { %13624 = vmatprep.mubr.msk.f32.mxu1 %vm14969_vm9, %v14968_v10  ;;  %13627 = vmatprep.subr.mxu1 %v14968_v10 }
 0x2ce   : > { %v1194_v36 = vpop.permute.xlu1 %1193  ;;  %13647 = vmatprep.subr.mxu0 %v14968_v10 }
 0x2cf   : > { %13625 = vmatmul.mubr.msk.f32.vlgmr.msra.gmra.mrb[14].mxu1 %vm523_vm10, %v15190_v17  ;;  %13640 = vmatmul.mubr.msk.f32.vlgmr.msra.gmra.mrb[8].mxu0 %vm523_vm10, %v15208_v27  ;;  %v1270_v37 = vpop.permute.xlu0 %1269 }
 0x2d0   : > { %13628 = vmatpush3.xpose.msk.msra.mxu1 %vm523_vm10, %v831_v33  ;;  %13648 = vmatpush3.msra.mxu0 %v1194_v36 }
 0x2d1   : > { %13629 = vmatprep.mubr.msk.f32.mxu1 %vm14969_vm9, %v14968_v10  ;;  %13632 = vmatprep.subr.mxu1 %v14968_v10 }
 0x2d2   : > { %13649 = vmatprep.mubr.msk.f32.mxu0 %vm14969_vm9, %v14968_v10  ;;  %13657 = vmatprep.subr.mxu0 %v14968_v10  ;;  %v1346_v31 = vpop.permute.xlu1 %1345 }
 0x2d3   : > { %13630 = vmatmul.mubr.msk.f32.vlgmr.msra.gmra.mrb[16].mxu1 %vm523_vm10, %v15200_v23  ;;  %v1498_v33 = vpop.permute.xlu0 %1497 }
 0x2d4   : > { %13633 = vmatpush3.xpose.msk.msra.mxu1 %vm523_vm10, %v908_v32  ;;  %13634 = vmatprep.mubr.msk.f32.mxu1 %vm14969_vm9, %v14968_v10 }
 0x2d5   : > { %13642 = vmatprep.subr.mxu1 %v14968_v10 }
 0x2d6   : > { %v1422_v32 = vpop.permute.xlu1 %1421 }
 0x2d7   : > { %13635 = vmatmul.mubr.msk.f32.vlgmr.msra.gmra.mrb[18].mxu1 %vm523_vm10, %v15198_v21  ;;  %v15372_v35 = vpop.permute.xlu0 %1811 }
 0x2d8   : > { %13643 = vmatpush3.xpose.msk.msra.mxu1 %vm523_vm10, %v1062_v34  ;;  %13644 = vmatprep.mubr.msk.f32.mxu1 %vm14969_vm9, %v14968_v10 }
 0x2d9   : > { %13652 = vmatprep.subr.mxu1 %v14968_v10 }
 0x2da   : > { %v1574_v34 = vpop.permute.xlu1 %1573 }
 0x2db   : > { %13645 = vmatmul.mubr.msk.f32.vlgmr.msra.gmra.mrb[20].mxu1 %vm523_vm10, %v15206_v25 }
 0x2dc   : > { %13653 = vmatpush3.msra.mxu1 %v1270_v37  ;;  %13654 = vmatprep.mubr.msk.f32.mxu1 %vm14969_vm9, %v14968_v10  ;;  %v15376_v37 = vpop.permute.xlu0 %1809 }
 0x2dd   : > { %13662 = vmatprep.subr.mxu1 %v14968_v10 }
 0x2de   : > { %v15374_v36 = vpop.permute.xlu1 %1725 }
 0x396   : > { %v594_v38 = vpop.f32.mrb[8].mxu1 }
 0x397   : > { %v1137_v39 = vmul.f32 1.442695, %v594_v38  ;;  %v13611_v40 = vpop.f32.mrb[9].mxu1  ;;  %v15378_v38 = vpop.permute.xlu1 %1889 }
 0x399   : > { %14582 = vpow2.f32 %v1137_v39  ;;  %v15380_v39 = vpop.permute.xlu0 %1967 }
 0x39a   : > { %v671_v41 = vpop.f32.mrb[10].mxu1 }
 0x39b   : > { %v1139_v42 = vmul.f32 1.442695, %v671_v41  ;;  %v13616_v43 = vpop.f32.mrb[11].mxu1  ;;  %v15382_v40 = vpop.permute.xlu1 %1887 }
 0x39d   : > { %14584 = vpow2.f32 %v1139_v42  ;;  %v1650_v41 = vpop.permute.xlu0 %1649 }
 0x39e   : > { %v748_v44 = vpop.f32.mrb[12].mxu1 }
 0x39f   : > { %v1141_v45 = vmul.f32 1.442695, %v748_v44  ;;  %v13621_v46 = vpop.f32.mrb[13].mxu1  ;;  %v15384_v42 = vpop.permute.xlu1 %2045 }
 0x3a1   : > { %14586 = vpow2.f32 %v1141_v45 }
 0x3a2   : > { %v825_v47 = vpop.f32.mrb[14].mxu1  ;;  %v1056_v48 = vpop.f32.mrb[8].mxu0 }
 0x3a3   : > { %v15292_v49 = vpop.eup %14582  ;;  %v1143_v50 = vmul.f32 1.442695, %v825_v47  ;;  %v1149_v51 = vmul.f32 1.442695, %v1056_v48  ;;  %v13626_v52 = vpop.f32.mrb[15].mxu1 }
 0x3a4   : > { %v13641_v53 = vpop.f32.mrb[9].mxu0  ;;  %v1153_v56 = vsel %vm523_vm10, %v15292_v49, 0.0 }
 0x3a5   : > { %14588 = vpow2.f32 %v1143_v50  ;;  %1154 = vadd.xlane.f32.xlu0 %v1153_v56 }
 0x3a6   : > { %14590 = vpow2.f32 %v1149_v51  ;;  %v902_v57 = vpop.f32.mrb[16].mxu1 }
 0x3a7   : > { %v15296_v58 = vpop.eup %14584  ;;  %v1145_v59 = vmul.f32 1.442695, %v902_v57  ;;  %v13631_v62 = vpop.f32.mrb[17].mxu1 }
 0x3a8   : > { %v1156_v63 = vsel %vm523_vm10, %v15296_v58, 0.0 }
 0x3a9   : > { %14592 = vpow2.f32 %v1145_v59  ;;  %1157 = vadd.xlane.f32.xlu1 %v1156_v63 }
 0x3aa   : > { %v979_v0 = vpop.f32.mrb[18].mxu1 }
 0x3ab   : > { %v15300_v1 = vpop.eup %14586  ;;  %v1147_v4 = vmul.f32 1.442695, %v979_v0  ;;  %v13636_v5 = vpop.f32.mrb[19].mxu1 }
 0x3ac   : > { %v1159_v6 = vsel %vm523_vm10, %v15300_v1, 0.0 }
 0x3ad   : > { %14594 = vpow2.f32 %v1147_v4  ;;  %1160 = vadd.xlane.f32.xlu0 %v1159_v6 }
 0x3ae   : > { %v1133_v7 = vpop.f32.mrb[20].mxu1 }
 0x3af   : > { %v15304_v11 = vpop.eup %14588  ;;  %v1151_v12 = vmul.f32 1.442695, %v1133_v7  ;;  %v13646_v14 = vpop.f32.mrb[21].mxu1 }
 0x3b0   : > { %v15306_v16 = vpop.eup %14590  ;;  %v1162_v18 = vsel %vm523_vm10, %v15304_v11, 0.0 }
 0x3b1   : > { %14596 = vpow2.f32 %v1151_v12  ;;  %1163 = vadd.xlane.f32.xlu0 %v1162_v18  ;;  %v1171_v20 = vsel %vm523_vm10, %v15306_v16, 0.0 }
 0x3b2   : > { %1172 = vadd.xlane.f32.xlu1 %v1171_v20 }
 0x3b3   : > { %v15312_v22 = vpop.eup %14592 }
 0x3b4   : > { %v1165_v24 = vsel %vm523_vm10, %v15312_v22, 0.0 }
 0x3b6   : > { %1166 = vadd.xlane.f32.xlu1 %v1165_v24 }
 0x3b7   : > { %v15316_v26 = vpop.eup %14594 }
 0x3b8   : > { %v1168_v28 = vsel %vm523_vm10, %v15316_v26, 0.0 }
 0x3b9   : > { %1169 = vadd.xlane.f32.xlu0 %v1168_v28 }
 0x3bb   : > { %v15320_v29 = vpop.eup %14596 }
 0x3bc   : > { %v1174_v30 = vsel %vm523_vm10, %v15320_v29, 0.0 }
 0x3bd   : > { %1175 = vadd.xlane.f32.xlu0 %v1174_v30 }
 0x3c7   : > { %2043 = vrot.lane.b32.xlu1 %v15190_v17, %s14973_s9 }
 0x3cb   : > { %2201 = vrot.lane.b32.xlu1 %v15198_v21, %s14972_s8 }
 0x3cf   : > { %2199 = vrot.lane.b32.xlu1 %v15198_v21, %s14973_s9 }
 0x3d3   : > { %2357 = vrot.lane.b32.xlu1 %v15206_v25, %s14972_s8  ;;  %1965 = vrot.lane.b32.xlu0 %v15192_v19, %s14973_s9 }
 0x3d7   : > { %2355 = vrot.lane.b32.xlu1 %v15206_v25, %s14973_s9  ;;  %2123 = vrot.lane.b32.xlu0 %v15200_v23, %s14972_s8 }
 0x3db   : > { %2489 = vrot.lane.b32.xlu1 %v15184_v15, %s14974_s10  ;;  %2121 = vrot.lane.b32.xlu0 %v15200_v23, %s14973_s9 }
 0x3df   : > { %2641 = vrot.lane.b32.xlu1 %v15192_v19, %s14974_s10  ;;  %2279 = vrot.lane.b32.xlu0 %v15208_v27, %s14972_s8 }
 0x3e3   : > { %2717 = vrot.lane.b32.xlu1 %v15190_v17, %s14974_s10  ;;  %2277 = vrot.lane.b32.xlu0 %v15208_v27, %s14973_s9 }
 0x3e7   : > { %2869 = vrot.lane.b32.xlu1 %v15198_v21, %s14974_s10  ;;  %2565 = vrot.lane.b32.xlu0 %v15182_v13, %s14974_s10 }
 0x3eb   : > { %3021 = vrot.lane.b32.xlu1 %v15206_v25, %s14974_s10  ;;  %2793 = vrot.lane.b32.xlu0 %v15200_v23, %s14974_s10 }
 0x3ef   : > { %3218 = vrot.lane.b32.xlu1 %v15182_v13, %s14975_s11  ;;  %2945 = vrot.lane.b32.xlu0 %v15208_v27, %s14974_s10 }
 0x3f3   : > { %3216 = vrot.lane.b32.xlu1 %v15182_v13, %s14976_s17  ;;  %3140 = vrot.lane.b32.xlu0 %v15184_v15, %s14975_s11 }
 0x3f7   : > { %3374 = vrot.lane.b32.xlu1 %v15190_v17, %s14975_s11  ;;  %3138 = vrot.lane.b32.xlu0 %v15184_v15, %s14976_s17 }
 0x3fb   : > { %3296 = vrot.lane.b32.xlu0 %v15192_v19, %s14975_s11 }
 0x432   : > { %v1155_v43 = vpop.xlane.xlu0 %1154 }
 0x433   : > { %14598 = vrcp.f32 %v1155_v43 }
 0x436   : > { %v1158_v44 = vpop.xlane.xlu1 %1157 }
 0x437   : > { %14600 = vrcp.f32 %v1158_v44 }
 0x43a   : > { %v1161_v45 = vpop.xlane.xlu0 %1160 }
 0x43b   : > { %14602 = vrcp.f32 %v1161_v45 }
 0x43d   : > { %v14599_v46 = vpop.eup %14598 }
 0x43e   : > { %v1164_v47 = vpop.xlane.xlu0 %1163  ;;  %v1185_v48 = vmul.f32 %v14599_v46, %v15292_v49 }
 0x43f   : > { %v1173_v50 = vpop.xlane.xlu1 %1172  ;;  %14604 = vrcp.f32 %v1164_v47 }
 0x440   : > { %13650 = vmatmul.mubr.msk.f32.vlgmr.msra.gmra.mrb[10].mxu0 %vm523_vm10, %v1185_v48 }
 0x441   : > { %v14601_v51 = vpop.eup %14600  ;;  %13658 = vmatpush3.msra.mxu0 %v1346_v31  ;;  %13659 = vmatprep.mubr.msk.f32.mxu0 %vm14969_vm9, %v14968_v10 }
 0x442   : > { %v1186_v52 = vmul.f32 %v14601_v51, %v15296_v58  ;;  %13667 = vmatprep.subr.mxu0 %v14968_v10 }
 0x443   : > { %v1167_v53 = vpop.xlane.xlu1 %1166 }
 0x444   : > { %14606 = vrcp.f32 %v1167_v53  ;;  %13655 = vmatmul.mubr.msk.f32.vlgmr.msra.gmra.mrb[22].mxu1 %vm523_vm10, %v1186_v52 }
 0x445   : > { %v14603_v56 = vpop.eup %14602  ;;  %13663 = vmatpush3.msra.mxu1 %v1422_v32  ;;  %13664 = vmatprep.mubr.msk.f32.mxu1 %vm14969_vm9, %v14968_v10  ;;  %14608 = vrcp.f32 %v1173_v50 }
 0x446   : > { %v1170_v49 = vpop.xlane.xlu0 %1169  ;;  %v1187_v57 = vmul.f32 %v14603_v56, %v15300_v1  ;;  %13672 = vmatprep.subr.mxu1 %v14968_v10 }
 0x447   : > { %14610 = vrcp.f32 %v1170_v49  ;;  %v2044_v59 = vpop.permute.xlu1 %2043 }
 0x448   : > { %13660 = vmatmul.mubr.msk.f32.vlgmr.msra.gmra.mrb[12].mxu0 %vm523_vm10, %v1187_v57 }
 0x449   : > { %v14605_v58 = vpop.eup %14604  ;;  %13668 = vmatpush3.msra.mxu0 %v1498_v33  ;;  %13669 = vmatprep.mubr.msk.f32.mxu0 %vm14969_vm9, %v14968_v10 }
 0x44a   : > { %v1176_v62 = vpop.xlane.xlu0 %1175  ;;  %v1188_v63 = vmul.f32 %v14605_v58, %v15304_v11  ;;  %13677 = vmatprep.subr.mxu0 %v14968_v10 }
 0x44b   : > { %14612 = vrcp.f32 %v1176_v62  ;;  %v2202_v6 = vpop.permute.xlu1 %2201 }
 0x44c   : > { %13665 = vmatmul.mubr.msk.f32.vlgmr.msra.gmra.mrb[24].mxu1 %vm523_vm10, %v1188_v63 }
 0x44d   : > { %13673 = vmatpush3.msra.mxu1 %v1574_v34  ;;  %13674 = vmatprep.mubr.msk.f32.mxu1 %vm14969_vm9, %v14968_v10 }
 0x44e   : > { %v14607_v0 = vpop.eup %14606  ;;  %v1966_v1 = vpop.permute.xlu0 %1965  ;;  %13682 = vmatprep.subr.mxu1 %v14968_v10 }
 0x44f   : > { %v1189_v4 = vmul.f32 %v14607_v0, %v15312_v22  ;;  %v14609_v5 = vpop.eup %14608  ;;  %v2200_v20 = vpop.permute.xlu1 %2199 }
 0x450   : > { %v1191_v14 = vmul.f32 %v14609_v5, %v15306_v16 }
 0x451   : > { %v14611_v7 = vpop.eup %14610  ;;  %13670 = vmatmul.mubr.msk.f32.vlgmr.msra.gmra.mrb[14].mxu0 %vm523_vm10, %v1189_v4 }
 0x452   : > { %13678 = vmatpush3.msra.mxu0 %v1650_v41  ;;  %13679 = vmatprep.mubr.msk.f32.mxu0 %vm14969_vm9, %v14968_v10  ;;  %v1190_v11 = vmul.f32 %v14611_v7, %v15316_v26  ;;  %v2124_v12 = vpop.permute.xlu0 %2123 }
 0x453   : > { %13687 = vmatprep.subr.mxu0 %v14968_v10  ;;  %v2358_v24 = vpop.permute.xlu1 %2357 }
 0x454   : > { %13675 = vmatmul.mubr.msk.f32.vlgmr.msra.gmra.mrb[26].mxu1 %vm523_vm10, %v1190_v11 }
 0x455   : > { %v14613_v18 = vpop.eup %14612  ;;  %13680 = vmatmul.mubr.msk.f32.vlgmr.msra.gmra.mrb[16].mxu0 %vm523_vm10, %v1191_v14  ;;  %13683 = vmatpush3.msra.mxu1 %v15374_v36 }
 0x456   : > { %13684 = vmatprep.mubr.msk.f32.mxu1 %vm14969_vm9, %v14968_v10  ;;  %v1192_v22 = vmul.f32 %v14613_v18, %v15320_v29  ;;  %13689 = vmatprep.mubr.msk.f32.mxu0 %vm14969_vm9, %v14968_v10  ;;  %v2122_v16 = vpop.permute.xlu0 %2121 }
 0x457   : > { %13692 = vmatprep.subr.mxu1 %v14968_v10  ;;  %v2356_v28 = vpop.permute.xlu1 %2355 }
 0x458   : > { %13685 = vmatmul.mubr.msk.f32.vlgmr.msra.gmra.mrb[28].mxu1 %vm523_vm10, %v1192_v22 }
 0x459   : > { %13688 = vmatpush3.xpose.msk.msra.mxu0 %vm523_vm10, %v15372_v35  ;;  %13694 = vmatprep.mubr.msk.f32.mxu1 %vm14969_vm9, %v14968_v10 }
 0x45a   : > { %13697 = vmatprep.subr.mxu0 %v14968_v10  ;;  %v2280_v26 = vpop.permute.xlu0 %2279 }
 0x45b   : > { %v2490_v30 = vpop.permute.xlu1 %2489 }
 0x45c   : > { %13690 = vmatmul.mubr.msk.f32.vlgmr.msra.gmra.mrb[18].mxu0 %vm523_vm10, %v15376_v37  ;;  %13693 = vmatpush3.xpose.msk.msra.mxu1 %vm523_vm10, %v15378_v38 }
 0x45d   : > { %13698 = vmatpush3.xpose.msk.msra.mxu0 %vm523_vm10, %v15380_v39  ;;  %13699 = vmatprep.mubr.msk.f32.mxu0 %vm14969_vm9, %v14968_v10 }
 0x45e   : > { %13702 = vmatprep.subr.mxu1 %v14968_v10  ;;  %13707 = vmatprep.subr.mxu0 %v14968_v10  ;;  %v2278_v29 = vpop.permute.xlu0 %2277 }
 0x45f   : > { %13695 = vmatmul.mubr.msk.f32.vlgmr.msra.gmra.mrb[30].mxu1 %vm523_vm10, %v15382_v40 }
 0x460   : > { %13700 = vmatmul.mubr.msk.f32.vlgmr.msra.gmra.mrb[20].mxu0 %vm523_vm10, %v1966_v1  ;;  %13703 = vmatpush3.xpose.msk.msra.mxu1 %vm523_vm10, %v15384_v42 }
 0x461   : > { %13708 = vmatpush3.xpose.msk.msra.mxu0 %vm523_vm10, %v2124_v12  ;;  %13704 = vmatprep.mubr.msk.f32.mxu1 %vm14969_vm9, %v14968_v10 }
 0x462   : > { %13709 = vmatprep.mubr.msk.f32.mxu0 %vm14969_vm9, %v14968_v10  ;;  %13712 = vmatprep.subr.mxu1 %v14968_v10  ;;  %v2566_v31 = vpop.permute.xlu0 %2565 }
 0x463   : > { %13705 = vmatmul.mubr.msk.f32.vlgmr.msra.gmra.mrb[32].mxu1 %vm523_vm10, %v2044_v59  ;;  %13717 = vmatprep.subr.mxu0 %v14968_v10 }
 0x464   : > { %13710 = vmatmul.mubr.msk.f32.vlgmr.msra.gmra.mrb[22].mxu0 %vm523_vm10, %v2122_v16  ;;  %13713 = vmatpush3.xpose.msk.msra.mxu1 %vm523_vm10, %v2202_v6 }
 0x465   : > { %13718 = vmatpush3.xpose.msk.msra.mxu0 %vm523_vm10, %v2280_v26  ;;  %13714 = vmatprep.mubr.msk.f32.mxu1 %vm14969_vm9, %v14968_v10 }
 0x466   : > { %13719 = vmatprep.mubr.msk.f32.mxu0 %vm14969_vm9, %v14968_v10  ;;  %13722 = vmatprep.subr.mxu1 %v14968_v10 }
 0x467   : > { %13715 = vmatmul.mubr.msk.f32.vlgmr.msra.gmra.mrb[34].mxu1 %vm523_vm10, %v2200_v20  ;;  %13727 = vmatprep.subr.mxu0 %v14968_v10 }
 0x468   : > { %13720 = vmatmul.mubr.msk.f32.vlgmr.msra.gmra.mrb[24].mxu0 %vm523_vm10, %v2278_v29  ;;  %13723 = vmatpush3.xpose.msk.msra.mxu1 %vm523_vm10, %v2358_v24 }
 0x469   : > { %13728 = vmatpush3.msra.mxu0 %v2490_v30  ;;  %13724 = vmatprep.mubr.msk.f32.mxu1 %vm14969_vm9, %v14968_v10 }
 0x46a   : > { %13732 = vmatprep.subr.mxu1 %v14968_v10  ;;  %13729 = vmatprep.mubr.msk.f32.mxu0 %vm14969_vm9, %v14968_v10 }
 0x46b   : > { %13725 = vmatmul.mubr.msk.f32.vlgmr.msra.gmra.mrb[36].mxu1 %vm523_vm10, %v2356_v28  ;;  %13737 = vmatprep.subr.mxu0 %v14968_v10 }
 0x46c   : > { %13733 = vmatpush3.msra.mxu1 %v2566_v31  ;;  %13734 = vmatprep.mubr.msk.f32.mxu1 %vm14969_vm9, %v14968_v10 }
 0x46d   : > { %13742 = vmatprep.subr.mxu1 %v14968_v10 }
 0x513   : > { %v1265_v32 = vpop.f32.mrb[10].mxu0 }
 0x514   : > { %1801 = vst.msk [vmem:[#allocation2] sm:$0xff] %vm523_vm10, %v1265_v32  ;;  %v13651_v33 = vpop.f32.mrb[11].mxu0 }
 0x517   : > { %v1341_v34 = vpop.f32.mrb[22].mxu1 }
 0x518   : > { %1802 = vst.msk [vmem:[#allocation2 + $0x8] sm:$0xff] %vm523_vm10, %v1341_v34  ;;  %v13656_v35 = vpop.f32.mrb[23].mxu1 }
 0x51b   : > { %v1417_v36 = vpop.f32.mrb[12].mxu0 }
 0x51c   : > { %1803 = vst.msk [vmem:[#allocation2 + $0x10] sm:$0xff] %vm523_vm10, %v1417_v36  ;;  %v13661_v37 = vpop.f32.mrb[13].mxu0 }
 0x51f   : > { %v1493_v38 = vpop.f32.mrb[24].mxu1 }
 0x520   : > { %1804 = vst.msk [vmem:[#allocation2 + $0x18] sm:$0xff] %vm523_vm10, %v1493_v38  ;;  %v13666_v39 = vpop.f32.mrb[25].mxu1 }
 0x524   : > { %v1569_v40 = vpop.f32.mrb[14].mxu0 }
 0x525   : > { %1805 = vst.msk [vmem:[#allocation2 + $0x20] sm:$0xff] %vm523_vm10, %v1569_v40  ;;  %v13671_v41 = vpop.f32.mrb[15].mxu0 }
 0x526   : > { %v2642_v41 = vpop.permute.xlu1 %2641 }
 0x527   : > { %v1645_v42 = vpop.f32.mrb[26].mxu1 }
 0x528   : > { %1806 = vst.msk [vmem:[#allocation2 + $0x28] sm:$0xff] %vm523_vm10, %v1645_v42  ;;  %v1721_v43 = vpop.f32.mrb[16].mxu0  ;;  %v13676_v44 = vpop.f32.mrb[27].mxu1 }
 0x529   : > { %1807 = vst.msk [vmem:[#allocation2 + $0x30] sm:$0xff] %vm523_vm10, %v1721_v43  ;;  %v13681_v45 = vpop.f32.mrb[17].mxu0  ;;  %v2794_v43 = vpop.permute.xlu0 %2793 }
 0x52a   : > { %v2718_v42 = vpop.permute.xlu1 %2717 }
 0x52b   : > { %v1797_v46 = vpop.f32.mrb[28].mxu1 }
 0x52c   : > { %1808 = vst.msk [vmem:[#allocation2 + $0x38] sm:$0xff] %vm523_vm10, %v1797_v46  ;;  %v13686_v47 = vpop.f32.mrb[29].mxu1 }
 0x52d   : > { %v2946_v45 = vpop.permute.xlu0 %2945 }
 0x52e   : > { %v2870_v44 = vpop.permute.xlu1 %2869 }
 0x52f   : > { %v1883_v48 = vpop.f32.mrb[18].mxu0 }
 0x530   : > { %v2433_v50 = vmul.f32 1.442695, %v1883_v48  ;;  %v13691_v51 = vpop.f32.mrb[19].mxu0 }
 0x531   : > { %v15563_v47 = vpop.permute.xlu0 %3140 }
 0x532   : > { %14614 = vpow2.f32 %v2433_v50  ;;  %v1961_v52 = vpop.f32.mrb[30].mxu1  ;;  %v15561_v46 = vpop.permute.xlu1 %3021 }
 0x533   : > { %v2435_v53 = vmul.f32 1.442695, %v1961_v52  ;;  %v2039_v56 = vpop.f32.mrb[20].mxu0  ;;  %v13696_v49 = vpop.f32.mrb[31].mxu1 }
 0x534   : > { %v2437_v57 = vmul.f32 1.442695, %v2039_v56  ;;  %v13701_v58 = vpop.f32.mrb[21].mxu0 }
 0x535   : > { %14616 = vpow2.f32 %v2435_v53  ;;  %v15567_v50 = vpop.permute.xlu0 %3138 }
 0x536   : > { %14618 = vpow2.f32 %v2437_v57  ;;  %v2117_v59 = vpop.f32.mrb[32].mxu1  ;;  %v15565_v48 = vpop.permute.xlu1 %3218 }
 0x537   : > { %v2439_v62 = vmul.f32 1.442695, %v2117_v59  ;;  %v2195_v63 = vpop.f32.mrb[22].mxu0  ;;  %v13706_v0 = vpop.f32.mrb[33].mxu1 }
 0x538   : > { %v2441_v1 = vmul.f32 1.442695, %v2195_v63  ;;  %v13711_v4 = vpop.f32.mrb[23].mxu0 }
 0x539   : > { %14620 = vpow2.f32 %v2439_v62  ;;  %v15571_v52 = vpop.permute.xlu0 %3296 }
 0x53a   : > { %14622 = vpow2.f32 %v2441_v1  ;;  %v2273_v5 = vpop.f32.mrb[34].mxu1  ;;  %v15569_v51 = vpop.permute.xlu1 %3216 }
 0x53b   : > { %v2443_v6 = vmul.f32 1.442695, %v2273_v5  ;;  %v2351_v7 = vpop.f32.mrb[24].mxu0  ;;  %v13716_v11 = vpop.f32.mrb[35].mxu1 }
 0x53c   : > { %v15481_v12 = vpop.eup %14614  ;;  %v2445_v14 = vmul.f32 1.442695, %v2351_v7  ;;  %v13721_v18 = vpop.f32.mrb[25].mxu0 }
 0x53d   : > { %14624 = vpow2.f32 %v2443_v6  ;;  %v2449_v20 = vsel %vm523_vm10, %v15481_v12, 0.0 }
 0x53e   : > { %14626 = vpow2.f32 %v2445_v14  ;;  %2450 = vadd.xlane.f32.xlu0 %v2449_v20  ;;  %v2429_v22 = vpop.f32.mrb[36].mxu1  ;;  %v15573_v53 = vpop.permute.xlu1 %3374 }
 0x53f   : > { %v15485_v16 = vpop.eup %14616  ;;  %v2447_v24 = vmul.f32 1.442695, %v2429_v22  ;;  %v13726_v26 = vpop.f32.mrb[37].mxu1 }
 0x540   : > { %v15487_v28 = vpop.eup %14618  ;;  %v2452_v29 = vsel %vm523_vm10, %v15485_v16, 0.0 }
 0x541   : > { %14628 = vpow2.f32 %v2447_v24  ;;  %2453 = vadd.xlane.f32.xlu1 %v2452_v29  ;;  %v2455_v30 = vsel %vm523_vm10, %v15487_v28, 0.0 }
 0x542   : > { %2456 = vadd.xlane.f32.xlu0 %v2455_v30 }
 0x543   : > { %v15493_v31 = vpop.eup %14620 }
 0x544   : > { %v15495_v32 = vpop.eup %14622  ;;  %v2458_v33 = vsel %vm523_vm10, %v15493_v31, 0.0 }
 0x545   : > { %v2461_v34 = vsel %vm523_vm10, %v15495_v32, 0.0 }
 0x546   : > { %2459 = vadd.xlane.f32.xlu0 %v2458_v33  ;;  %2462 = vadd.xlane.f32.xlu1 %v2461_v34 }
 0x547   : > { %v15501_v35 = vpop.eup %14624 }
 0x548   : > { %v15503_v36 = vpop.eup %14626  ;;  %v2464_v37 = vsel %vm523_vm10, %v15501_v35, 0.0 }
 0x549   : > { %v2467_v38 = vsel %vm523_vm10, %v15503_v36, 0.0 }
 0x54a   : > { %2465 = vadd.xlane.f32.xlu0 %v2464_v37  ;;  %2468 = vadd.xlane.f32.xlu1 %v2467_v38 }
 0x54b   : > { %v15509_v39 = vpop.eup %14628 }
 0x54c   : > { %v2470_v40 = vsel %vm523_vm10, %v15509_v39, 0.0 }
 0x54e   : > { %2471 = vadd.xlane.f32.xlu0 %v2470_v40 }
 0x55b   : > { %3372 = vrot.lane.b32.xlu1 %v15190_v17, %s14976_s17 }
 0x55f   : > { %3530 = vrot.lane.b32.xlu1 %v15198_v21, %s14975_s11 }
 0x563   : > { %3528 = vrot.lane.b32.xlu1 %v15198_v21, %s14976_s17 }
 0x564   : > { %3294 = vrot.lane.b32.xlu0 %v15192_v19, %s14976_s17 }
 0x567   : > { %3686 = vrot.lane.b32.xlu1 %v15206_v25, %s14975_s11 }
 0x568   : > { %3452 = vrot.lane.b32.xlu0 %v15200_v23, %s14975_s11 }
 0x56b   : > { %3684 = vrot.lane.b32.xlu1 %v15206_v25, %s14976_s17 }
 0x56c   : > { %3450 = vrot.lane.b32.xlu0 %v15200_v23, %s14976_s17 }
 0x56f   : > { %3818 = vrot.lane.b32.xlu1 %v15184_v15, %s14977_s20 }
 0x570   : > { %3608 = vrot.lane.b32.xlu0 %v15208_v27, %s14975_s11 }
 0x573   : > { %3970 = vrot.lane.b32.xlu1 %v15192_v19, %s14977_s20 }
 0x574   : > { %3606 = vrot.lane.b32.xlu0 %v15208_v27, %s14976_s17 }
 0x577   : > { %4046 = vrot.lane.b32.xlu1 %v15190_v17, %s14977_s20 }
 0x578   : > { %3894 = vrot.lane.b32.xlu0 %v15182_v13, %s14977_s20 }
 0x57b   : > { %4198 = vrot.lane.b32.xlu1 %v15198_v21, %s14977_s20 }
 0x57c   : > { %4122 = vrot.lane.b32.xlu0 %v15200_v23, %s14977_s20 }
 0x57f   : > { %4350 = vrot.lane.b32.xlu1 %v15206_v25, %s14977_s20 }
 0x580   : > { %4274 = vrot.lane.b32.xlu0 %v15208_v27, %s14977_s20 }
 0x583   : > { %4547 = vrot.lane.b32.xlu1 %v15182_v13, %s17584_s19 }
 0x584   : > { %4469 = vrot.lane.b32.xlu0 %v15184_v15, %s17584_s19 }
 0x587   : > { %4545 = vrot.lane.b32.xlu1 %v15182_v13, %s17578_s25 }
 0x588   : > { %4467 = vrot.lane.b32.xlu0 %v15184_v15, %s17578_s25 }
 0x58b   : > { %4703 = vrot.lane.b32.xlu1 %v15190_v17, %s17584_s19 }
 0x58c   : > { %4625 = vrot.lane.b32.xlu0 %v15192_v19, %s17584_s19 }
 0x5cb   : > { %v2451_v56 = vpop.xlane.xlu0 %2450 }
 0x5cc   : > { %14630 = vrcp.f32 %v2451_v56 }
 0x5ce   : > { %v2454_v49 = vpop.xlane.xlu1 %2453 }
 0x5cf   : > { %14632 = vrcp.f32 %v2454_v49  ;;  %v2457_v57 = vpop.xlane.xlu0 %2456 }
 0x5d0   : > { %14634 = vrcp.f32 %v2457_v57 }
 0x5d3   : > { %v2463_v58 = vpop.xlane.xlu1 %2462  ;;  %v2460_v59 = vpop.xlane.xlu0 %2459 }
 0x5d4   : > { %14636 = vrcp.f32 %v2463_v58 }
 0x5d5   : > { %14638 = vrcp.f32 %v2460_v59 }
 0x5d6   : > { %v14631_v62 = vpop.eup %14630 }
 0x5d7   : > { %v2469_v63 = vpop.xlane.xlu1 %2468  ;;  %v2466_v0 = vpop.xlane.xlu0 %2465  ;;  %v2481_v1 = vmul.f32 %v14631_v62, %v15481_v12 }
 0x5d8   : > { %14640 = vrcp.f32 %v2469_v63 }
 0x5d9   : > { %v14633_v4 = vpop.eup %14632  ;;  %14642 = vrcp.f32 %v2466_v0  ;;  %13730 = vmatmul.mubr.msk.f32.vlgmr.msra.gmra.mrb[26].mxu0 %vm523_vm10, %v2481_v1 }
 0x5da   : > { %v14635_v5 = vpop.eup %14634  ;;  %13738 = vmatpush3.msra.mxu0 %v2642_v41  ;;  %13739 = vmatprep.mubr.msk.f32.mxu0 %vm14969_vm9, %v14968_v10  ;;  %v2482_v6 = vmul.f32 %v14633_v4, %v15485_v16 }
 0x5db   : > { %v15580_v7 = vpop.permute.xlu1 %3372  ;;  %v2472_v11 = vpop.xlane.xlu0 %2471  ;;  %13747 = vmatprep.subr.mxu0 %v14968_v10  ;;  %v2483_v14 = vmul.f32 %v14635_v5, %v15487_v28 }
 0x5dc   : > { %14644 = vrcp.f32 %v2472_v11  ;;  %13735 = vmatmul.mubr.msk.f32.vlgmr.msra.gmra.mrb[38].mxu1 %vm523_vm10, %v2482_v6 }
 0x5dd   : > { %13740 = vmatmul.mubr.msk.f32.vlgmr.msra.gmra.mrb[28].mxu0 %vm523_vm10, %v2483_v14  ;;  %13743 = vmatpush3.msra.mxu1 %v2718_v42 }
 0x5de   : > { %v14637_v12 = vpop.eup %14636  ;;  %13748 = vmatpush3.msra.mxu0 %v2794_v43  ;;  %13744 = vmatprep.mubr.msk.f32.mxu1 %vm14969_vm9, %v14968_v10 }
 0x5df   : > { %v14639_v18 = vpop.eup %14638  ;;  %v3295_v20 = vpop.permute.xlu0 %3294  ;;  %13749 = vmatprep.mubr.msk.f32.mxu0 %vm14969_vm9, %v14968_v10  ;;  %13752 = vmatprep.subr.mxu1 %v14968_v10  ;;  %v2485_v22 = vmul.f32 %v14637_v12, %v15495_v32 }
 0x5e0   : > { %v3531_v16 = vpop.permute.xlu1 %3530  ;;  %13757 = vmatprep.subr.mxu0 %v14968_v10  ;;  %v2484_v24 = vmul.f32 %v14639_v18, %v15493_v31 }
 0x5e1   : > { %13750 = vmatmul.mubr.msk.f32.vlgmr.msra.gmra.mrb[30].mxu0 %vm523_vm10, %v2485_v22 }
 0x5e2   : > { %v14641_v26 = vpop.eup %14640  ;;  %13745 = vmatmul.mubr.msk.f32.vlgmr.msra.gmra.mrb[40].mxu1 %vm523_vm10, %v2484_v24  ;;  %13758 = vmatpush3.msra.mxu0 %v2946_v45 }
 0x5e3   : > { %v14643_v28 = vpop.eup %14642  ;;  %13753 = vmatpush3.msra.mxu1 %v2870_v44  ;;  %13754 = vmatprep.mubr.msk.f32.mxu1 %vm14969_vm9, %v14968_v10  ;;  %v2487_v29 = vmul.f32 %v14641_v26, %v15503_v36  ;;  %v3453_v31 = vpop.permute.xlu0 %3452 }
 0x5e4   : > { %13759 = vmatprep.mubr.msk.f32.mxu0 %vm14969_vm9, %v14968_v10  ;;  %13762 = vmatprep.subr.mxu1 %v14968_v10  ;;  %v2486_v30 = vmul.f32 %v14643_v28, %v15501_v35  ;;  %v3529_v33 = vpop.permute.xlu1 %3528 }
 0x5e5   : > { %13760 = vmatmul.mubr.msk.f32.vlgmr.msra.gmra.mrb[32].mxu0 %vm523_vm10, %v2487_v29  ;;  %13767 = vmatprep.subr.mxu0 %v14968_v10 }
 0x5e6   : > { %v14645_v32 = vpop.eup %14644  ;;  %13755 = vmatmul.mubr.msk.f32.vlgmr.msra.gmra.mrb[42].mxu1 %vm523_vm10, %v2486_v30  ;;  %13769 = vmatprep.mubr.msk.f32.mxu0 %vm14969_vm9, %v14968_v10 }
 0x5e7   : > { %13763 = vmatpush3.msra.mxu1 %v15561_v46  ;;  %13764 = vmatprep.mubr.msk.f32.mxu1 %vm14969_vm9, %v14968_v10  ;;  %v2488_v34 = vmul.f32 %v14645_v32, %v15509_v39  ;;  %v3451_v35 = vpop.permute.xlu0 %3450 }
 0x5e8   : > { %13772 = vmatprep.subr.mxu1 %v14968_v10  ;;  %v3687_v36 = vpop.permute.xlu1 %3686 }
 0x5e9   : > { %13768 = vmatpush3.xpose.msk.msra.mxu0 %vm523_vm10, %v15563_v47 }
 0x5ea   : > { %13765 = vmatmul.mubr.msk.f32.vlgmr.msra.gmra.mrb[44].mxu1 %vm523_vm10, %v2488_v34  ;;  %13777 = vmatprep.subr.mxu0 %v14968_v10 }
 0x5eb   : > { %13774 = vmatprep.mubr.msk.f32.mxu1 %vm14969_vm9, %v14968_v10  ;;  %v3609_v37 = vpop.permute.xlu0 %3608 }
 0x5ec   : > { %13770 = vmatmul.mubr.msk.f32.vlgmr.msra.gmra.mrb[34].mxu0 %vm523_vm10, %v15567_v50  ;;  %v3685_v38 = vpop.permute.xlu1 %3684 }
 0x5ed   : > { %13778 = vmatpush3.xpose.msk.msra.mxu0 %vm523_vm10, %v15571_v52  ;;  %13779 = vmatprep.mubr.msk.f32.mxu0 %vm14969_vm9, %v14968_v10 }
 0x5ee   : > { %13773 = vmatpush3.xpose.msk.msra.mxu1 %vm523_vm10, %v15565_v48  ;;  %13787 = vmatprep.subr.mxu0 %v14968_v10 }
 0x5ef   : > { %13782 = vmatprep.subr.mxu1 %v14968_v10  ;;  %v3607_v39 = vpop.permute.xlu0 %3606 }
 0x5f0   : > { %13780 = vmatmul.mubr.msk.f32.vlgmr.msra.gmra.mrb[36].mxu0 %vm523_vm10, %v3295_v20  ;;  %v3819_v40 = vpop.permute.xlu1 %3818 }
 0x5f1   : > { %13775 = vmatmul.mubr.msk.f32.vlgmr.msra.gmra.mrb[46].mxu1 %vm523_vm10, %v15569_v51  ;;  %13788 = vmatpush3.xpose.msk.msra.mxu0 %vm523_vm10, %v3453_v31 }
 0x5f2   : > { %13783 = vmatpush3.xpose.msk.msra.mxu1 %vm523_vm10, %v15573_v53  ;;  %13784 = vmatprep.mubr.msk.f32.mxu1 %vm14969_vm9, %v14968_v10 }
 0x5f3   : > { %13789 = vmatprep.mubr.msk.f32.mxu0 %vm14969_vm9, %v14968_v10  ;;  %13792 = vmatprep.subr.mxu1 %v14968_v10  ;;  %v3895_v41 = vpop.permute.xlu0 %3894 }
 0x5f4   : > { %13790 = vmatmul.mubr.msk.f32.vlgmr.msra.gmra.mrb[38].mxu0 %vm523_vm10, %v3451_v35  ;;  %13797 = vmatprep.subr.mxu0 %v14968_v10 }
 0x5f5   : > { %13785 = vmatmul.mubr.msk.f32.vlgmr.msra.gmra.mrb[48].mxu1 %vm523_vm10, %v15580_v7  ;;  %13798 = vmatpush3.xpose.msk.msra.mxu0 %vm523_vm10, %v3609_v37 }
 0x5f6   : > { %13793 = vmatpush3.xpose.msk.msra.mxu1 %vm523_vm10, %v3531_v16  ;;  %13794 = vmatprep.mubr.msk.f32.mxu1 %vm14969_vm9, %v14968_v10 }
 0x5f7   : > { %13799 = vmatprep.mubr.msk.f32.mxu0 %vm14969_vm9, %v14968_v10  ;;  %13802 = vmatprep.subr.mxu1 %v14968_v10 }
 0x5f8   : > { %13800 = vmatmul.mubr.msk.f32.vlgmr.msra.gmra.mrb[40].mxu0 %vm523_vm10, %v3607_v39  ;;  %13807 = vmatprep.subr.mxu0 %v14968_v10 }
 0x5f9   : > { %13795 = vmatmul.mubr.msk.f32.vlgmr.msra.gmra.mrb[50].mxu1 %vm523_vm10, %v3529_v33  ;;  %13808 = vmatpush3.msra.mxu0 %v3819_v40 }
 0x5fa   : > { %13803 = vmatpush3.xpose.msk.msra.mxu1 %vm523_vm10, %v3687_v36  ;;  %13804 = vmatprep.mubr.msk.f32.mxu1 %vm14969_vm9, %v14968_v10 }
 0x5fb   : > { %13812 = vmatprep.subr.mxu1 %v14968_v10  ;;  %13809 = vmatprep.mubr.msk.f32.mxu0 %vm14969_vm9, %v14968_v10 }
 0x5fc   : > { %13817 = vmatprep.subr.mxu0 %v14968_v10 }
 0x5fd   : > { %13805 = vmatmul.mubr.msk.f32.vlgmr.msra.gmra.mrb[52].mxu1 %vm523_vm10, %v3685_v38 }
 0x5fe   : > { %13813 = vmatpush3.msra.mxu1 %v3895_v41  ;;  %13814 = vmatprep.mubr.msk.f32.mxu1 %vm14969_vm9, %v14968_v10 }
 0x5ff   : > { %13822 = vmatprep.subr.mxu1 %v14968_v10 }
 0x6ac   : > { %v15665_v42 = vpop.f32.mrb[26].mxu0 }
 0x6ad   : > { %v13731_v43 = vpop.f32.mrb[27].mxu0 }
 0x6af   : > { %v15667_v44 = vpop.f32.mrb[38].mxu1 }
 0x6b0   : > { %v15669_v45 = vpop.f32.mrb[28].mxu0  ;;  %v13736_v46 = vpop.f32.mrb[39].mxu1 }
 0x6b1   : > { %v13741_v47 = vpop.f32.mrb[29].mxu0 }
 0x6b4   : > { %v15671_v48 = vpop.f32.mrb[30].mxu0 }
 0x6b5   : > { %v15673_v50 = vpop.f32.mrb[40].mxu1  ;;  %v13751_v51 = vpop.f32.mrb[31].mxu0 }
 0x6b6   : > { %v13746_v52 = vpop.f32.mrb[41].mxu1 }
 0x6b8   : > { %v15675_v53 = vpop.f32.mrb[32].mxu0 }
 0x6b9   : > { %v15677_v56 = vpop.f32.mrb[42].mxu1  ;;  %v13761_v49 = vpop.f32.mrb[33].mxu0 }
 0x6ba   : > { %v13756_v57 = vpop.f32.mrb[43].mxu1 }
 0x6bd   : > { %v15679_v58 = vpop.f32.mrb[44].mxu1 }
 0x6be   : > { %v13766_v59 = vpop.f32.mrb[45].mxu1 }
 0x6bf   : > { %v3212_v62 = vpop.f32.mrb[34].mxu0 }
 0x6c0   : > { %v3762_v63 = vmul.f32 1.442695, %v3212_v62  ;;  %v13771_v0 = vpop.f32.mrb[35].mxu0 }
 0x6c1   : > { %v4123_v0 = vpop.permute.xlu0 %4122 }
 0x6c2   : > { %14646 = vpow2.f32 %v3762_v63 }
 0x6c3   : > { %v3368_v1 = vpop.f32.mrb[36].mxu0 }
 0x6c4   : > { %v3290_v4 = vpop.f32.mrb[46].mxu1  ;;  %v3766_v5 = vmul.f32 1.442695, %v3368_v1  ;;  %v13781_v6 = vpop.f32.mrb[37].mxu0 }
 0x6c5   : > { %v3764_v7 = vmul.f32 1.442695, %v3290_v4  ;;  %v13776_v11 = vpop.f32.mrb[47].mxu1 }
 0x6c6   : > { %14648 = vpow2.f32 %v3766_v5 }
 0x6c7   : > { %14650 = vpow2.f32 %v3764_v7  ;;  %v3524_v14 = vpop.f32.mrb[38].mxu0 }
 0x6c8   : > { %v3446_v12 = vpop.f32.mrb[48].mxu1  ;;  %v3770_v18 = vmul.f32 1.442695, %v3524_v14  ;;  %v13791_v20 = vpop.f32.mrb[39].mxu0 }
 0x6c9   : > { %v3768_v22 = vmul.f32 1.442695, %v3446_v12  ;;  %v13786_v16 = vpop.f32.mrb[49].mxu1 }
 0x6ca   : > { %14652 = vpow2.f32 %v3770_v18 }
 0x6cb   : > { %14654 = vpow2.f32 %v3768_v22  ;;  %v3680_v24 = vpop.f32.mrb[40].mxu0 }
 0x6cc   : > { %v15681_v26 = vpop.eup %14646  ;;  %v3602_v28 = vpop.f32.mrb[50].mxu1  ;;  %v3774_v29 = vmul.f32 1.442695, %v3680_v24 }
 0x6cd   : > { %v13801_v30 = vpop.f32.mrb[41].mxu0  ;;  %v3772_v31 = vmul.f32 1.442695, %v3602_v28  ;;  %v13796_v32 = vpop.f32.mrb[51].mxu1  ;;  %v3778_v33 = vsel %vm523_vm10, %v15681_v26, 0.0 }
 0x6ce   : > { %14656 = vpow2.f32 %v3774_v29  ;;  %3779 = vadd.xlane.f32.xlu0 %v3778_v33 }
 0x6cf   : > { %14658 = vpow2.f32 %v3772_v31 }
 0x6d0   : > { %v15685_v34 = vpop.eup %14648  ;;  %v3758_v35 = vpop.f32.mrb[52].mxu1 }
 0x6d1   : > { %v15687_v36 = vpop.eup %14650  ;;  %v3776_v37 = vmul.f32 1.442695, %v3758_v35  ;;  %v13806_v38 = vpop.f32.mrb[53].mxu1  ;;  %v3784_v39 = vsel %vm523_vm10, %v15685_v34, 0.0 }
 0x6d2   : > { %v3781_v40 = vsel %vm523_vm10, %v15687_v36, 0.0  ;;  %3785 = vadd.xlane.f32.xlu0 %v3784_v39 }
 0x6d3   : > { %14660 = vpow2.f32 %v3776_v37  ;;  %3782 = vadd.xlane.f32.xlu1 %v3781_v40 }
 0x6d4   : > { %v15693_v41 = vpop.eup %14652 }
 0x6d5   : > { %v15695_v43 = vpop.eup %14654  ;;  %v3790_v46 = vsel %vm523_vm10, %v15693_v41, 0.0 }
 0x6d6   : > { %v3787_v47 = vsel %vm523_vm10, %v15695_v43, 0.0 }
 0x6d7   : > { %3788 = vadd.xlane.f32.xlu0 %v3787_v47  ;;  %3791 = vadd.xlane.f32.xlu1 %v3790_v46 }
 0x6d8   : > { %v15701_v51 = vpop.eup %14656 }
 0x6d9   : > { %v15703_v52 = vpop.eup %14658  ;;  %v3796_v49 = vsel %vm523_vm10, %v15701_v51, 0.0 }
 0x6da   : > { %v3793_v57 = vsel %vm523_vm10, %v15703_v52, 0.0 }
 0x6db   : > { %3794 = vadd.xlane.f32.xlu0 %v3793_v57  ;;  %3797 = vadd.xlane.f32.xlu1 %v3796_v49 }
 0x6dd   : > { %v15709_v59 = vpop.eup %14660 }
 0x6de   : > { %v3799_v62 = vsel %vm523_vm10, %v15709_v59, 0.0 }
 0x6df   : > { %3800 = vadd.xlane.f32.xlu0 %v3799_v62 }
 0x6ec   : > { %4701 = vrot.lane.b32.xlu1 %v15190_v17, %s17578_s25 }
 0x6f0   : > { %4859 = vrot.lane.b32.xlu1 %v15198_v21, %s17584_s19 }
 0x6f4   : > { %4857 = vrot.lane.b32.xlu1 %v15198_v21, %s17578_s25 }
 0x6f5   : > { %4623 = vrot.lane.b32.xlu0 %v15192_v19, %s17578_s25 }
 0x6f8   : > { %5015 = vrot.lane.b32.xlu1 %v15206_v25, %s17584_s19 }
 0x6f9   : > { %4781 = vrot.lane.b32.xlu0 %v15200_v23, %s17584_s19 }
 0x6fc   : > { %5013 = vrot.lane.b32.xlu1 %v15206_v25, %s17578_s25 }
 0x6fd   : > { %4779 = vrot.lane.b32.xlu0 %v15200_v23, %s17578_s25 }
 0x700   : > { %5147 = vrot.lane.b32.xlu1 %v15184_v15, %s17576_s26  ;;  %v3971_v15 = vpop.permute.xlu1 %3970 }
 0x701   : > { %4937 = vrot.lane.b32.xlu0 %v15208_v27, %s17584_s19 }
 0x704   : > { %5299 = vrot.lane.b32.xlu1 %v15192_v19, %s17576_s26  ;;  %v4047_v63 = vpop.permute.xlu1 %4046  ;;  %v4275_v19 = vpop.permute.xlu0 %4274 }
 0x705   : > { %4935 = vrot.lane.b32.xlu0 %v15208_v27, %s17578_s25 }
 0x708   : > { %5375 = vrot.lane.b32.xlu1 %v15190_v17, %s17576_s26  ;;  %v4199_v1 = vpop.permute.xlu1 %4198  ;;  %v15747_v5 = vpop.permute.xlu0 %4469 }
 0x709   : > { %5223 = vrot.lane.b32.xlu0 %v15182_v13, %s17576_s26 }
 0x70c   : > { %5527 = vrot.lane.b32.xlu1 %v15198_v21, %s17576_s26  ;;  %v15745_v4 = vpop.permute.xlu1 %4350  ;;  %v15751_v17 = vpop.permute.xlu0 %4467 }
 0x70d   : > { %5451 = vrot.lane.b32.xlu0 %v15200_v23, %s17576_s26 }
 0x710   : > { %v15749_v6 = vpop.permute.xlu1 %4547  ;;  %v15755_v7 = vpop.permute.xlu0 %4625 }
 0x714   : > { %v15753_v13 = vpop.permute.xlu1 %4545 }
 0x718   : > { %v15757_v11 = vpop.permute.xlu1 %4703 }
 0x75b   : > { %v3780_v21 = vpop.xlane.xlu0 %3779 }
 0x75c   : > { %14662 = vrcp.f32 %v3780_v21 }
 0x75f   : > { %v3786_v23 = vpop.xlane.xlu0 %3785 }
 0x760   : > { %v3783_v14 = vpop.xlane.xlu1 %3782  ;;  %14664 = vrcp.f32 %v3786_v23 }
 0x761   : > { %14666 = vrcp.f32 %v3783_v14 }
 0x764   : > { %v3792_v12 = vpop.xlane.xlu1 %3791  ;;  %v3789_v18 = vpop.xlane.xlu0 %3788 }
 0x765   : > { %14668 = vrcp.f32 %v3792_v12 }
 0x766   : > { %v14663_v20 = vpop.eup %14662  ;;  %14670 = vrcp.f32 %v3789_v18 }
 0x767   : > { %v3810_v22 = vmul.f32 %v14663_v20, %v15681_v26 }
 0x768   : > { %v3798_v16 = vpop.xlane.xlu1 %3797  ;;  %v3795_v24 = vpop.xlane.xlu0 %3794 }
 0x769   : > { %14672 = vrcp.f32 %v3798_v16  ;;  %13810 = vmatmul.mubr.msk.f32.vlgmr.msra.gmra.mrb[42].mxu0 %vm523_vm10, %v3810_v22 }
 0x76a   : > { %v14665_v28 = vpop.eup %14664  ;;  %14674 = vrcp.f32 %v3795_v24  ;;  %13818 = vmatpush3.msra.mxu0 %v3971_v15  ;;  %13819 = vmatprep.mubr.msk.f32.mxu0 %vm14969_vm9, %v14968_v10 }
 0x76b   : > { %v14667_v29 = vpop.eup %14666  ;;  %13827 = vmatprep.subr.mxu0 %v14968_v10  ;;  %v3812_v30 = vmul.f32 %v14665_v28, %v15685_v34 }
 0x76c   : > { %v15765_v31 = vpop.permute.xlu1 %4701  ;;  %v3801_v32 = vpop.xlane.xlu0 %3800  ;;  %v3811_v26 = vmul.f32 %v14667_v29, %v15687_v36 }
 0x76d   : > { %14676 = vrcp.f32 %v3801_v32  ;;  %13820 = vmatmul.mubr.msk.f32.vlgmr.msra.gmra.mrb[44].mxu0 %vm523_vm10, %v3812_v30 }
 0x76e   : > { %13815 = vmatmul.mubr.msk.f32.vlgmr.msra.gmra.mrb[54].mxu1 %vm523_vm10, %v3811_v26  ;;  %13828 = vmatpush3.msra.mxu0 %v4123_v0 }
 0x76f   : > { %v14669_v33 = vpop.eup %14668  ;;  %13823 = vmatpush3.msra.mxu1 %v4047_v63  ;;  %13824 = vmatprep.mubr.msk.f32.mxu1 %vm14969_vm9, %v14968_v10 }
 0x770   : > { %v14671_v35 = vpop.eup %14670  ;;  %v4624_v37 = vpop.permute.xlu0 %4623  ;;  %13829 = vmatprep.mubr.msk.f32.mxu0 %vm14969_vm9, %v14968_v10  ;;  %13832 = vmatprep.subr.mxu1 %v14968_v10  ;;  %v3814_v34 = vmul.f32 %v14669_v33, %v15693_v41 }
 0x771   : > { %v4860_v36 = vpop.permute.xlu1 %4859  ;;  %13837 = vmatprep.subr.mxu0 %v14968_v10  ;;  %v3813_v38 = vmul.f32 %v14671_v35, %v15695_v43 }
 0x772   : > { %13830 = vmatmul.mubr.msk.f32.vlgmr.msra.gmra.mrb[46].mxu0 %vm523_vm10, %v3814_v34 }
 0x773   : > { %v14673_v39 = vpop.eup %14672  ;;  %13825 = vmatmul.mubr.msk.f32.vlgmr.msra.gmra.mrb[56].mxu1 %vm523_vm10, %v3813_v38  ;;  %13838 = vmatpush3.msra.mxu0 %v4275_v19 }
 0x774   : > { %v14675_v40 = vpop.eup %14674  ;;  %13833 = vmatpush3.msra.mxu1 %v4199_v1  ;;  %13834 = vmatprep.mubr.msk.f32.mxu1 %vm14969_vm9, %v14968_v10  ;;  %v3816_v46 = vmul.f32 %v14673_v39, %v15701_v51  ;;  %v4782_v43 = vpop.permute.xlu0 %4781 }
 0x775   : > { %13839 = vmatprep.mubr.msk.f32.mxu0 %vm14969_vm9, %v14968_v10  ;;  %13842 = vmatprep.subr.mxu1 %v14968_v10  ;;  %v3815_v41 = vmul.f32 %v14675_v40, %v15703_v52  ;;  %v4858_v49 = vpop.permute.xlu1 %4857 }
 0x776   : > { %13840 = vmatmul.mubr.msk.f32.vlgmr.msra.gmra.mrb[48].mxu0 %vm523_vm10, %v3816_v46  ;;  %13847 = vmatprep.subr.mxu0 %v14968_v10 }
 0x777   : > { %v14677_v47 = vpop.eup %14676  ;;  %13835 = vmatmul.mubr.msk.f32.vlgmr.msra.gmra.mrb[58].mxu1 %vm523_vm10, %v3815_v41  ;;  %13849 = vmatprep.mubr.msk.f32.mxu0 %vm14969_vm9, %v14968_v10 }
 0x778   : > { %13843 = vmatpush3.msra.mxu1 %v15745_v4  ;;  %13844 = vmatprep.mubr.msk.f32.mxu1 %vm14969_vm9, %v14968_v10  ;;  %v3817_v51 = vmul.f32 %v14677_v47, %v15709_v59  ;;  %v4780_v52 = vpop.permute.xlu0 %4779 }
 0x779   : > { %13852 = vmatprep.subr.mxu1 %v14968_v10  ;;  %v5016_v57 = vpop.permute.xlu1 %5015 }
 0x77a   : > { %13848 = vmatpush3.xpose.msk.msra.mxu0 %vm523_vm10, %v15747_v5 }
 0x77b   : > { %13845 = vmatmul.mubr.msk.f32.vlgmr.msra.gmra.mrb[60].mxu1 %vm523_vm10, %v3817_v51  ;;  %13857 = vmatprep.subr.mxu0 %v14968_v10 }
 0x77c   : > { %13854 = vmatprep.mubr.msk.f32.mxu1 %vm14969_vm9, %v14968_v10  ;;  %v4938_v59 = vpop.permute.xlu0 %4937 }
 0x77d   : > { %13850 = vmatmul.mubr.msk.f32.vlgmr.msra.gmra.mrb[50].mxu0 %vm523_vm10, %v15751_v17  ;;  %v5014_v62 = vpop.permute.xlu1 %5013 }
 0x77e   : > { %13858 = vmatpush3.xpose.msk.msra.mxu0 %vm523_vm10, %v15755_v7  ;;  %13859 = vmatprep.mubr.msk.f32.mxu0 %vm14969_vm9, %v14968_v10 }
 0x77f   : > { %13853 = vmatpush3.xpose.msk.msra.mxu1 %vm523_vm10, %v15749_v6  ;;  %13867 = vmatprep.subr.mxu0 %v14968_v10 }
 0x780   : > { %13862 = vmatprep.subr.mxu1 %v14968_v10  ;;  %v4936_v15 = vpop.permute.xlu0 %4935 }
 0x781   : > { %13860 = vmatmul.mubr.msk.f32.vlgmr.msra.gmra.mrb[52].mxu0 %vm523_vm10, %v4624_v37  ;;  %v5148_v63 = vpop.permute.xlu1 %5147 }
 0x782   : > { %13855 = vmatmul.mubr.msk.f32.vlgmr.msra.gmra.mrb[62].mxu1 %vm523_vm10, %v15753_v13  ;;  %13868 = vmatpush3.xpose.msk.msra.mxu0 %vm523_vm10, %v4782_v43 }
 0x783   : > { %13863 = vmatpush3.xpose.msk.msra.mxu1 %vm523_vm10, %v15757_v11  ;;  %13864 = vmatprep.mubr.msk.f32.mxu1 %vm14969_vm9, %v14968_v10 }
 0x784   : > { %13869 = vmatprep.mubr.msk.f32.mxu0 %vm14969_vm9, %v14968_v10  ;;  %13872 = vmatprep.subr.mxu1 %v14968_v10  ;;  %v5224_v0 = vpop.permute.xlu0 %5223 }
 0x785   : > { %13870 = vmatmul.mubr.msk.f32.vlgmr.msra.gmra.mrb[54].mxu0 %vm523_vm10, %v4780_v52  ;;  %13877 = vmatprep.subr.mxu0 %v14968_v10 }
 0x786   : > { %13865 = vmatmul.mubr.msk.f32.vlgmr.msra.gmra.mrb[64].mxu1 %vm523_vm10, %v15765_v31  ;;  %13878 = vmatpush3.xpose.msk.msra.mxu0 %vm523_vm10, %v4938_v59 }
 0x787   : > { %13873 = vmatpush3.xpose.msk.msra.mxu1 %vm523_vm10, %v4860_v36  ;;  %13874 = vmatprep.mubr.msk.f32.mxu1 %vm14969_vm9, %v14968_v10 }
 0x788   : > { %13879 = vmatprep.mubr.msk.f32.mxu0 %vm14969_vm9, %v14968_v10  ;;  %13882 = vmatprep.subr.mxu1 %v14968_v10 }
 0x789   : > { %13880 = vmatmul.mubr.msk.f32.vlgmr.msra.gmra.mrb[56].mxu0 %vm523_vm10, %v4936_v15  ;;  %13887 = vmatprep.subr.mxu0 %v14968_v10 }
 0x78a   : > { %13875 = vmatmul.mubr.msk.f32.vlgmr.msra.gmra.mrb[66].mxu1 %vm523_vm10, %v4858_v49  ;;  %13888 = vmatpush3.msra.mxu0 %v5148_v63 }
 0x78b   : > { %13883 = vmatpush3.xpose.msk.msra.mxu1 %vm523_vm10, %v5016_v57  ;;  %13884 = vmatprep.mubr.msk.f32.mxu1 %vm14969_vm9, %v14968_v10 }
 0x78c   : > { %13892 = vmatprep.subr.mxu1 %v14968_v10  ;;  %13889 = vmatprep.mubr.msk.f32.mxu0 %vm14969_vm9, %v14968_v10 }
 0x78d   : > { %13897 = vmatprep.subr.mxu0 %v14968_v10 }
 0x78e   : > { %13885 = vmatmul.mubr.msk.f32.vlgmr.msra.gmra.mrb[68].mxu1 %vm523_vm10, %v5014_v62 }
 0x78f   : > { %13893 = vmatpush3.msra.mxu1 %v5224_v0  ;;  %13894 = vmatprep.mubr.msk.f32.mxu1 %vm14969_vm9, %v14968_v10 }
 0x790   : > { %13902 = vmatprep.subr.mxu1 %v14968_v10 }
 0x83c   : > { %v15849_v1 = vpop.f32.mrb[42].mxu0 }
 0x83d   : > { %v13811_v19 = vpop.f32.mrb[43].mxu0 }
 0x840   : > { %v15851_v4 = vpop.f32.mrb[44].mxu0 }
 0x841   : > { %v15853_v5 = vpop.f32.mrb[54].mxu1  ;;  %v13821_v6 = vpop.f32.mrb[45].mxu0 }
 0x842   : > { %v13816_v17 = vpop.f32.mrb[55].mxu1 }
 0x845   : > { %v15855_v13 = vpop.f32.mrb[46].mxu0 }
 0x846   : > { %v15857_v7 = vpop.f32.mrb[56].mxu1  ;;  %v13831_v21 = vpop.f32.mrb[47].mxu0 }
 0x847   : > { %v13826_v11 = vpop.f32.mrb[57].mxu1 }
 0x849   : > { %v15859_v23 = vpop.f32.mrb[48].mxu0 }
 0x84a   : > { %v15861_v14 = vpop.f32.mrb[58].mxu1  ;;  %v13841_v12 = vpop.f32.mrb[49].mxu0 }
 0x84b   : > { %v13836_v18 = vpop.f32.mrb[59].mxu1 }
 0x84e   : > { %v15863_v20 = vpop.f32.mrb[60].mxu1 }
 0x84f   : > { %v13846_v22 = vpop.f32.mrb[61].mxu1 }
 0x850   : > { %v4541_v16 = vpop.f32.mrb[50].mxu0 }
 0x851   : > { %v5091_v24 = vmul.f32 1.442695, %v4541_v16  ;;  %v13851_v28 = vpop.f32.mrb[51].mxu0 }
 0x853   : > { %14678 = vpow2.f32 %v5091_v24 }
 0x854   : > { %v4697_v29 = vpop.f32.mrb[52].mxu0 }
 0x855   : > { %v4619_v30 = vpop.f32.mrb[62].mxu1  ;;  %v5095_v31 = vmul.f32 1.442695, %v4697_v29  ;;  %v13861_v32 = vpop.f32.mrb[53].mxu0 }
 0x856   : > { %v5093_v26 = vmul.f32 1.442695, %v4619_v30  ;;  %v13856_v33 = vpop.f32.mrb[63].mxu1 }
 0x857   : > { %14680 = vpow2.f32 %v5095_v31 }
 0x858   : > { %14682 = vpow2.f32 %v5093_v26  ;;  %v4853_v35 = vpop.f32.mrb[54].mxu0 }
 0x859   : > { %v4775_v37 = vpop.f32.mrb[64].mxu1  ;;  %v5099_v34 = vmul.f32 1.442695, %v4853_v35  ;;  %v13871_v36 = vpop.f32.mrb[55].mxu0 }
 0x85a   : > { %v5097_v38 = vmul.f32 1.442695, %v4775_v37  ;;  %v13866_v39 = vpop.f32.mrb[65].mxu1 }
 0x85b   : > { %14684 = vpow2.f32 %v5099_v34 }
 0x85c   : > { %14686 = vpow2.f32 %v5097_v38  ;;  %v5009_v40 = vpop.f32.mrb[56].mxu0 }
 0x85d   : > { %v15865_v46 = vpop.eup %14678  ;;  %v4931_v41 = vpop.f32.mrb[66].mxu1  ;;  %v5103_v43 = vmul.f32 1.442695, %v5009_v40 }
 0x85e   : > { %v13881_v47 = vpop.f32.mrb[57].mxu0  ;;  %v5101_v49 = vmul.f32 1.442695, %v4931_v41  ;;  %v13876_v51 = vpop.f32.mrb[67].mxu1  ;;  %v5107_v52 = vsel %vm523_vm10, %v15865_v46, 0.0 }
 0x85f   : > { %14688 = vpow2.f32 %v5103_v43  ;;  %5108 = vadd.xlane.f32.xlu0 %v5107_v52 }
 0x860   : > { %14690 = vpow2.f32 %v5101_v49 }
 0x861   : > { %v15869_v57 = vpop.eup %14680  ;;  %v5087_v59 = vpop.f32.mrb[68].mxu1 }
 0x862   : > { %v15871_v62 = vpop.eup %14682  ;;  %v5105_v15 = vmul.f32 1.442695, %v5087_v59  ;;  %v13886_v63 = vpop.f32.mrb[69].mxu1  ;;  %v5113_v0 = vsel %vm523_vm10, %v15869_v57, 0.0 }
 0x863   : > { %v5110_v19 = vsel %vm523_vm10, %v15871_v62, 0.0  ;;  %5114 = vadd.xlane.f32.xlu0 %v5113_v0 }
 0x864   : > { %14692 = vpow2.f32 %v5105_v15  ;;  %5111 = vadd.xlane.f32.xlu1 %v5110_v19 }
 0x865   : > { %v15877_v6 = vpop.eup %14684 }
 0x866   : > { %v15879_v17 = vpop.eup %14686  ;;  %v5119_v21 = vsel %vm523_vm10, %v15877_v6, 0.0 }
 0x867   : > { %v5116_v11 = vsel %vm523_vm10, %v15879_v17, 0.0 }
 0x868   : > { %5117 = vadd.xlane.f32.xlu0 %v5116_v11  ;;  %5120 = vadd.xlane.f32.xlu1 %v5119_v21  ;;  %v363_v21 = vld [vmem:[%s17572_s2 + $0x28] sm:$0xff] }
 0x869   : > { %v15885_v12 = vpop.eup %14688 }
 0x86a   : > { %v15887_v18 = vpop.eup %14690  ;;  %v5125_v22 = vsel %vm523_vm10, %v15885_v12, 0.0 }
 0x86b   : > { %v5122_v16 = vsel %vm523_vm10, %v15887_v18, 0.0 }
 0x86c   : > { %5123 = vadd.xlane.f32.xlu0 %v5122_v16  ;;  %5126 = vadd.xlane.f32.xlu1 %v5125_v22 }
 0x86e   : > { %v15893_v24 = vpop.eup %14692 }
 0x86f   : > { %v5128_v28 = vsel %vm523_vm10, %v15893_v24, 0.0 }
 0x870   : > { %5129 = vadd.xlane.f32.xlu0 %v5128_v28 }
 0x87d   : > { %5679 = vrot.lane.b32.xlu1 %v15206_v25, %s17576_s26  ;;  %v5300_v25 = vpop.permute.xlu1 %5299 }
 0x881   : > { %3107 = vrot.lane.b32.xlu1 %v15667_v44, %s17574_s27 }
 0x885   : > { %4436 = vrot.lane.b32.xlu1 %v15853_v5, %s17582_s24 }
 0x886   : > { %5603 = vrot.lane.b32.xlu0 %v15208_v27, %s17576_s26  ;;  %v5376_v27 = vpop.permute.xlu1 %5375 }
 0x889   : > { %3111 = vrot.lane.b32.xlu1 %v15673_v50, %s17574_s27 }
 0x88a   : > { %3105 = vrot.lane.b32.xlu0 %v15665_v42, %s17574_s27  ;;  %v5452_v42 = vpop.permute.xlu0 %5451 }
 0x88d   : > { %4440 = vrot.lane.b32.xlu1 %v15857_v7, %s17582_s24 }
 0x88e   : > { %4434 = vrot.lane.b32.xlu0 %v15849_v1, %s17582_s24 }
 0x891   : > { %3115 = vrot.lane.b32.xlu1 %v15677_v56, %s17574_s27 }
 0x892   : > { %3109 = vrot.lane.b32.xlu0 %v15669_v45, %s17574_s27  ;;  %v5528_v45 = vpop.permute.xlu1 %5527 }
 0x895   : > { %4444 = vrot.lane.b32.xlu1 %v15861_v14, %s17582_s24 }
 0x896   : > { %4438 = vrot.lane.b32.xlu0 %v15851_v4, %s17582_s24 }
 0x899   : > { %3119 = vrot.lane.b32.xlu1 %v15679_v58, %s17574_s27 }
 0x89a   : > { %3113 = vrot.lane.b32.xlu0 %v15671_v48, %s17574_s27 }
 0x89e   : > { %4442 = vrot.lane.b32.xlu0 %v15855_v13, %s17582_s24 }
 0x8a2   : > { %3117 = vrot.lane.b32.xlu0 %v15675_v53, %s17574_s27 }
 0x8ec   : > { %v5109_v44 = vpop.xlane.xlu0 %5108 }
 0x8ed   : > { %14694 = vrcp.f32 %v5109_v44 }
 0x8f0   : > { %v5115_v50 = vpop.xlane.xlu0 %5114 }
 0x8f1   : > { %v5112_v56 = vpop.xlane.xlu1 %5111  ;;  %14696 = vrcp.f32 %v5115_v50 }
 0x8f2   : > { %14698 = vrcp.f32 %v5112_v56 }
 0x8f5   : > { %v5121_v58 = vpop.xlane.xlu1 %5120  ;;  %v5118_v1 = vpop.xlane.xlu0 %5117 }
 0x8f6   : > { %14700 = vrcp.f32 %v5121_v58 }
 0x8f7   : > { %v14695_v48 = vpop.eup %14694  ;;  %14702 = vrcp.f32 %v5118_v1 }
 0x8f8   : > { %v5139_v4 = vmul.f32 %v14695_v48, %v15865_v46 }
 0x8f9   : > { %v5127_v5 = vpop.xlane.xlu1 %5126  ;;  %v5124_v13 = vpop.xlane.xlu0 %5123 }
 0x8fa   : > { %14704 = vrcp.f32 %v5127_v5  ;;  %13890 = vmatmul.mubr.msk.f32.vlgmr.msra.gmra.mrb[58].mxu0 %vm523_vm10, %v5139_v4 }
 0x8fb   : > { %v14697_v53 = vpop.eup %14696  ;;  %14706 = vrcp.f32 %v5124_v13  ;;  %13898 = vmatpush3.msra.mxu0 %v5300_v25  ;;  %13899 = vmatprep.mubr.msk.f32.mxu0 %vm14969_vm9, %v14968_v10 }
 0x8fc   : > { %v14699_v7 = vpop.eup %14698  ;;  %13907 = vmatprep.subr.mxu0 %v14968_v10  ;;  %v5141_v14 = vmul.f32 %v14697_v53, %v15869_v57 }
 0x8fd   : > { %v5680_v29 = vpop.permute.xlu1 %5679  ;;  %v5130_v30 = vpop.xlane.xlu0 %5129  ;;  %v5140_v31 = vmul.f32 %v14699_v7, %v15871_v62 }
 0x8fe   : > { %14708 = vrcp.f32 %v5130_v30  ;;  %13900 = vmatmul.mubr.msk.f32.vlgmr.msra.gmra.mrb[60].mxu0 %vm523_vm10, %v5141_v14 }
 0x8ff   : > { %13895 = vmatmul.mubr.msk.f32.vlgmr.msra.gmra.mrb[70].mxu1 %vm523_vm10, %v5140_v31  ;;  %13908 = vmatpush3.msra.mxu0 %v5452_v42 }
 0x900   : > { %v14701_v32 = vpop.eup %14700  ;;  %13903 = vmatpush3.msra.mxu1 %v5376_v27  ;;  %13904 = vmatprep.mubr.msk.f32.mxu1 %vm14969_vm9, %v14968_v10 }
 0x901   : > { %v14703_v26 = vpop.eup %14702  ;;  %v3108_v33 = vpop.permute.xlu1 %3107  ;;  %13909 = vmatprep.mubr.msk.f32.mxu0 %vm14969_vm9, %v14968_v10  ;;  %13912 = vmatprep.subr.mxu1 %v14968_v10  ;;  %v5143_v37 = vmul.f32 %v14701_v32, %v15877_v6 }
 0x902   : > { %v5604_v35 = vpop.permute.xlu0 %5603  ;;  %3131 = vst.msk [vmem:[#allocation2 + $0x8] sm:$0xff] %vm3129_vm11, %v3108_v33  ;;  %13917 = vmatprep.subr.mxu0 %v14968_v10  ;;  %v5142_v34 = vmul.f32 %v14703_v26, %v15879_v17  ;;  %v362_v17 = vld [vmem:[%s17572_s2 + $0x20] sm:$0xff] }
 0x903   : > { %13910 = vmatmul.mubr.msk.f32.vlgmr.msra.gmra.mrb[62].mxu0 %vm523_vm10, %v5143_v37  ;;  %v14443_v11 = vpack.c.bf16 %v363_v21, %v362_v17 }
 0x904   : > { %v14705_v36 = vpop.eup %14704  ;;  %13905 = vmatmul.mubr.msk.f32.vlgmr.msra.gmra.mrb[72].mxu1 %vm523_vm10, %v5142_v34  ;;  %13918 = vmatpush3.msra.mxu0 %v5604_v35 }
 0x905   : > { %v14707_v38 = vpop.eup %14706  ;;  %13913 = vmatpush3.msra.mxu1 %v5528_v45  ;;  %v4437_v39 = vpop.permute.xlu1 %4436  ;;  %13914 = vmatprep.mubr.msk.f32.mxu1 %vm14969_vm9, %v14968_v10  ;;  %v5145_v46 = vmul.f32 %v14705_v36, %v15885_v12  ;;  %v364_v12 = vld [vmem:[%s17572_s2 + $0x30] sm:$0xff] }
 0x906   : > { %v3106_v40 = vpop.permute.xlu0 %3105  ;;  %4460 = vst.msk [vmem:[#allocation2 + $0x8] sm:$0xff] %vm4458_vm12, %v4437_v39  ;;  %13919 = vmatprep.mubr.msk.f32.mxu0 %vm14969_vm9, %v14968_v10  ;;  %13922 = vmatprep.subr.mxu1 %v14968_v10  ;;  %v5144_v41 = vmul.f32 %v14707_v38, %v15887_v18  ;;  %v365_v18 = vld [vmem:[%s17572_s2 + $0x38] sm:$0xff] }
 0x907   : > { %3130 = vst.msk [vmem:[#allocation2] sm:$0xff] %vm3129_vm11, %v3106_v40  ;;  %13920 = vmatmul.mubr.msk.f32.vlgmr.msra.gmra.mrb[64].mxu0 %vm523_vm10, %v5145_v46  ;;  %14444 = vmatprep.subr.bf16.mxu0 %v14443_v11  ;;  %v14447_v22 = vpack.c.bf16 %v365_v18, %v364_v12  ;;  %v12960_v46 = vld [vmem:[%s17572_s2 + $0xa1] ss:$0 sm:$0xff] }
 0x908   : > { %v14709_v43 = vpop.eup %14708  ;;  %13915 = vmatmul.mubr.msk.f32.vlgmr.msra.gmra.mrb[74].mxu1 %vm523_vm10, %v5144_v41  ;;  %14446 = vmatpush3.bf16.msra.mxu0 %v14443_v11 }
 0x909   : > { %13923 = vmatpush3.msra.mxu1 %v5680_v29  ;;  %v3112_v47 = vpop.permute.xlu1 %3111  ;;  %13924 = vmatprep.mubr.msk.f32.mxu1 %vm14969_vm9, %v14968_v10  ;;  %v5146_v51 = vmul.f32 %v14709_v43, %v15893_v24 }
 0x90a   : > { %v4435_v49 = vpop.permute.xlu0 %4434  ;;  %3133 = vst.msk [vmem:[#allocation2 + $0x18] sm:$0xff] %vm3129_vm11, %v3112_v47  ;;  %14448 = vmatprep.subr.bf16.mxu0 %v14447_v22 }
 0x90b   : > { %4459 = vst.msk [vmem:[#allocation2] sm:$0xff] %vm4458_vm12, %v4435_v49 }
 0x90c   : > { %13925 = vmatmul.mubr.msk.f32.vlgmr.msra.gmra.mrb[76].mxu1 %vm523_vm10, %v5146_v51  ;;  %14450 = vmatpush3.bf16.msra.mxu0 %v14447_v22 }
 0x90d   : > { %v4441_v52 = vpop.permute.xlu1 %4440 }
 0x90e   : > { %v3110_v57 = vpop.permute.xlu0 %3109  ;;  %4462 = vst.msk [vmem:[#allocation2 + $0x18] sm:$0xff] %vm4458_vm12, %v4441_v52 }
 0x90f   : > { %3132 = vst.msk [vmem:[#allocation2 + $0x10] sm:$0xff] %vm3129_vm11, %v3110_v57 }
 0x911   : > { %v3116_v59 = vpop.permute.xlu1 %3115 }
 0x912   : > { %v4439_v62 = vpop.permute.xlu0 %4438  ;;  %3135 = vst.msk [vmem:[#allocation2 + $0x28] sm:$0xff] %vm3129_vm11, %v3116_v59 }
 0x913   : > { %4461 = vst.msk [vmem:[#allocation2 + $0x10] sm:$0xff] %vm4458_vm12, %v4439_v62 }
 0x915   : > { %v4445_v15 = vpop.permute.xlu1 %4444 }
 0x916   : > { %v3114_v63 = vpop.permute.xlu0 %3113  ;;  %4464 = vst.msk [vmem:[#allocation2 + $0x28] sm:$0xff] %vm4458_vm12, %v4445_v15 }
 0x917   : > { %3134 = vst.msk [vmem:[#allocation2 + $0x20] sm:$0xff] %vm3129_vm11, %v3114_v63 }
 0x919   : > { %v3120_v0 = vpop.permute.xlu1 %3119 }
 0x91a   : > { %v4443_v19 = vpop.permute.xlu0 %4442  ;;  %3137 = vst.msk [vmem:[#allocation2 + $0x38] sm:$0xff] %vm3129_vm11, %v3120_v0 }
 0x91b   : > { %4463 = vst.msk [vmem:[#allocation2 + $0x20] sm:$0xff] %vm4458_vm12, %v4443_v19 }
 0x91e   : > { %v3118_v6 = vpop.permute.xlu0 %3117 }
 0x91f   : > { %3136 = vst.msk [vmem:[#allocation2 + $0x30] sm:$0xff] %vm3129_vm11, %v3118_v6 }
 0x9cd   : > { %v5219_v16 = vpop.f32.mrb[58].mxu0 }
 0x9ce   : > { %5763 = vrot.lane.b32.xlu0 %v5219_v16, %s17580_s28  ;;  %v13891_v24 = vpop.f32.mrb[59].mxu0 }
 0x9d1   : > { %v5371_v28 = vpop.f32.mrb[60].mxu0 }
 0x9d2   : > { %v5295_v25 = vpop.f32.mrb[70].mxu1  ;;  %5767 = vrot.lane.b32.xlu0 %v5371_v28, %s17580_s28  ;;  %v13901_v27 = vpop.f32.mrb[61].mxu0 }
 0x9d3   : > { %5765 = vrot.lane.b32.xlu1 %v5295_v25, %s17580_s28  ;;  %v13896_v42 = vpop.f32.mrb[71].mxu1 }
 0x9d6   : > { %v5523_v44 = vpop.f32.mrb[62].mxu0 }
 0x9d7   : > { %v5447_v45 = vpop.f32.mrb[72].mxu1  ;;  %5771 = vrot.lane.b32.xlu0 %v5523_v44, %s17580_s28  ;;  %v13911_v50 = vpop.f32.mrb[63].mxu0 }
 0x9d8   : > { %5769 = vrot.lane.b32.xlu1 %v5447_v45, %s17580_s28  ;;  %v13906_v56 = vpop.f32.mrb[73].mxu1 }
 0x9da   : > { %v5675_v58 = vpop.f32.mrb[64].mxu0 }
 0x9db   : > { %v5599_v1 = vpop.f32.mrb[74].mxu1  ;;  %4446 = vrot.lane.b32.xlu0 %v15859_v23, %s17582_s24  ;;  %v13921_v48 = vpop.f32.mrb[65].mxu0 }
 0x9dc   : > { %5773 = vrot.lane.b32.xlu1 %v5599_v1, %s17580_s28  ;;  %v13916_v4 = vpop.f32.mrb[75].mxu1 }
 0x9df   : > { %v5751_v5 = vpop.f32.mrb[76].mxu1  ;;  %5775 = vrot.lane.b32.xlu0 %v5675_v58, %s17580_s28 }
 0x9e0   : > { %4448 = vrot.lane.b32.xlu1 %v15863_v20, %s17582_s24  ;;  %v13926_v13 = vpop.f32.mrb[77].mxu1  ;;  %s17593_s24 = smov 24  }
 0x9e4   : > { %5777 = vrot.lane.b32.xlu1 %v5751_v5, %s17580_s28  ;;  %s17518_s28 = sshll.u32 %s162_s5, 3 }
 0xa40   : > { %v5764_v53 = vpop.permute.xlu0 %5763 }
 0xa41   : > { %5788 = vst.msk [vmem:[#allocation2] sm:$0xff] %vm5787_vm13, %v5764_v53 }
 0xa44   : > { %v5768_v7 = vpop.permute.xlu0 %5767 }
 0xa45   : > { %v5766_v14 = vpop.permute.xlu1 %5765  ;;  %5790 = vst.msk [vmem:[#allocation2 + $0x10] sm:$0xff] %vm5787_vm13, %v5768_v7 }
 0xa46   : > { %5789 = vst.msk [vmem:[#allocation2 + $0x8] sm:$0xff] %vm5787_vm13, %v5766_v14 }
 0xa48   : > { %v5796_v23 = vld [vmem:[#allocation2] sm:$0xff] }
 0xa49   : > { %v5772_v29 = vpop.permute.xlu0 %5771  ;;  %13935 = vmatprep.mubr.msk.f32.mxu0 %vm390_vm8, %v5796_v23 }
 0xa4a   : > { %v5770_v30 = vpop.permute.xlu1 %5769  ;;  %5792 = vst.msk [vmem:[#allocation2 + $0x20] sm:$0xff] %vm5787_vm13, %v5772_v29 }
 0xa4b   : > { %5791 = vst.msk [vmem:[#allocation2 + $0x18] sm:$0xff] %vm5787_vm13, %v5770_v30  ;;  %v367_v30 = vld [vmem:[%s17572_s2 + $0x48] sm:$0xff] }
 0xa4c   : > { %v5798_v20 = vld [vmem:[#allocation2 + $0x10] sm:$0xff] }
 0xa4d   : > { %v4447_v31 = vpop.permute.xlu0 %4446  ;;  %v5797_v32 = vld [vmem:[#allocation2 + $0x8] sm:$0xff] }
 0xa4e   : > { %v5774_v26 = vpop.permute.xlu1 %5773  ;;  %4465 = vst.msk [vmem:[#allocation2 + $0x30] sm:$0xff] %vm4458_vm12, %v4447_v31  ;;  %13936 = vmatmul.mubr.msk.f32.vlgmr.msra.gmra.mrb[66].mxu0 %vm390_vm8, %v5797_v32  ;;  %v368_v31 = vld [vmem:[%s17572_s2 + $0x50] sm:$0xff]  ;;  %v369_v32 = vld [vmem:[%s17572_s2 + $0x58] sm:$0xff] }
 0xa4f   : > { %5793 = vst.msk [vmem:[#allocation2 + $0x28] sm:$0xff] %vm5787_vm13, %v5774_v26  ;;  %13938 = vmatprep.mubr.msk.f32.mxu0 %vm390_vm8, %v5798_v20  ;;  %v14455_v26 = vpack.c.bf16 %v369_v32, %v368_v31  ;;  %v16144_v32 = vld [vmem:[%s17572_s2 + $0xa2] ss:$0 sm:$0xff] }
 0xa51   : > { %v5776_v33 = vpop.permute.xlu0 %5775  ;;  %v5800_v35 = vld [vmem:[#allocation2 + $0x20] sm:$0xff] }
 0xa52   : > { %v4449_v37 = vpop.permute.xlu1 %4448  ;;  %5794 = vst.msk [vmem:[#allocation2 + $0x30] sm:$0xff] %vm5787_vm13, %v5776_v33  ;;  %v5799_v34 = vld [vmem:[#allocation2 + $0x18] sm:$0xff]  ;;  %v370_v33 = vld [vmem:[%s17572_s2 + $0x60] sm:$0xff] }
 0xa53   : > { %4466 = vst.msk [vmem:[#allocation2 + $0x38] sm:$0xff] %vm4458_vm12, %v4449_v37  ;;  %13939 = vmatmul.mubr.msk.f32.gmra.mrb[68].mxu0 %vm390_vm8, %v5799_v34  ;;  %v372_v37 = vld [vmem:[%s17572_s2 + $0x70] sm:$0xff] }
 0xa54   : > { %13941 = vmatprep.mubr.msk.f32.mxu0 %vm390_vm8, %v5800_v35  ;;  %v371_v35 = vld [vmem:[%s17572_s2 + $0x68] sm:$0xff] }
 0xa55   : > { %v16105_v34 = vpack.c.bf16 %v371_v35, %v370_v33 }
 0xa56   : > { %v5778_v36 = vpop.permute.xlu1 %5777  ;;  %v5801_v38 = vld [vmem:[#allocation2 + $0x28] sm:$0xff] }
 0xa57   : > { %5795 = vst.msk [vmem:[#allocation2 + $0x38] sm:$0xff] %vm5787_vm13, %v5778_v36  ;;  %13942 = vmatmul.mubr.msk.f32.gmra.mrb[70].mxu0 %vm390_vm8, %v5801_v38  ;;  %v373_v36 = vld [vmem:[%s17572_s2 + $0x78] sm:$0xff]  ;;  %14460 = vmatprep.subr.bf16.mxu0 %v16105_v34 }
 0xa58   : > { %v16110_v38 = vpack.c.bf16 %v373_v36, %v372_v37  ;;  %14462 = vmatpush3.bf16.msra.mxu0 %v16105_v34 }
 0xa59   : > { %v5802_v39 = vld [vmem:[#allocation2 + $0x30] sm:$0xff] }
 0xa5a   : > { %13944 = vmatprep.mubr.msk.f32.mxu0 %vm390_vm8, %v5802_v39  ;;  %v374_v39 = vld [vmem:[%s17572_s2 + $0x80] sm:$0xff]  ;;  %14464 = vmatprep.subr.bf16.mxu0 %v16110_v38 }
 0xa5c   : > { %14466 = vmatpush3.bf16.msra.mxu0 %v16110_v38 }
 0xa5e   : > { %v5803_v40 = vld [vmem:[#allocation2 + $0x38] sm:$0xff] }
 0xa5f   : > { %13945 = vmatmul.mubr.msk.f32.gmra.mrb[72].mxu0 %vm390_vm8, %v5803_v40  ;;  %v375_v40 = vld [vmem:[%s17572_s2 + $0x88] sm:$0xff] }
 0xb21   : > { %v13937_v41 = vpop.f32.mrb[66].mxu0 }
 0xb22   : > { %v5904_v43 = vadd.f32 %v13937_v41, %v12960_v46  ;;  %v5898_v47 = vpop.f32.mrb[67].mxu0 }
 0xb23   : > { %v5899_v49 = vadd.f32 %v12960_v46, %v5898_v47 }
 0xb24   : > { %v16021_v51 = vadd.f32 %v5904_v43, %v15125_v55 }
 0xb25   : > { %v16024_v52 = vadd.f32 %v5899_v49, %v15123_v54 }
 0xb26   : > { %v13940_v57 = vpop.f32.mrb[68].mxu0  ;;  %v5948_v59 = vsel %vm390_vm8, %v16021_v51, 0.0  ;;  %v5979_v63 = vmul.f32 %v16021_v51, %v16021_v51 }
 0xb27   : > { %v5908_v62 = vpop.f32.mrb[69].mxu0  ;;  %5949 = vadd.xlane.f32.xlu1 %v5948_v59  ;;  %v5945_v15 = vsel %vm390_vm8, %v16024_v52, 0.0  ;;  %v5914_v54 = vadd.f32 %v13940_v57, %v12960_v46  ;;  %v5978_v21 = vmul.f32 %v16024_v52, %v16024_v52 }
 0xb28   : > { %v5909_v0 = vadd.f32 %v12960_v46, %v5908_v62  ;;  %5946 = vadd.xlane.f32.xlu0 %v5945_v15  ;;  %v5989_v17 = vsel %vm390_vm8, %v5979_v63, 0.0 }
 0xb29   : > { %v5986_v22 = vsel %vm390_vm8, %v5978_v21, 0.0 }
 0xb2a   : > { %v16033_v55 = vadd.f32 %v5909_v0, %v15137_v60  ;;  %v13943_v19 = vpop.f32.mrb[70].mxu0  ;;  %v16043_v60 = vadd.f32 %v5914_v54, %v15139_v61 }
 0xb2b   : > { %v5918_v6 = vpop.f32.mrb[71].mxu0  ;;  %v5924_v25 = vadd.f32 %v13943_v19, %v12960_v46 }
 0xb2c   : > { %v5919_v11 = vadd.f32 %v12960_v46, %v5918_v6  ;;  %5990 = vadd.xlane.f32.xlu0 %v5989_v17  ;;  %v5951_v12 = vsel %vm390_vm8, %v16033_v55, 0.0  ;;  %v5980_v18 = vmul.f32 %v16033_v55, %v16033_v55  ;;  %v5954_v42 = vsel %vm390_vm8, %v16043_v60, 0.0 }
 0xb2d   : > { %5952 = vadd.xlane.f32.xlu1 %v5951_v12  ;;  %v5981_v44 = vmul.f32 %v16043_v60, %v16043_v60  ;;  %v16059_v50 = vadd.f32 %v5924_v25, %v15153_v3 }
 0xb2e   : > { %v16047_v16 = vadd.f32 %v5919_v11, %v15151_v2  ;;  %v5992_v24 = vsel %vm390_vm8, %v5980_v18, 0.0 }
 0xb2f   : > { %v5995_v56 = vsel %vm390_vm8, %v5981_v44, 0.0  ;;  %v5960_v4 = vsel %vm390_vm8, %v16059_v50, 0.0  ;;  %v5983_v5 = vmul.f32 %v16059_v50, %v16059_v50 }
 0xb30   : > { %5987 = vadd.xlane.f32.xlu0 %v5986_v22  ;;  %v5957_v45 = vsel %vm390_vm8, %v16047_v16, 0.0  ;;  %v5982_v2 = vmul.f32 %v16047_v16, %v16047_v16 }
 0xb31   : > { %5993 = vadd.xlane.f32.xlu1 %v5992_v24  ;;  %v6001_v53 = vsel %vm390_vm8, %v5983_v5, 0.0 }
 0xb32   : > { %v13946_v28 = vpop.f32.mrb[72].mxu0  ;;  %v5998_v1 = vsel %vm390_vm8, %v5982_v2, 0.0 }
 0xb33   : > { %v5928_v27 = vpop.f32.mrb[73].mxu0  ;;  %v5934_v48 = vadd.f32 %v13946_v28, %v12960_v46 }
 0xb34   : > { %v5929_v61 = vadd.f32 %v12960_v46, %v5928_v27  ;;  %5955 = vadd.xlane.f32.xlu0 %v5954_v42  ;;  %v16122_v46 = vpack.c.bf16 %v375_v40, %v374_v39 }
 0xb35   : > { %5958 = vadd.xlane.f32.xlu1 %v5957_v45 }
 0xb36   : > { %v16063_v58 = vadd.f32 %v5929_v61, %v15165_v8  ;;  %v16075_v8 = vadd.f32 %v5934_v48, %v15167_v9  ;;  %v366_v9 = vld [vmem:[%s17572_s2 + $0x40] sm:$0xff]  ;;  %14468 = vmatprep.subr.bf16.mxu0 %v16122_v46 }
 0xb37   : > { %v14451_v20 = vpack.c.bf16 %v367_v30, %v366_v9  ;;  %14470 = vmatpush3.bf16.msra.mxu0 %v16122_v46 }
 0xb38   : > { %5996 = vadd.xlane.f32.xlu0 %v5995_v56  ;;  %v5963_v3 = vsel %vm390_vm8, %v16063_v58, 0.0  ;;  %v5984_v13 = vmul.f32 %v16063_v58, %v16063_v58  ;;  %v5966_v14 = vsel %vm390_vm8, %v16075_v8, 0.0  ;;  %v5985_v23 = vmul.f32 %v16075_v8, %v16075_v8 }
 0xb39   : > { %5999 = vadd.xlane.f32.xlu1 %v5998_v1  ;;  %14452 = vmatprep.subr.bf16.mxu1 %v14451_v20 }
 0xb3a   : > { %v6004_v7 = vsel %vm390_vm8, %v5984_v13, 0.0  ;;  %v6007_v29 = vsel %vm390_vm8, %v5985_v23, 0.0  ;;  %14454 = vmatpush3.bf16.msra.mxu1 %v14451_v20 }
 0xb3b   : > { %14456 = vmatprep.subr.bf16.mxu1 %v14455_v26 }
 0xb3c   : > { %5961 = vadd.xlane.f32.xlu0 %v5960_v4 }
 0xb3d   : > { %5964 = vadd.xlane.f32.xlu1 %v5963_v3 }
 0xb3e   : > { %14458 = vmatpush3.bf16.msra.mxu1 %v14455_v26 }
 0xb3f   : > { %14515 = vmatprep.subr.bf16.mxu1 %v16105_v34 }
 0xb40   : > { %6002 = vadd.xlane.f32.xlu0 %v6001_v53 }
 0xb41   : > { %6005 = vadd.xlane.f32.xlu1 %v6004_v7 }
 0xb44   : > { %5967 = vadd.xlane.f32.xlu0 %v5966_v14 }
 0xb48   : > { %6008 = vadd.xlane.f32.xlu0 %v6007_v29 }
 0xbb4   : > { %v5950_v41 = vpop.xlane.xlu1 %5949 }
 0xbb5   : > { %v5947_v43 = vpop.xlane.xlu0 %5946  ;;  %v5971_v47 = vmul.f32 0.03125, %v5950_v41 }
 0xbb6   : > { %v5970_v59 = vmul.f32 0.03125, %v5947_v43 }
 0xbb7   : > { %v6019_v57 = vmul.f32 %v5971_v47, %v5971_v47  ;;  %v6035_v53 = vsub.f32 %v16021_v51, %v5971_v47 }
 0xbb8   : > { %v6018_v54 = vmul.f32 %v5970_v59, %v5970_v59  ;;  %v6034_v20 = vsub.f32 %v16024_v52, %v5970_v59 }
 0xbb9   : > { %v5991_v49 = vpop.xlane.xlu0 %5990 }
 0xbba   : > { %v5953_v62 = vpop.xlane.xlu1 %5952  ;;  %v6011_v15 = vmul.f32 0.03125, %v5991_v49 }
 0xbbb   : > { %v5972_v63 = vmul.f32 0.03125, %v5953_v62 }
 0xbbc   : > { %v6027_v0 = vsub.f32 %v6011_v15, %v6019_v57 }
 0xbbd   : > { %v5988_v19 = vpop.xlane.xlu0 %5987  ;;  %v6020_v11 = vmul.f32 %v5972_v63, %v5972_v63  ;;  %v6036_v51 = vsub.f32 %v16033_v55, %v5972_v63  ;;  %v12970_v55 = vld [vmem:[%s17572_s2 + $0xa3] ss:$0 sm:$0xff] }
 0xbbe   : > { %v6043_v6 = vadd.f32 1e-05, %v6027_v0  ;;  %v5994_v17 = vpop.xlane.xlu1 %5993  ;;  %v6010_v21 = vmul.f32 0.03125, %v5988_v19 }
 0xbbf   : > { %v6012_v12 = vmul.f32 0.03125, %v5994_v17 }
 0xbc0   : > { %14710 = vrsqrt.f32 %v6043_v6  ;;  %v6026_v18 = vsub.f32 %v6010_v21, %v6018_v54 }
 0xbc1   : > { %v6028_v22 = vsub.f32 %v6012_v12, %v6020_v11  ;;  %v5956_v24 = vpop.xlane.xlu0 %5955 }
 0xbc2   : > { %v6042_v28 = vadd.f32 1e-05, %v6026_v18  ;;  %v5959_v25 = vpop.xlane.xlu1 %5958  ;;  %v16127_v27 = vmul.f32 0.03125, %v5956_v24 }
 0xbc3   : > { %v6044_v42 = vadd.f32 1e-05, %v6028_v22  ;;  %v16129_v44 = vmul.f32 0.03125, %v5959_v25 }
 0xbc4   : > { %14712 = vrsqrt.f32 %v6042_v28  ;;  %v6021_v45 = vmul.f32 %v16127_v27, %v16127_v27  ;;  %v6037_v6 = vsub.f32 %v16043_v60, %v16127_v27 }
 0xbc5   : > { %14714 = vrsqrt.f32 %v6044_v42  ;;  %v5997_v61 = vpop.xlane.xlu0 %5996  ;;  %v6022_v1 = vmul.f32 %v16129_v44, %v16129_v44  ;;  %v6038_v12 = vsub.f32 %v16047_v16, %v16129_v44 }
 0xbc6   : > { %v6000_v2 = vpop.xlane.xlu1 %5999  ;;  %v6013_v56 = vmul.f32 0.03125, %v5997_v61 }
 0xbc7   : > { %v6014_v48 = vmul.f32 0.03125, %v6000_v2 }
 0xbc8   : > { %v6029_v4 = vsub.f32 %v6013_v56, %v6021_v45 }
 0xbc9   : > { %v6030_v5 = vsub.f32 %v6014_v48, %v6022_v1  ;;  %v5962_v3 = vpop.xlane.xlu0 %5961 }
 0xbca   : > { %v14711_v13 = vpop.eup %14710  ;;  %v6045_v7 = vadd.f32 1e-05, %v6029_v4  ;;  %v5965_v14 = vpop.xlane.xlu1 %5964  ;;  %v16136_v23 = vmul.f32 0.03125, %v5962_v3 }
 0xbcb   : > { %v6046_v29 = vadd.f32 1e-05, %v6030_v5  ;;  %v16138_v9 = vmul.f32 0.03125, %v5965_v14  ;;  %v6059_v30 = vmul.f32 %v14711_v13, %v6035_v53 }
 0xbcc   : > { %14716 = vrsqrt.f32 %v6045_v7  ;;  %v6023_v33 = vmul.f32 %v16136_v23, %v16136_v23  ;;  %v376_v7 = vld [vmem:[%s17572_s2 + $0x90] sm:$0xff] }
 0xbcd   : > { %14718 = vrsqrt.f32 %v6046_v29  ;;  %v6003_v31 = vpop.xlane.xlu0 %6002  ;;  %v6024_v39 = vmul.f32 %v16138_v9, %v16138_v9  ;;  %v6071_v43 = vmul.f32 %v16144_v32, %v6059_v30  ;;  %v6040_v2 = vsub.f32 %v16063_v58, %v16138_v9 }
 0xbce   : > { %v14713_v26 = vpop.eup %14712  ;;  %v6006_v35 = vpop.xlane.xlu1 %6005  ;;  %v6015_v37 = vmul.f32 0.03125, %v6003_v31 }
 0xbcf   : > { %v14715_v36 = vpop.eup %14714  ;;  %v6016_v52 = vmul.f32 0.03125, %v6006_v35  ;;  %v6058_v40 = vmul.f32 %v14713_v26, %v6034_v20  ;;  %v16159_v54 = vadd.f32 %v12970_v55, %v6071_v43 }
 0xbd0   : > { %v6031_v41 = vsub.f32 %v6015_v37, %v6023_v33  ;;  %v6060_v47 = vmul.f32 %v14715_v36, %v6036_v51 }
 0xbd1   : > { %v6032_v49 = vsub.f32 %v6016_v52, %v6024_v39  ;;  %v5968_v57 = vpop.xlane.xlu0 %5967  ;;  %v6070_v59 = vmul.f32 %v16144_v32, %v6058_v40 }
 0xbd2   : > { %v6047_v62 = vadd.f32 1e-05, %v6031_v41  ;;  %v5977_v15 = vmul.f32 0.03125, %v5968_v57  ;;  %v6072_v63 = vmul.f32 %v16144_v32, %v6060_v47 }
 0xbd3   : > { %v6048_v0 = vadd.f32 1e-05, %v6032_v49  ;;  %v16157_v19 = vadd.f32 %v12970_v55, %v6070_v59 }
 0xbd4   : > { %14720 = vrsqrt.f32 %v6047_v62  ;;  %v16165_v21 = vadd.f32 %v12970_v55, %v6072_v63  ;;  %v6025_v18 = vmul.f32 %v5977_v15, %v5977_v15  ;;  %v6041_v3 = vsub.f32 %v16075_v8, %v5977_v15  ;;  %v377_v8 = vld [vmem:[%s17572_s2 + $0x98] sm:$0xff]  ;;  %v12980_v63 = vld [vmem:[%s17572_s2 + $0xa5] ss:$0 sm:$0xff] }
 0xbd5   : > { %14722 = vrsqrt.f32 %v6048_v0  ;;  %13955 = vmatprep.mubr.msk.f32.mxu1 %vm390_vm8, %v16157_v19  ;;  %v6009_v17 = vpop.xlane.xlu0 %6008  ;;  %v14471_v14 = vpack.c.bf16 %v377_v8, %v376_v7 }
 0xbd6   : > { %v14717_v11 = vpop.eup %14716  ;;  %v6017_v22 = vmul.f32 0.03125, %v6009_v17  ;;  %13956 = vmatmul.mubr.msk.f32.vlgmr.msra.gmra.mrb[78].mxu1 %vm390_vm8, %v16159_v54 }
 0xbd7   : > { %v14719_v24 = vpop.eup %14718  ;;  %13958 = vmatprep.mubr.msk.f32.mxu1 %vm390_vm8, %v16165_v21  ;;  %v6061_v60 = vmul.f32 %v14717_v11, %v6037_v6  ;;  %14519 = vmatpush3.bf16.msra.mxu1 %v16105_v34  ;;  %v6039_v34 = vsub.f32 %v16059_v50, %v16136_v23  ;;  %v12971_v23 = vld [vmem:[%s17572_s2 + $0xa4] ss:$0 sm:$0xff] }
 0xbd8   : > { %v6033_v28 = vsub.f32 %v6017_v22, %v6025_v18  ;;  %v6062_v25 = vmul.f32 %v14719_v24, %v6038_v12  ;;  %14516 = vmatprep.subr.bf16.mxu1 %v16110_v38  ;;  %14472 = vmatprep.subr.bf16.mxu0 %v14471_v14 }
 0xbd9   : > { %v6073_v27 = vmul.f32 %v16144_v32, %v6061_v60  ;;  %14474 = vmatpush3.bf16.msra.mxu0 %v14471_v14 }
 0xbda   : > { %v6049_v42 = vadd.f32 1e-05, %v6033_v28  ;;  %v6074_v16 = vmul.f32 %v16144_v32, %v6062_v25  ;;  %14015 = vmatprep.subr.mxu0 %v14968_v10 }
 0xbdb   : > { %v16177_v44 = vadd.f32 %v12970_v55, %v6073_v27  ;;  %14520 = vmatpush3.bf16.msra.mxu1 %v16110_v38 }
 0xbdc   : > { %14724 = vrsqrt.f32 %v6049_v42  ;;  %v16180_v61 = vadd.f32 %v12970_v55, %v6074_v16  ;;  %14517 = vmatprep.subr.bf16.mxu1 %v16122_v46 }
 0xbdd   : > { %13959 = vmatmul.mubr.msk.f32.gmra.mrb[80].mxu1 %vm390_vm8, %v16177_v44 }
 0xbde   : > { %v14721_v45 = vpop.eup %14720  ;;  %13961 = vmatprep.mubr.msk.f32.mxu1 %vm390_vm8, %v16180_v61 }
 0xbdf   : > { %v14723_v56 = vpop.eup %14722  ;;  %v6063_v38 = vmul.f32 %v14721_v45, %v6039_v34  ;;  %14521 = vmatpush3.bf16.msra.mxu1 %v16122_v46 }
 0xbe0   : > { %v6064_v1 = vmul.f32 %v14723_v56, %v6040_v2  ;;  %14518 = vmatprep.subr.bf16.mxu1 %v14471_v14 }
 0xbe1   : > { %v6075_v48 = vmul.f32 %v16144_v32, %v6063_v38 }
 0xbe2   : > { %v6076_v4 = vmul.f32 %v16144_v32, %v6064_v1 }
 0xbe3   : > { %v16194_v50 = vadd.f32 %v12970_v55, %v6075_v48  ;;  %14522 = vmatpush3.bf16.msra.mxu1 %v14471_v14 }
 0xbe4   : > { %v16196_v5 = vadd.f32 %v12970_v55, %v6076_v4 }
 0xbe5   : > { %13962 = vmatmul.mubr.msk.f32.gmra.mrb[82].mxu1 %vm390_vm8, %v16194_v50 }
 0xbe6   : > { %v14725_v58 = vpop.eup %14724  ;;  %13964 = vmatprep.mubr.msk.f32.mxu1 %vm390_vm8, %v16196_v5 }
 0xbe7   : > { %v6065_v13 = vmul.f32 %v14725_v58, %v6041_v3 }
 0xbe9   : > { %v6077_v46 = vmul.f32 %v16144_v32, %v6065_v13 }
 0xbeb   : > { %v16204_v53 = vadd.f32 %v12970_v55, %v6077_v46 }
 0xbed   : > { %13965 = vmatmul.mubr.msk.f32.gmra.mrb[84].mxu1 %vm390_vm8, %v16204_v53 }
 0xca9   : > { %v13957_v29 = vpop.f32.mrb[78].mxu1 }
 0xcaa   : > { %v6190_v9 = vadd.f32 %v13957_v29, %v12971_v23  ;;  %v6184_v30 = vpop.f32.mrb[79].mxu1 }
 0xcab   : > { %v6185_v20 = vadd.f32 %v12971_v23, %v6184_v30 }
 0xcac   : > { %v6224_v32 = vmax.f32 %v6190_v9, 0.0 }
 0xcad   : > { %v6223_v31 = vmax.f32 %v6185_v20, 0.0 }
 0xcaf   : > { %13983 = vmatprep.mubr.msk.f32.mxu0 %vm6235_vm14, %v6223_v31 }
 0xcb0   : > { %v13960_v26 = vpop.f32.mrb[80].mxu1  ;;  %13984 = vmatmul.mubr.msk.f32.vlgmr.msra.gmra.mrb[74].mxu0 %vm6235_vm14, %v6224_v32 }
 0xcb1   : > { %v6200_v51 = vadd.f32 %v13960_v26, %v12971_v23  ;;  %v6194_v33 = vpop.f32.mrb[81].mxu1 }
 0xcb2   : > { %v6195_v35 = vadd.f32 %v12971_v23, %v6194_v33 }
 0xcb3   : > { %v6226_v36 = vmax.f32 %v6200_v51, 0.0 }
 0xcb4   : > { %v6225_v37 = vmax.f32 %v6195_v35, 0.0 }
 0xcb6   : > { %13986 = vmatprep.mubr.msk.f32.mxu0 %vm6235_vm14, %v6225_v37  ;;  %v12991_v37 = vld [vmem:[%s17572_s2 + $0xa8] sm:$0xff] }
 0xcb7   : > { %13987 = vmatmul.mubr.msk.f32.gmra.mrb[76].mxu0 %vm6235_vm14, %v6226_v36  ;;  %v12992_v36 = vld [vmem:[%s17572_s2 + $0xb0] sm:$0xff] }
 0xcb8   : > { %v13963_v39 = vpop.f32.mrb[82].mxu1  ;;  %14017 = vmatprep.mubr.msk.f32.mxu0 %vm14969_vm9, %v14968_v10 }
 0xcb9   : > { %v6210_v52 = vadd.f32 %v13963_v39, %v12971_v23  ;;  %v6204_v40 = vpop.f32.mrb[83].mxu1  ;;  %v14475_v39 = vpack.c.bf16 %v12992_v36, %v12991_v37 }
 0xcba   : > { %v6205_v41 = vadd.f32 %v12971_v23, %v6204_v40  ;;  %v12994_v40 = vld [vmem:[%s17572_s2 + $0xc0] sm:$0xff] }
 0xcbb   : > { %v6228_v47 = vmax.f32 %v6210_v52, 0.0  ;;  %14476 = vmatprep.subr.bf16.mxu1 %v14475_v39  ;;  %v12993_v52 = vld [vmem:[%s17572_s2 + $0xb8] sm:$0xff] }
 0xcbc   : > { %v6227_v43 = vmax.f32 %v6205_v41, 0.0  ;;  %v14479_v41 = vpack.c.bf16 %v12994_v40, %v12993_v52 }
 0xcbe   : > { %13989 = vmatprep.mubr.msk.f32.mxu1 %vm6235_vm14, %v6227_v43 }
 0xcbf   : > { %13990 = vmatmul.mubr.msk.f32.vlgmr.msra.gmra.mrb[86].mxu1 %vm6235_vm14, %v6228_v47 }
 0xcc0   : > { %v13966_v49 = vpop.f32.mrb[84].mxu1  ;;  %14478 = vmatpush3.bf16.msra.mxu1 %v14475_v39 }
 0xcc1   : > { %v6220_v57 = vadd.f32 %v13966_v49, %v12971_v23  ;;  %v6214_v55 = vpop.f32.mrb[85].mxu1  ;;  %14480 = vmatprep.subr.bf16.mxu1 %v14479_v41 }
 0xcc2   : > { %v6215_v59 = vadd.f32 %v12971_v23, %v6214_v55 }
 0xcc3   : > { %v6230_v15 = vmax.f32 %v6220_v57, 0.0 }
 0xcc4   : > { %v6229_v62 = vmax.f32 %v6215_v59, 0.0  ;;  %14482 = vmatpush3.bf16.msra.mxu1 %v14479_v41 }
 0xcc5   : > { %14020 = vmatprep.subr.mxu1 %v14968_v10 }
 0xcc6   : > { %13992 = vmatprep.mubr.msk.f32.mxu1 %vm6235_vm14, %v6229_v62 }
 0xcc7   : > { %13993 = vmatmul.mubr.msk.f32.gmra.mrb[88].mxu1 %vm6235_vm14, %v6230_v15 }
 0xd83   : > { %v13985_v0 = vpop.f32.mrb[74].mxu0 }
 0xd84   : > { %v6332_v6 = vadd.f32 %v13985_v0, %v12980_v63  ;;  %v6326_v17 = vpop.f32.mrb[75].mxu0 }
 0xd85   : > { %v6327_v11 = vadd.f32 %v12980_v63, %v6326_v17 }
 0xd86   : > { %v16232_v12 = vadd.f32 %v6332_v6, %v16159_v54 }
 0xd87   : > { %v16235_v18 = vadd.f32 %v6327_v11, %v16157_v19 }
 0xd88   : > { %v6376_v22 = vsel %vm390_vm8, %v16232_v12, 0.0  ;;  %v6406_v24 = vmul.f32 %v16232_v12, %v16232_v12 }
 0xd89   : > { %6377 = vadd.xlane.f32.xlu0 %v6376_v22  ;;  %v6373_v60 = vsel %vm390_vm8, %v16235_v18, 0.0  ;;  %v6405_v28 = vmul.f32 %v16235_v18, %v16235_v18 }
 0xd8a   : > { %6374 = vadd.xlane.f32.xlu1 %v6373_v60  ;;  %v13988_v25 = vpop.f32.mrb[76].mxu0  ;;  %v6416_v19 = vsel %vm390_vm8, %v6406_v24, 0.0 }
 0xd8b   : > { %v6342_v54 = vadd.f32 %v13988_v25, %v12980_v63  ;;  %v6336_v27 = vpop.f32.mrb[77].mxu0  ;;  %v6413_v34 = vsel %vm390_vm8, %v6405_v28, 0.0 }
 0xd8c   : > { %v6337_v42 = vadd.f32 %v12980_v63, %v6336_v27 }
 0xd8d   : > { %v16247_v16 = vadd.f32 %v6342_v54, %v16177_v44  ;;  %6417 = vadd.xlane.f32.xlu0 %v6416_v19 }
 0xd8e   : > { %v16251_v45 = vadd.f32 %v6337_v42, %v16165_v21  ;;  %6414 = vadd.xlane.f32.xlu1 %v6413_v34 }
 0xd8f   : > { %v6382_v2 = vsel %vm390_vm8, %v16247_v16, 0.0  ;;  %v6408_v38 = vmul.f32 %v16247_v16, %v16247_v16 }
 0xd90   : > { %v6379_v56 = vsel %vm390_vm8, %v16251_v45, 0.0  ;;  %v6407_v44 = vmul.f32 %v16251_v45, %v16251_v45 }
 0xd91   : > { %6383 = vadd.xlane.f32.xlu0 %v6382_v2  ;;  %v6422_v3 = vsel %vm390_vm8, %v6408_v38, 0.0 }
 0xd92   : > { %6380 = vadd.xlane.f32.xlu1 %v6379_v56  ;;  %v13991_v1 = vpop.f32.mrb[86].mxu1  ;;  %v6419_v13 = vsel %vm390_vm8, %v6407_v44, 0.0 }
 0xd93   : > { %v6352_v48 = vadd.f32 %v13991_v1, %v12980_v63  ;;  %v6346_v4 = vpop.f32.mrb[87].mxu1 }
 0xd94   : > { %v6347_v21 = vadd.f32 %v12980_v63, %v6346_v4 }
 0xd95   : > { %v16263_v58 = vadd.f32 %v6352_v48, %v16194_v50  ;;  %6423 = vadd.xlane.f32.xlu0 %v6422_v3 }
 0xd96   : > { %v16267_v46 = vadd.f32 %v6347_v21, %v16180_v61  ;;  %6420 = vadd.xlane.f32.xlu1 %v6419_v13 }
 0xd97   : > { %v6388_v7 = vsel %vm390_vm8, %v16263_v58, 0.0  ;;  %v6410_v14 = vmul.f32 %v16263_v58, %v16263_v58 }
 0xd98   : > { %v6385_v8 = vsel %vm390_vm8, %v16267_v46, 0.0  ;;  %v6409_v50 = vmul.f32 %v16267_v46, %v16267_v46 }
 0xd99   : > { %6389 = vadd.xlane.f32.xlu0 %v6388_v7  ;;  %v6428_v30 = vsel %vm390_vm8, %v6410_v14, 0.0 }
 0xd9a   : > { %6386 = vadd.xlane.f32.xlu1 %v6385_v8  ;;  %v13994_v23 = vpop.f32.mrb[88].mxu1  ;;  %v6425_v31 = vsel %vm390_vm8, %v6409_v50, 0.0  ;;  %v16321_v50 = vld [vmem:[%s17572_s2 + $0xa6] ss:$0 sm:$0xff] }
 0xd9b   : > { %v6362_v29 = vadd.f32 %v13994_v23, %v12980_v63  ;;  %v6356_v9 = vpop.f32.mrb[89].mxu1 }
 0xd9c   : > { %v6357_v61 = vadd.f32 %v12980_v63, %v6356_v9 }
 0xd9d   : > { %v16279_v20 = vadd.f32 %v6362_v29, %v16204_v53  ;;  %6429 = vadd.xlane.f32.xlu0 %v6428_v30 }
 0xd9e   : > { %v16283_v32 = vadd.f32 %v6357_v61, %v16196_v5  ;;  %6426 = vadd.xlane.f32.xlu1 %v6425_v31 }
 0xd9f   : > { %v6394_v26 = vsel %vm390_vm8, %v16279_v20, 0.0  ;;  %v6412_v33 = vmul.f32 %v16279_v20, %v16279_v20 }
 0xda0   : > { %v6391_v51 = vsel %vm390_vm8, %v16283_v32, 0.0  ;;  %v6411_v53 = vmul.f32 %v16283_v32, %v16283_v32 }
 0xda1   : > { %6395 = vadd.xlane.f32.xlu0 %v6394_v26  ;;  %v6434_v35 = vsel %vm390_vm8, %v6412_v33, 0.0 }
 0xda2   : > { %6392 = vadd.xlane.f32.xlu1 %v6391_v51  ;;  %v6431_v5 = vsel %vm390_vm8, %v6411_v53, 0.0 }
 0xda5   : > { %6435 = vadd.xlane.f32.xlu0 %v6434_v35  ;;  %v12990_v35 = vld [vmem:[%s17572_s2 + $0xa7] ss:$0 sm:$0xff] }
 0xda6   : > { %6432 = vadd.xlane.f32.xlu1 %v6431_v5 }
 0xe16   : > { %v6378_v43 = vpop.xlane.xlu0 %6377 }
 0xe17   : > { %v6398_v47 = vmul.f32 0.03125, %v6378_v43  ;;  %v6375_v49 = vpop.xlane.xlu1 %6374 }
 0xe18   : > { %v6397_v57 = vmul.f32 0.03125, %v6375_v49 }
 0xe19   : > { %v6446_v59 = vmul.f32 %v6398_v47, %v6398_v47  ;;  %v6462_v13 = vsub.f32 %v16232_v12, %v6398_v47 }
 0xe1a   : > { %v6418_v55 = vpop.xlane.xlu0 %6417  ;;  %v6445_v63 = vmul.f32 %v6397_v57, %v6397_v57  ;;  %v6461_v14 = vsub.f32 %v16235_v18, %v6397_v57 }
 0xe1b   : > { %v6438_v62 = vmul.f32 0.03125, %v6418_v55  ;;  %v6415_v15 = vpop.xlane.xlu1 %6414 }
 0xe1c   : > { %v6437_v0 = vmul.f32 0.03125, %v6415_v15 }
 0xe1d   : > { %v6454_v6 = vsub.f32 %v6438_v62, %v6446_v59 }
 0xe1e   : > { %v6453_v17 = vsub.f32 %v6437_v0, %v6445_v63  ;;  %v6384_v11 = vpop.xlane.xlu0 %6383 }
 0xe1f   : > { %v6470_v22 = vadd.f32 1e-05, %v6454_v6  ;;  %v16308_v24 = vmul.f32 0.03125, %v6384_v11  ;;  %v6381_v60 = vpop.xlane.xlu1 %6380 }
 0xe20   : > { %v6469_v28 = vadd.f32 1e-05, %v6453_v17  ;;  %v6399_v25 = vmul.f32 0.03125, %v6381_v60 }
 0xe21   : > { %14726 = vrsqrt.f32 %v6470_v22  ;;  %v6448_v27 = vmul.f32 %v16308_v24, %v16308_v24  ;;  %v6464_v43 = vsub.f32 %v16247_v16, %v16308_v24 }
 0xe22   : > { %14728 = vrsqrt.f32 %v6469_v28  ;;  %v6424_v54 = vpop.xlane.xlu0 %6423  ;;  %v6447_v34 = vmul.f32 %v6399_v25, %v6399_v25  ;;  %v6463_v55 = vsub.f32 %v16251_v45, %v6399_v25 }
 0xe23   : > { %v6440_v42 = vmul.f32 0.03125, %v6424_v54  ;;  %v6421_v19 = vpop.xlane.xlu1 %6420 }
 0xe24   : > { %v6439_v2 = vmul.f32 0.03125, %v6421_v19 }
 0xe25   : > { %v6456_v56 = vsub.f32 %v6440_v42, %v6448_v27 }
 0xe26   : > { %v6455_v38 = vsub.f32 %v6439_v2, %v6447_v34  ;;  %v6390_v44 = vpop.xlane.xlu0 %6389 }
 0xe27   : > { %v6472_v1 = vadd.f32 1e-05, %v6456_v56  ;;  %v16312_v48 = vmul.f32 0.03125, %v6390_v44  ;;  %v6387_v4 = vpop.xlane.xlu1 %6386 }
 0xe28   : > { %v6471_v21 = vadd.f32 1e-05, %v6455_v38  ;;  %v16314_v3 = vmul.f32 0.03125, %v6387_v4 }
 0xe29   : > { %14730 = vrsqrt.f32 %v6472_v1  ;;  %v6450_v23 = vmul.f32 %v16312_v48, %v16312_v48  ;;  %v6466_v54 = vsub.f32 %v16263_v58, %v16312_v48 }
 0xe2a   : > { %14732 = vrsqrt.f32 %v6471_v21  ;;  %v6430_v7 = vpop.xlane.xlu0 %6429  ;;  %v6449_v12 = vmul.f32 %v16314_v3, %v16314_v3  ;;  %v6465_v19 = vsub.f32 %v16267_v46, %v16314_v3 }
 0xe2b   : > { %v14727_v8 = vpop.eup %14726  ;;  %v6442_v29 = vmul.f32 0.03125, %v6430_v7  ;;  %v6427_v9 = vpop.xlane.xlu1 %6426 }
 0xe2c   : > { %v14729_v61 = vpop.eup %14728  ;;  %v6486_v30 = vmul.f32 %v14727_v8, %v6462_v13  ;;  %v6441_v31 = vmul.f32 0.03125, %v6427_v9 }
 0xe2d   : > { %v6458_v26 = vsub.f32 %v6442_v29, %v6450_v23  ;;  %v6485_v51 = vmul.f32 %v14729_v61, %v6461_v14 }
 0xe2e   : > { %v6498_v18 = vmul.f32 %v16321_v50, %v6486_v30  ;;  %v6457_v33 = vsub.f32 %v6441_v31, %v6449_v12  ;;  %v6396_v53 = vpop.xlane.xlu0 %6395 }
 0xe2f   : > { %v6474_v5 = vadd.f32 1e-05, %v6458_v26  ;;  %v6404_v37 = vmul.f32 0.03125, %v6396_v53  ;;  %v6393_v36 = vpop.xlane.xlu1 %6392  ;;  %v6497_v39 = vmul.f32 %v16321_v50, %v6485_v51 }
 0xe30   : > { %v6473_v52 = vadd.f32 1e-05, %v6457_v33  ;;  %v6403_v40 = vmul.f32 0.03125, %v6393_v36  ;;  %v16336_v49 = vadd.f32 %v12990_v35, %v6498_v18 }
 0xe31   : > { %14734 = vrsqrt.f32 %v6474_v5  ;;  %v16332_v41 = vadd.f32 %v12990_v35, %v6497_v39  ;;  %v6452_v59 = vmul.f32 %v6404_v37, %v6404_v37  ;;  %v6468_v1 = vsub.f32 %v16279_v20, %v6404_v37 }
 0xe32   : > { %14736 = vrsqrt.f32 %v6473_v52  ;;  %v6436_v47 = vpop.xlane.xlu0 %6435  ;;  %v6451_v0 = vmul.f32 %v6403_v40, %v6403_v40  ;;  %v6467_v4 = vsub.f32 %v16283_v32, %v6403_v40  ;;  %v13019_v32 = vld [vmem:[%s17572_s2 + $0x148] ss:$0 sm:$0xff] }
 0xe33   : > { %v14731_v57 = vpop.eup %14730  ;;  %v6444_v62 = vmul.f32 0.03125, %v6436_v47  ;;  %14003 = vmatprep.mubr.msk.f32.mxu1 %vm390_vm8, %v16332_v41  ;;  %v6433_v15 = vpop.xlane.xlu1 %6432 }
 0xe34   : > { %v14733_v63 = vpop.eup %14732  ;;  %v6443_v6 = vmul.f32 0.03125, %v6433_v15  ;;  %14004 = vmatmul.mubr.msk.f32.vlgmr.msra.gmra.mrb[90].mxu1 %vm390_vm8, %v16336_v49  ;;  %v6488_v16 = vmul.f32 %v14731_v57, %v6464_v43 }
 0xe35   : > { %v6460_v17 = vsub.f32 %v6444_v62, %v6452_v59  ;;  %v6487_v11 = vmul.f32 %v14733_v63, %v6463_v55 }
 0xe36   : > { %v6459_v22 = vsub.f32 %v6443_v6, %v6451_v0  ;;  %v6500_v24 = vmul.f32 %v16321_v50, %v6488_v16 }
 0xe37   : > { %v6476_v60 = vadd.f32 1e-05, %v6460_v17  ;;  %v6499_v45 = vmul.f32 %v16321_v50, %v6487_v11 }
 0xe38   : > { %v6475_v28 = vadd.f32 1e-05, %v6459_v22  ;;  %v16349_v27 = vadd.f32 %v12990_v35, %v6500_v24 }
 0xe39   : > { %14738 = vrsqrt.f32 %v6476_v60  ;;  %v16345_v25 = vadd.f32 %v12990_v35, %v6499_v45 }
 0xe3a   : > { %14740 = vrsqrt.f32 %v6475_v28 }
 0xe3b   : > { %v14735_v42 = vpop.eup %14734  ;;  %14006 = vmatprep.mubr.msk.f32.mxu1 %vm390_vm8, %v16345_v25 }
 0xe3c   : > { %v14737_v34 = vpop.eup %14736  ;;  %14007 = vmatmul.mubr.msk.f32.gmra.mrb[92].mxu1 %vm390_vm8, %v16349_v27  ;;  %v6490_v2 = vmul.f32 %v14735_v42, %v6466_v54 }
 0xe3d   : > { %v6489_v56 = vmul.f32 %v14737_v34, %v6465_v19 }
 0xe3e   : > { %v6502_v38 = vmul.f32 %v16321_v50, %v6490_v2 }
 0xe3f   : > { %v6501_v58 = vmul.f32 %v16321_v50, %v6489_v56 }
 0xe40   : > { %v16362_v48 = vadd.f32 %v12990_v35, %v6502_v38 }
 0xe41   : > { %v16359_v44 = vadd.f32 %v12990_v35, %v6501_v58 }
 0xe43   : > { %v14739_v46 = vpop.eup %14738  ;;  %14009 = vmatprep.mubr.msk.f32.mxu1 %vm390_vm8, %v16359_v44 }
 0xe44   : > { %v14741_v21 = vpop.eup %14740  ;;  %14010 = vmatmul.mubr.msk.f32.gmra.mrb[94].mxu1 %vm390_vm8, %v16362_v48  ;;  %v6492_v3 = vmul.f32 %v14739_v46, %v6468_v1 }
 0xe45   : > { %v6491_v13 = vmul.f32 %v14741_v21, %v6467_v4 }
 0xe46   : > { %v6504_v7 = vmul.f32 %v16321_v50, %v6492_v3 }
 0xe47   : > { %v6503_v8 = vmul.f32 %v16321_v50, %v6491_v13 }
 0xe48   : > { %v16373_v20 = vadd.f32 %v12990_v35, %v6504_v7 }
 0xe49   : > { %v16371_v14 = vadd.f32 %v12990_v35, %v6503_v8 }
 0xe4b   : > { %14012 = vmatprep.mubr.msk.f32.mxu1 %vm390_vm8, %v16371_v14 }
 0xe4c   : > { %14013 = vmatmul.mubr.msk.f32.gmra.mrb[96].mxu1 %vm390_vm8, %v16373_v20 }
 0xe4d   : > { %14022 = vmatprep.mubr.msk.f32.mxu1 %vm14969_vm9, %v14968_v10 }
 0xf07   : > { %v14005_v23 = vpop.f32.mrb[90].mxu1 }
 0xf08   : > { %v16384_v29 = vadd.f32 %v14005_v23, %v13019_v32  ;;  %v6640_v50 = vpop.f32.mrb[91].mxu1 }
 0xf09   : > { %v16386_v9 = vadd.f32 %v13019_v32, %v6640_v50 }
 0xf0a   : > { %6757 = vrot.lane.b32.xlu0 %v16384_v29, %s14970_s6 }
 0xf0b   : > { %6680 = vrot.lane.b32.xlu1 %v16386_v9, %s14970_s6 }
 0xf0f   : > { %v14008_v61 = vpop.f32.mrb[92].mxu1 }
 0xf10   : > { %v6650_v30 = vpop.f32.mrb[93].mxu1  ;;  %v16396_v31 = vadd.f32 %v14008_v61, %v13019_v32 }
 0xf11   : > { %v16392_v12 = vadd.f32 %v13019_v32, %v6650_v30 }
 0xf13   : > { %6834 = vrot.lane.b32.xlu1 %v16392_v12, %s14970_s6 }
 0xf17   : > { %6911 = vrot.lane.b32.xlu1 %v16396_v31, %s14970_s6  ;;  %v14011_v26 = vpop.f32.mrb[94].mxu1 }
 0xf18   : > { %v16400_v51 = vadd.f32 %v14011_v26, %v13019_v32  ;;  %v6660_v18 = vpop.f32.mrb[95].mxu1 }
 0xf19   : > { %v16402_v33 = vadd.f32 %v13019_v32, %v6660_v18 }
 0xf1b   : > { %7065 = vrot.lane.b32.xlu1 %v16400_v51, %s14970_s6  ;;  %6988 = vrot.lane.b32.xlu0 %v16402_v33, %s14970_s6 }
 0xf1f   : > { %v14014_v53 = vpop.f32.mrb[96].mxu1 }
 0xf20   : > { %v16408_v35 = vadd.f32 %v14014_v53, %v13019_v32  ;;  %v6670_v5 = vpop.f32.mrb[97].mxu1 }
 0xf21   : > { %v16410_v37 = vadd.f32 %v13019_v32, %v6670_v5 }
 0xf22   : > { %7219 = vrot.lane.b32.xlu1 %v16408_v35, %s14970_s6 }
 0xf23   : > { %7142 = vrot.lane.b32.xlu0 %v16410_v37, %s14970_s6  ;;  %s17588_s6 = smov 72  }
 0xf26   : > { %7351 = vrot.lane.b32.xlu1 %v16386_v9, %s14971_s7 }
 0xf27   : > { %7427 = vrot.lane.b32.xlu0 %v16384_v29, %s14971_s7 }
 0xf2a   : > { %7503 = vrot.lane.b32.xlu1 %v16392_v12, %s14971_s7 }
 0xf2b   : > { %7655 = vrot.lane.b32.xlu0 %v16402_v33, %s14971_s7 }
 0xf2e   : > { %7579 = vrot.lane.b32.xlu1 %v16396_v31, %s14971_s7 }
 0xf2f   : > { %7969 = vrot.lane.b32.xlu0 %v16386_v9, %s14972_s8 }
 0xf32   : > { %7731 = vrot.lane.b32.xlu1 %v16400_v51, %s14971_s7 }
 0xf33   : > { %7967 = vrot.lane.b32.xlu0 %v16386_v9, %s14973_s9 }
 0xf36   : > { %7883 = vrot.lane.b32.xlu1 %v16408_v35, %s14971_s7 }
 0xf37   : > { %8125 = vrot.lane.b32.xlu0 %v16392_v12, %s14972_s8 }
 0xf3a   : > { %8047 = vrot.lane.b32.xlu1 %v16384_v29, %s14972_s8 }
 0xf3b   : > { %7807 = vrot.lane.b32.xlu0 %v16410_v37, %s14971_s7  ;;  %s17589_s7 = smov 104  }
 0xf3e   : > { %8045 = vrot.lane.b32.xlu1 %v16384_v29, %s14973_s9 }
 0xf42   : > { %8203 = vrot.lane.b32.xlu1 %v16396_v31, %s14972_s8 }
 0xf7c   : > { %v6758_v36 = vpop.permute.xlu0 %6757 }
 0xf7d   : > { %v6681_v39 = vpop.permute.xlu1 %6680  ;;  %14021 = vmatpush3.xpose.msk.msra.mxu1 %vm523_vm10, %v6758_v36 }
 0xf7e   : > { %14016 = vmatpush3.xpose.msk.msra.mxu0 %vm523_vm10, %v6681_v39  ;;  %14030 = vmatprep.subr.mxu1 %v14968_v10 }
 0xf7f   : > { %14025 = vmatprep.subr.mxu0 %v14968_v10 }
 0xf80   : > { %14023 = vmatmul.mubr.msk.f32.vlgmr.msra.gmra.mrb[98].mxu1 %vm523_vm10, %v16384_v29 }
 0xf81   : > { %14018 = vmatmul.mubr.msk.f32.vlgmr.msra.gmra.mrb[78].mxu0 %vm523_vm10, %v16386_v9  ;;  %14032 = vmatprep.mubr.msk.f32.mxu1 %vm14969_vm9, %v14968_v10 }
 0xf82   : > { %14027 = vmatprep.mubr.msk.f32.mxu0 %vm14969_vm9, %v14968_v10 }
 0xf85   : > { %v6835_v52 = vpop.permute.xlu1 %6834 }
 0xf86   : > { %14026 = vmatpush3.xpose.msk.msra.mxu0 %vm523_vm10, %v6835_v52 }
 0xf87   : > { %14035 = vmatprep.subr.mxu0 %v14968_v10 }
 0xf89   : > { %14028 = vmatmul.mubr.msk.f32.vlgmr.msra.gmra.mrb[80].mxu0 %vm523_vm10, %v16392_v12  ;;  %v6912_v40 = vpop.permute.xlu1 %6911 }
 0xf8a   : > { %14031 = vmatpush3.xpose.msk.msra.mxu1 %vm523_vm10, %v6912_v40  ;;  %14037 = vmatprep.mubr.msk.f32.mxu0 %vm14969_vm9, %v14968_v10 }
 0xf8b   : > { %14040 = vmatprep.subr.mxu1 %v14968_v10 }
 0xf8d   : > { %v7066_v43 = vpop.permute.xlu1 %7065  ;;  %14033 = vmatmul.mubr.msk.f32.vlgmr.msra.gmra.mrb[100].mxu1 %vm523_vm10, %v16396_v31  ;;  %v6989_v47 = vpop.permute.xlu0 %6988 }
 0xf8e   : > { %14036 = vmatpush3.xpose.msk.msra.mxu0 %vm523_vm10, %v6989_v47  ;;  %14041 = vmatpush3.xpose.msk.msra.mxu1 %vm523_vm10, %v7066_v43 }
 0xf8f   : > { %14042 = vmatprep.mubr.msk.f32.mxu1 %vm14969_vm9, %v14968_v10  ;;  %14050 = vmatprep.subr.mxu1 %v14968_v10 }
 0xf90   : > { %14045 = vmatprep.subr.mxu0 %v14968_v10 }
 0xf91   : > { %14038 = vmatmul.mubr.msk.f32.vlgmr.msra.gmra.mrb[82].mxu0 %vm523_vm10, %v16402_v33  ;;  %14043 = vmatmul.mubr.msk.f32.vlgmr.msra.gmra.mrb[102].mxu1 %vm523_vm10, %v16400_v51 }
 0xf92   : > { %14052 = vmatprep.mubr.msk.f32.mxu1 %vm14969_vm9, %v14968_v10  ;;  %14047 = vmatprep.mubr.msk.f32.mxu0 %vm14969_vm9, %v14968_v10 }
 0xf94   : > { %v7220_v57 = vpop.permute.xlu1 %7219 }
 0xf95   : > { %14051 = vmatpush3.xpose.msk.msra.mxu1 %vm523_vm10, %v7220_v57  ;;  %v7143_v55 = vpop.permute.xlu0 %7142 }
 0xf96   : > { %14046 = vmatpush3.xpose.msk.msra.mxu0 %vm523_vm10, %v7143_v55  ;;  %14060 = vmatprep.subr.mxu1 %v14968_v10 }
 0xf97   : > { %14055 = vmatprep.subr.mxu0 %v14968_v10 }
 0xf98   : > { %v7352_v59 = vpop.permute.xlu1 %7351  ;;  %14053 = vmatmul.mubr.msk.f32.vlgmr.msra.gmra.mrb[104].mxu1 %vm523_vm10, %v16408_v35 }
 0xf99   : > { %14048 = vmatmul.mubr.msk.f32.vlgmr.msra.gmra.mrb[84].mxu0 %vm523_vm10, %v16410_v37  ;;  %v7428_v62 = vpop.permute.xlu0 %7427  ;;  %14062 = vmatprep.mubr.msk.f32.mxu1 %vm14969_vm9, %v14968_v10 }
 0xf9a   : > { %14056 = vmatpush3.msra.mxu0 %v7352_v59  ;;  %14061 = vmatpush3.msra.mxu1 %v7428_v62 }
 0xf9b   : > { %14070 = vmatprep.subr.mxu1 %v14968_v10  ;;  %14057 = vmatprep.mubr.msk.f32.mxu0 %vm14969_vm9, %v14968_v10 }
 0xf9c   : > { %14065 = vmatprep.subr.mxu0 %v14968_v10  ;;  %v7504_v40 = vpop.permute.xlu1 %7503 }
 0xf9d   : > { %v7656_v57 = vpop.permute.xlu0 %7655 }
 0xfa0   : > { %v7580_v43 = vpop.permute.xlu1 %7579 }
 0xfa1   : > { %v16568_v59 = vpop.permute.xlu0 %7969 }
 0xfa4   : > { %v7732_v47 = vpop.permute.xlu1 %7731 }
 0xfa8   : > { %v7884_v55 = vpop.permute.xlu1 %7883 }
 0xfac   : > { %v8048_v62 = vpop.permute.xlu1 %8047 }
0x1053   : > { %v6829_v15 = vpop.f32.mrb[98].mxu1 }
0x1054   : > { %v7297_v63 = vmul.f32 1.442695, %v6829_v15  ;;  %v6752_v0 = vpop.f32.mrb[78].mxu0  ;;  %v14024_v6 = vpop.f32.mrb[99].mxu1 }
0x1055   : > { %v7295_v16 = vmul.f32 1.442695, %v6752_v0  ;;  %v14019_v17 = vpop.f32.mrb[79].mxu0  ;;  %v16572_v15 = vpop.permute.xlu0 %7967 }
0x1056   : > { %14742 = vpow2.f32 %v7297_v63  ;;  %v8046_v63 = vpop.permute.xlu1 %8045 }
0x1057   : > { %14744 = vpow2.f32 %v7295_v16 }
0x1059   : > { %v16578_v0 = vpop.permute.xlu0 %8125 }
0x105a   : > { %v8204_v6 = vpop.permute.xlu1 %8203 }
0x105c   : > { %v6906_v11 = vpop.f32.mrb[80].mxu0 }
0x105d   : > { %v14029_v22 = vpop.f32.mrb[81].mxu0  ;;  %v7299_v28 = vmul.f32 1.442695, %v6906_v11  ;;  %v7808_v16 = vpop.permute.xlu0 %7807 }
0x1060   : > { %v16494_v24 = vpop.eup %14742  ;;  %v6983_v60 = vpop.f32.mrb[100].mxu1 }
0x1061   : > { %v16496_v45 = vpop.eup %14744  ;;  %v7301_v54 = vmul.f32 1.442695, %v6983_v60  ;;  %v14034_v42 = vpop.f32.mrb[101].mxu1  ;;  %v7314_v19 = vsel %vm523_vm10, %v16494_v24, 0.0 }
0x1062   : > { %7315 = vadd.xlane.f32.xlu1 %v7314_v19  ;;  %v7311_v34 = vsel %vm523_vm10, %v16496_v45, 0.0 }
0x1063   : > { %14746 = vpow2.f32 %v7301_v54  ;;  %7312 = vadd.xlane.f32.xlu0 %v7311_v34 }
0x1064   : > { %v7060_v2 = vpop.f32.mrb[82].mxu0  ;;  %v7137_v56 = vpop.f32.mrb[102].mxu1  ;;  %14748 = vpow2.f32 %v7299_v28 }
0x1065   : > { %v7303_v38 = vmul.f32 1.442695, %v7060_v2  ;;  %v7305_v58 = vmul.f32 1.442695, %v7137_v56  ;;  %v14039_v1 = vpop.f32.mrb[83].mxu0  ;;  %v14044_v46 = vpop.f32.mrb[103].mxu1 }
0x1067   : > { %14750 = vpow2.f32 %v7303_v38 }
0x1068   : > { %14752 = vpow2.f32 %v7305_v58 }
0x106b   : > { %v7291_v4 = vpop.f32.mrb[104].mxu1 }
0x106c   : > { %v7309_v21 = vmul.f32 1.442695, %v7291_v4  ;;  %v7214_v3 = vpop.f32.mrb[84].mxu0  ;;  %v14054_v13 = vpop.f32.mrb[105].mxu1 }
0x106d   : > { %v16502_v7 = vpop.eup %14746  ;;  %v14049_v8 = vpop.f32.mrb[85].mxu0  ;;  %v7307_v36 = vmul.f32 1.442695, %v7214_v3 }
0x106e   : > { %14754 = vpow2.f32 %v7309_v21  ;;  %v7320_v32 = vsel %vm523_vm10, %v16502_v7, 0.0  ;;  %v16506_v23 = vpop.eup %14748 }
0x106f   : > { %7321 = vadd.xlane.f32.xlu0 %v7320_v32  ;;  %v7317_v61 = vsel %vm523_vm10, %v16506_v23, 0.0  ;;  %14756 = vpow2.f32 %v7307_v36 }
0x1071   : > { %v16508_v50 = vpop.eup %14750 }
0x1072   : > { %v7323_v30 = vsel %vm523_vm10, %v16508_v50, 0.0  ;;  %v16514_v26 = vpop.eup %14752 }
0x1073   : > { %7318 = vadd.xlane.f32.xlu0 %v7317_v61  ;;  %7324 = vadd.xlane.f32.xlu1 %v7323_v30  ;;  %v7326_v18 = vsel %vm523_vm10, %v16514_v26, 0.0 }
0x1077   : > { %7327 = vadd.xlane.f32.xlu0 %v7326_v18 }
0x1078   : > { %v16518_v53 = vpop.eup %14754 }
0x1079   : > { %v7332_v5 = vsel %vm523_vm10, %v16518_v53, 0.0  ;;  %v16534_v39 = vpop.eup %14756 }
0x107a   : > { %v7329_v52 = vsel %vm523_vm10, %v16534_v39, 0.0 }
0x107b   : > { %7333 = vadd.xlane.f32.xlu0 %v7332_v5 }
0x1084   : > { %8201 = vrot.lane.b32.xlu1 %v16396_v31, %s14973_s9 }
0x1091   : > { %8123 = vrot.lane.b32.xlu0 %v16392_v12, %s14973_s9 }
0x1095   : > { %8281 = vrot.lane.b32.xlu0 %v16402_v33, %s14972_s8 }
0x1099   : > { %8279 = vrot.lane.b32.xlu0 %v16402_v33, %s14973_s9 }
0x109d   : > { %8437 = vrot.lane.b32.xlu0 %v16410_v37, %s14972_s8 }
0x10a1   : > { %8435 = vrot.lane.b32.xlu0 %v16410_v37, %s14973_s9 }
0x10a5   : > { %8723 = vrot.lane.b32.xlu0 %v16384_v29, %s14974_s10 }
0x10a8   : > { %7330 = vadd.xlane.f32.xlu1 %v7329_v52 }
0x10a9   : > { %8951 = vrot.lane.b32.xlu0 %v16402_v33, %s14974_s10 }
0x10ad   : > { %9103 = vrot.lane.b32.xlu0 %v16410_v37, %s14974_s10 }
0x10b1   : > { %9297 = vrot.lane.b32.xlu0 %v16386_v9, %s14975_s11 }
0x10b5   : > { %9295 = vrot.lane.b32.xlu0 %v16386_v9, %s14976_s17 }
0x10b9   : > { %9453 = vrot.lane.b32.xlu0 %v16392_v12, %s14975_s11  ;;  %8359 = vrot.lane.b32.xlu1 %v16400_v51, %s14972_s8 }
0x10bd   : > { %8357 = vrot.lane.b32.xlu1 %v16400_v51, %s14973_s9 }
0x10c1   : > { %8515 = vrot.lane.b32.xlu1 %v16408_v35, %s14972_s8  ;;  %s17590_s8 = smov 40  }
0x10c5   : > { %8513 = vrot.lane.b32.xlu1 %v16408_v35, %s14973_s9  ;;  %s17591_s9 = smov 8  }
0x10c9   : > { %8647 = vrot.lane.b32.xlu1 %v16386_v9, %s14974_s10 }
0x10cd   : > { %8799 = vrot.lane.b32.xlu1 %v16392_v12, %s14974_s10 }
0x10d1   : > { %8875 = vrot.lane.b32.xlu1 %v16396_v31, %s14974_s10 }
0x10d5   : > { %9027 = vrot.lane.b32.xlu1 %v16400_v51, %s14974_s10 }
0x10d9   : > { %9179 = vrot.lane.b32.xlu1 %v16408_v35, %s14974_s10  ;;  %s17592_s10 = smov 16  }
0x10dd   : > { %9375 = vrot.lane.b32.xlu1 %v16384_v29, %s14975_s11 }
0x10e1   : > { %9373 = vrot.lane.b32.xlu1 %v16384_v29, %s14976_s17 }
0x10e5   : > { %9531 = vrot.lane.b32.xlu1 %v16396_v31, %s14975_s11 }
0x10ef   : > { %v7316_v17 = vpop.xlane.xlu1 %7315 }
0x10f0   : > { %14758 = vrcp.f32 %v7316_v17  ;;  %v7313_v11 = vpop.xlane.xlu0 %7312 }
0x10f1   : > { %14760 = vrcp.f32 %v7313_v11 }
0x10fa   : > { %v14759_v22 = vpop.eup %14758 }
0x10fb   : > { %v14761_v60 = vpop.eup %14760  ;;  %v7344_v28 = vmul.f32 %v14759_v22, %v16494_v24 }
0x10fc   : > { %v7322_v54 = vpop.xlane.xlu0 %7321  ;;  %v7343_v42 = vmul.f32 %v14761_v60, %v16496_v45 }
0x10fd   : > { %14762 = vrcp.f32 %v7322_v54  ;;  %14063 = vmatmul.mubr.msk.f32.vlgmr.msra.gmra.mrb[106].mxu1 %vm523_vm10, %v7344_v28 }
0x10fe   : > { %14071 = vmatpush3.msra.mxu1 %v7580_v43  ;;  %14058 = vmatmul.mubr.msk.f32.vlgmr.msra.gmra.mrb[86].mxu0 %vm523_vm10, %v7343_v42 }
0x10ff   : > { %14066 = vmatpush3.msra.mxu0 %v7504_v40  ;;  %14072 = vmatprep.mubr.msk.f32.mxu1 %vm14969_vm9, %v14968_v10 }
0x1100   : > { %v7319_v19 = vpop.xlane.xlu0 %7318  ;;  %14080 = vmatprep.subr.mxu1 %v14968_v10  ;;  %14067 = vmatprep.mubr.msk.f32.mxu0 %vm14969_vm9, %v14968_v10  ;;  %v7325_v24 = vpop.xlane.xlu1 %7324 }
0x1101   : > { %14075 = vmatprep.subr.mxu0 %v14968_v10  ;;  %14764 = vrcp.f32 %v7319_v19 }
0x1102   : > { %14766 = vrcp.f32 %v7325_v24 }
0x1104   : > { %v7328_v45 = vpop.xlane.xlu0 %7327 }
0x1105   : > { %14768 = vrcp.f32 %v7328_v45 }
0x1107   : > { %v14763_v34 = vpop.eup %14762 }
0x1108   : > { %v7334_v2 = vpop.xlane.xlu0 %7333  ;;  %v7346_v56 = vmul.f32 %v14763_v34, %v16502_v7  ;;  %v8202_v7 = vpop.permute.xlu1 %8201 }
0x1109   : > { %14770 = vrcp.f32 %v7334_v2 }
0x110a   : > { %14073 = vmatmul.mubr.msk.f32.vlgmr.msra.gmra.mrb[108].mxu1 %vm523_vm10, %v7346_v56 }
0x110b   : > { %14081 = vmatpush3.msra.mxu1 %v7732_v47  ;;  %14082 = vmatprep.mubr.msk.f32.mxu1 %vm14969_vm9, %v14968_v10  ;;  %v14765_v38 = vpop.eup %14764 }
0x110c   : > { %14090 = vmatprep.subr.mxu1 %v14968_v10  ;;  %v7345_v58 = vmul.f32 %v14765_v38, %v16506_v23  ;;  %v14767_v1 = vpop.eup %14766  ;;  %v8124_v8 = vpop.permute.xlu0 %8123 }
0x110d   : > { %v7347_v21 = vmul.f32 %v14767_v1, %v16508_v50 }
0x110e   : > { %14068 = vmatmul.mubr.msk.f32.vlgmr.msra.gmra.mrb[88].mxu0 %vm523_vm10, %v7345_v58 }
0x110f   : > { %v14769_v46 = vpop.eup %14768  ;;  %14076 = vmatpush3.msra.mxu0 %v7656_v57  ;;  %14077 = vmatprep.mubr.msk.f32.mxu0 %vm14969_vm9, %v14968_v10 }
0x1110   : > { %v7348_v4 = vmul.f32 %v14769_v46, %v16514_v26  ;;  %14085 = vmatprep.subr.mxu0 %v14968_v10  ;;  %v8282_v32 = vpop.permute.xlu0 %8281 }
0x1112   : > { %14083 = vmatmul.mubr.msk.f32.vlgmr.msra.gmra.mrb[110].mxu1 %vm523_vm10, %v7348_v4  ;;  %14078 = vmatmul.mubr.msk.f32.vlgmr.msra.gmra.mrb[90].mxu0 %vm523_vm10, %v7347_v21 }
0x1113   : > { %v14771_v3 = vpop.eup %14770  ;;  %14091 = vmatpush3.msra.mxu1 %v7884_v55  ;;  %14086 = vmatpush3.msra.mxu0 %v7808_v16 }
0x1114   : > { %14092 = vmatprep.mubr.msk.f32.mxu1 %vm14969_vm9, %v14968_v10  ;;  %v7350_v13 = vmul.f32 %v14771_v3, %v16518_v53  ;;  %14100 = vmatprep.subr.mxu1 %v14968_v10  ;;  %v8280_v23 = vpop.permute.xlu0 %8279 }
0x1115   : > { %14087 = vmatprep.mubr.msk.f32.mxu0 %vm14969_vm9, %v14968_v10  ;;  %14095 = vmatprep.subr.mxu0 %v14968_v10 }
0x1116   : > { %14093 = vmatmul.mubr.msk.f32.vlgmr.msra.gmra.mrb[112].mxu1 %vm523_vm10, %v7350_v13 }
0x1117   : > { %14102 = vmatprep.mubr.msk.f32.mxu1 %vm14969_vm9, %v14968_v10 }
0x1118   : > { %v8438_v30 = vpop.permute.xlu0 %8437 }
0x111a   : > { %14101 = vmatpush3.xpose.msk.msra.mxu1 %vm523_vm10, %v8048_v62 }
0x111b   : > { %14110 = vmatprep.subr.mxu1 %v14968_v10 }
0x111c   : > { %v8436_v53 = vpop.permute.xlu0 %8435 }
0x111d   : > { %14103 = vmatmul.mubr.msk.f32.vlgmr.msra.gmra.mrb[114].mxu1 %vm523_vm10, %v8046_v63 }
0x111e   : > { %14111 = vmatpush3.xpose.msk.msra.mxu1 %vm523_vm10, %v8204_v6  ;;  %14112 = vmatprep.mubr.msk.f32.mxu1 %vm14969_vm9, %v14968_v10 }
0x111f   : > { %14120 = vmatprep.subr.mxu1 %v14968_v10 }
0x1120   : > { %v8724_v40 = vpop.permute.xlu0 %8723 }
0x1121   : > { %14113 = vmatmul.mubr.msk.f32.vlgmr.msra.gmra.mrb[116].mxu1 %vm523_vm10, %v8202_v7 }
0x1122   : > { %14122 = vmatprep.mubr.msk.f32.mxu1 %vm14969_vm9, %v14968_v10 }
0x1135   : > { %v7331_v50 = vpop.xlane.xlu1 %7330 }
0x1136   : > { %14772 = vrcp.f32 %v7331_v50 }
0x1139   : > { %v8360_v61 = vpop.permute.xlu1 %8359 }
0x113a   : > { %14121 = vmatpush3.xpose.msk.msra.mxu1 %vm523_vm10, %v8360_v61 }
0x113b   : > { %14130 = vmatprep.subr.mxu1 %v14968_v10 }
0x113d   : > { %v8358_v26 = vpop.permute.xlu1 %8357 }
0x113e   : > { %14123 = vmatmul.mubr.msk.f32.vlgmr.msra.gmra.mrb[118].mxu1 %vm523_vm10, %v8358_v26 }
0x113f   : > { %14132 = vmatprep.mubr.msk.f32.mxu1 %vm14969_vm9, %v14968_v10 }
0x1140   : > { %v14773_v18 = vpop.eup %14772 }
0x1141   : > { %v8516_v5 = vpop.permute.xlu1 %8515  ;;  %v7349_v36 = vmul.f32 %v14773_v18, %v16534_v39 }
0x1142   : > { %14131 = vmatpush3.xpose.msk.msra.mxu1 %vm523_vm10, %v8516_v5 }
0x1143   : > { %14088 = vmatmul.mubr.msk.f32.vlgmr.msra.gmra.mrb[92].mxu0 %vm523_vm10, %v7349_v36  ;;  %14140 = vmatprep.subr.mxu1 %v14968_v10 }
0x1144   : > { %14096 = vmatpush3.xpose.msk.msra.mxu0 %vm523_vm10, %v16568_v59  ;;  %14097 = vmatprep.mubr.msk.f32.mxu0 %vm14969_vm9, %v14968_v10 }
0x1145   : > { %v8514_v52 = vpop.permute.xlu1 %8513  ;;  %14105 = vmatprep.subr.mxu0 %v14968_v10 }
0x1146   : > { %14133 = vmatmul.mubr.msk.f32.vlgmr.msra.gmra.mrb[120].mxu1 %vm523_vm10, %v8514_v52 }
0x1147   : > { %14141 = vmatpush3.msra.mxu1 %v8724_v40  ;;  %14098 = vmatmul.mubr.msk.f32.vlgmr.msra.gmra.mrb[94].mxu0 %vm523_vm10, %v16572_v15 }
0x1148   : > { %14106 = vmatpush3.xpose.msk.msra.mxu0 %vm523_vm10, %v16578_v0  ;;  %14107 = vmatprep.mubr.msk.f32.mxu0 %vm14969_vm9, %v14968_v10 }
0x1149   : > { %14115 = vmatprep.subr.mxu0 %v14968_v10  ;;  %14142 = vmatprep.mubr.msk.f32.mxu1 %vm14969_vm9, %v14968_v10  ;;  %v8648_v39 = vpop.permute.xlu1 %8647 }
0x114a   : > { %14150 = vmatprep.subr.mxu1 %v14968_v10 }
0x114b   : > { %14108 = vmatmul.mubr.msk.f32.vlgmr.msra.gmra.mrb[96].mxu0 %vm523_vm10, %v8124_v8 }
0x114c   : > { %14116 = vmatpush3.xpose.msk.msra.mxu0 %vm523_vm10, %v8282_v32  ;;  %14117 = vmatprep.mubr.msk.f32.mxu0 %vm14969_vm9, %v14968_v10 }
0x114d   : > { %14125 = vmatprep.subr.mxu0 %v14968_v10 }
0x114f   : > { %14118 = vmatmul.mubr.msk.f32.vlgmr.msra.gmra.mrb[98].mxu0 %vm523_vm10, %v8280_v23 }
0x1150   : > { %14126 = vmatpush3.xpose.msk.msra.mxu0 %vm523_vm10, %v8438_v30  ;;  %14127 = vmatprep.mubr.msk.f32.mxu0 %vm14969_vm9, %v14968_v10 }
0x1151   : > { %14135 = vmatprep.subr.mxu0 %v14968_v10 }
0x1153   : > { %14128 = vmatmul.mubr.msk.f32.vlgmr.msra.gmra.mrb[100].mxu0 %vm523_vm10, %v8436_v53 }
0x1154   : > { %14136 = vmatpush3.msra.mxu0 %v8648_v39  ;;  %14137 = vmatprep.mubr.msk.f32.mxu0 %vm14969_vm9, %v14968_v10 }
0x1155   : > { %14145 = vmatprep.subr.mxu0 %v14968_v10 }
0x11d0   : > { %v7499_v43 = vpop.f32.mrb[106].mxu1 }
0x11d1   : > { %7960 = vst.msk [vmem:[#allocation2 + $0x8] sm:$0xff] %vm523_vm10, %v7499_v43  ;;  %v7423_v47 = vpop.f32.mrb[86].mxu0  ;;  %v14064_v57 = vpop.f32.mrb[107].mxu1 }
0x11d2   : > { %7959 = vst.msk [vmem:[#allocation2] sm:$0xff] %vm523_vm10, %v7423_v47  ;;  %v14059_v55 = vpop.f32.mrb[87].mxu0 }
0x11dd   : > { %v7651_v59 = vpop.f32.mrb[108].mxu1 }
0x11de   : > { %7962 = vst.msk [vmem:[#allocation2 + $0x18] sm:$0xff] %vm523_vm10, %v7651_v59  ;;  %v14074_v62 = vpop.f32.mrb[109].mxu1 }
0x11e1   : > { %v7575_v15 = vpop.f32.mrb[88].mxu0 }
0x11e2   : > { %7961 = vst.msk [vmem:[#allocation2 + $0x10] sm:$0xff] %vm523_vm10, %v7575_v15  ;;  %v14069_v63 = vpop.f32.mrb[89].mxu0 }
0x11e5   : > { %v7803_v0 = vpop.f32.mrb[110].mxu1  ;;  %v7727_v6 = vpop.f32.mrb[90].mxu0 }
0x11e6   : > { %7964 = vst.msk [vmem:[#allocation2 + $0x28] sm:$0xff] %vm523_vm10, %v7803_v0  ;;  %v14084_v16 = vpop.f32.mrb[111].mxu1  ;;  %7963 = vst.msk [vmem:[#allocation2 + $0x20] sm:$0xff] %vm523_vm10, %v7727_v6  ;;  %v14079_v17 = vpop.f32.mrb[91].mxu0 }
0x11e7   : > { %v8800_v0 = vpop.permute.xlu1 %8799 }
0x11e9   : > { %v7955_v11 = vpop.f32.mrb[112].mxu1 }
0x11ea   : > { %7966 = vst.msk [vmem:[#allocation2 + $0x38] sm:$0xff] %vm523_vm10, %v7955_v11  ;;  %v14094_v22 = vpop.f32.mrb[113].mxu1 }
0x11eb   : > { %v8876_v16 = vpop.permute.xlu1 %8875 }
0x11ef   : > { %v9028_v17 = vpop.permute.xlu1 %9027 }
0x11f0   : > { %v8119_v60 = vpop.f32.mrb[114].mxu1 }
0x11f1   : > { %v8593_v28 = vmul.f32 1.442695, %v8119_v60  ;;  %v14104_v54 = vpop.f32.mrb[115].mxu1 }
0x11f3   : > { %14774 = vpow2.f32 %v8593_v28  ;;  %v16725_v11 = vpop.permute.xlu1 %9179 }
0x11f4   : > { %v8275_v42 = vpop.f32.mrb[116].mxu1 }
0x11f5   : > { %v14114_v19 = vpop.f32.mrb[117].mxu1  ;;  %v8597_v4 = vmul.f32 1.442695, %v8275_v42 }
0x11f7   : > { %v16733_v22 = vpop.permute.xlu1 %9375 }
0x11fb   : > { %v16737_v60 = vpop.permute.xlu1 %9373 }
0x11fd   : > { %v16670_v24 = vpop.eup %14774 }
0x11fe   : > { %v8610_v45 = vsel %vm523_vm10, %v16670_v24, 0.0 }
0x11ff   : > { %8611 = vadd.xlane.f32.xlu1 %v8610_v45  ;;  %v16743_v28 = vpop.permute.xlu1 %9531  ;;  %v8952_v45 = vpop.permute.xlu0 %8951 }
0x1211   : > { %v8431_v34 = vpop.f32.mrb[118].mxu1 }
0x1212   : > { %v14124_v2 = vpop.f32.mrb[119].mxu1  ;;  %v8601_v23 = vmul.f32 1.442695, %v8431_v34  ;;  %v9104_v34 = vpop.permute.xlu0 %9103 }
0x1216   : > { %v7879_v56 = vpop.f32.mrb[92].mxu0 }
0x1217   : > { %7965 = vst.msk [vmem:[#allocation2 + $0x30] sm:$0xff] %vm523_vm10, %v7879_v56  ;;  %v14089_v38 = vpop.f32.mrb[93].mxu0 }
0x1219   : > { %v8587_v58 = vpop.f32.mrb[120].mxu1 }
0x121a   : > { %v8041_v1 = vpop.f32.mrb[94].mxu0  ;;  %v14134_v46 = vpop.f32.mrb[121].mxu1  ;;  %v8605_v18 = vmul.f32 1.442695, %v8587_v58 }
0x121b   : > { %v8591_v21 = vmul.f32 1.442695, %v8041_v1  ;;  %v14099_v3 = vpop.f32.mrb[95].mxu0 }
0x121d   : > { %14776 = vpow2.f32 %v8591_v21 }
0x121e   : > { %v8197_v13 = vpop.f32.mrb[96].mxu0  ;;  %14778 = vpow2.f32 %v8597_v4 }
0x121f   : > { %v8595_v7 = vmul.f32 1.442695, %v8197_v13  ;;  %v14109_v8 = vpop.f32.mrb[97].mxu0 }
0x1221   : > { %14780 = vpow2.f32 %v8595_v7 }
0x1222   : > { %v8353_v32 = vpop.f32.mrb[98].mxu0 }
0x1223   : > { %v8599_v50 = vmul.f32 1.442695, %v8353_v32  ;;  %v14119_v61 = vpop.f32.mrb[99].mxu0 }
0x1225   : > { %14782 = vpow2.f32 %v8599_v50 }
0x1226   : > { %v8509_v30 = vpop.f32.mrb[100].mxu0  ;;  %14784 = vpow2.f32 %v8601_v23 }
0x1227   : > { %v16675_v26 = vpop.eup %14776  ;;  %v14129_v53 = vpop.f32.mrb[101].mxu0  ;;  %14786 = vpow2.f32 %v8605_v18  ;;  %v8603_v15 = vmul.f32 1.442695, %v8509_v30 }
0x1228   : > { %v8607_v5 = vsel %vm523_vm10, %v16675_v26, 0.0  ;;  %v16679_v36 = vpop.eup %14778 }
0x1229   : > { %8608 = vadd.xlane.f32.xlu0 %v8607_v5  ;;  %v8616_v52 = vsel %vm523_vm10, %v16679_v36, 0.0  ;;  %14788 = vpow2.f32 %v8603_v15 }
0x122b   : > { %v16683_v40 = vpop.eup %14780 }
0x122c   : > { %v8613_v43 = vsel %vm523_vm10, %v16683_v40, 0.0 }
0x122d   : > { %8617 = vadd.xlane.f32.xlu0 %v8616_v52 }
0x122f   : > { %v16685_v39 = vpop.eup %14782 }
0x1230   : > { %v8619_v47 = vsel %vm523_vm10, %v16685_v39, 0.0  ;;  %v16691_v57 = vpop.eup %14784 }
0x1231   : > { %8614 = vadd.xlane.f32.xlu0 %v8613_v43  ;;  %8620 = vadd.xlane.f32.xlu1 %v8619_v47  ;;  %v8622_v55 = vsel %vm523_vm10, %v16691_v57, 0.0  ;;  %v16695_v59 = vpop.eup %14786 }
0x1232   : > { %v8628_v62 = vsel %vm523_vm10, %v16695_v59, 0.0 }
0x1233   : > { %v16711_v63 = vpop.eup %14788 }
0x1234   : > { %v8625_v6 = vsel %vm523_vm10, %v16711_v63, 0.0 }
0x1235   : > { %8623 = vadd.xlane.f32.xlu0 %v8622_v55 }
0x1239   : > { %8629 = vadd.xlane.f32.xlu0 %v8628_v62 }
0x1242   : > { %9529 = vrot.lane.b32.xlu1 %v16396_v31, %s14976_s17 }
0x124f   : > { %9451 = vrot.lane.b32.xlu0 %v16392_v12, %s14976_s17 }
0x1253   : > { %9609 = vrot.lane.b32.xlu0 %v16402_v33, %s14975_s11 }
0x1257   : > { %9607 = vrot.lane.b32.xlu0 %v16402_v33, %s14976_s17 }
0x125b   : > { %9765 = vrot.lane.b32.xlu0 %v16410_v37, %s14975_s11 }
0x125f   : > { %9763 = vrot.lane.b32.xlu0 %v16410_v37, %s14976_s17 }
0x1263   : > { %10051 = vrot.lane.b32.xlu0 %v16384_v29, %s14977_s20 }
0x1266   : > { %8626 = vadd.xlane.f32.xlu1 %v8625_v6 }
0x1267   : > { %10279 = vrot.lane.b32.xlu0 %v16402_v33, %s14977_s20 }
0x126b   : > { %10431 = vrot.lane.b32.xlu0 %v16410_v37, %s14977_s20 }
0x126f   : > { %10625 = vrot.lane.b32.xlu0 %v16386_v9, %s17588_s6 }
0x1273   : > { %10623 = vrot.lane.b32.xlu0 %v16386_v9, %s17589_s7 }
0x1277   : > { %10781 = vrot.lane.b32.xlu0 %v16392_v12, %s17588_s6  ;;  %9687 = vrot.lane.b32.xlu1 %v16400_v51, %s14975_s11 }
0x127b   : > { %9685 = vrot.lane.b32.xlu1 %v16400_v51, %s14976_s17 }
0x127f   : > { %9843 = vrot.lane.b32.xlu1 %v16408_v35, %s14975_s11 }
0x1283   : > { %9841 = vrot.lane.b32.xlu1 %v16408_v35, %s14976_s17 }
0x1287   : > { %9975 = vrot.lane.b32.xlu1 %v16386_v9, %s14977_s20 }
0x128b   : > { %10127 = vrot.lane.b32.xlu1 %v16392_v12, %s14977_s20 }
0x128c   : > { %v8612_v54 = vpop.xlane.xlu1 %8611 }
0x128d   : > { %14790 = vrcp.f32 %v8612_v54 }
0x128f   : > { %10203 = vrot.lane.b32.xlu1 %v16396_v31, %s14977_s20 }
0x1293   : > { %10355 = vrot.lane.b32.xlu1 %v16400_v51, %s14977_s20 }
0x1297   : > { %v14791_v42 = vpop.eup %14790  ;;  %10507 = vrot.lane.b32.xlu1 %v16408_v35, %s14977_s20  ;;  %s14984_s20 = smov [#allocation3]  }
0x1298   : > { %v8640_v19 = vmul.f32 %v14791_v42, %v16670_v24  ;;  %v16764_v24 = vpop.permute.xlu0 %9297  ;;  %s14906_s25 = sshll.u32 %s14984_s20, 4  ;;  %s14907_s25 = int_to_ptr.vmem [resolvable:$false] %s14906_s25 }
0x1299   : > { %s14908_s26 = scalar_lea.vmem %s14907_s25, 256 }
0x129a   : > { %14143 = vmatmul.mubr.msk.f32.vlgmr.msra.gmra.mrb[122].mxu1 %vm523_vm10, %v8640_v19 }
0x129b   : > { %14151 = vmatpush3.msra.mxu1 %v8876_v16  ;;  %10703 = vrot.lane.b32.xlu1 %v16384_v29, %s17588_s6 }
0x129c   : > { %14152 = vmatprep.mubr.msk.f32.mxu1 %vm14969_vm9, %v14968_v10  ;;  %14160 = vmatprep.subr.mxu1 %v14968_v10  ;;  %v16766_v2 = vpop.permute.xlu0 %9295 }
0x129f   : > { %10701 = vrot.lane.b32.xlu1 %v16384_v29, %s17589_s7 }
0x12a0   : > { %v16768_v56 = vpop.permute.xlu0 %9453 }
0x12a3   : > { %10859 = vrot.lane.b32.xlu1 %v16396_v31, %s17588_s6 }
0x12b6   : > { %v8609_v38 = vpop.xlane.xlu0 %8608 }
0x12b7   : > { %14792 = vrcp.f32 %v8609_v38 }
0x12ba   : > { %v8618_v58 = vpop.xlane.xlu0 %8617 }
0x12bb   : > { %14794 = vrcp.f32 %v8618_v58 }
0x12be   : > { %v8615_v1 = vpop.xlane.xlu0 %8614  ;;  %v8621_v46 = vpop.xlane.xlu1 %8620 }
0x12bf   : > { %14796 = vrcp.f32 %v8615_v1 }
0x12c0   : > { %14798 = vrcp.f32 %v8621_v46 }
0x12c1   : > { %v14793_v4 = vpop.eup %14792 }
0x12c2   : > { %v8624_v21 = vpop.xlane.xlu0 %8623  ;;  %v8639_v3 = vmul.f32 %v14793_v4, %v16675_v26  ;;  %v9530_v5 = vpop.permute.xlu1 %9529 }
0x12c3   : > { %14800 = vrcp.f32 %v8624_v21 }
0x12c4   : > { %14138 = vmatmul.mubr.msk.f32.vlgmr.msra.gmra.mrb[102].mxu0 %vm523_vm10, %v8639_v3 }
0x12c5   : > { %v14795_v13 = vpop.eup %14794  ;;  %14146 = vmatpush3.msra.mxu0 %v8800_v0  ;;  %14147 = vmatprep.mubr.msk.f32.mxu0 %vm14969_vm9, %v14968_v10 }
0x12c6   : > { %v8630_v7 = vpop.xlane.xlu0 %8629  ;;  %v8642_v8 = vmul.f32 %v14795_v13, %v16679_v36  ;;  %14155 = vmatprep.subr.mxu0 %v14968_v10 }
0x12c7   : > { %14802 = vrcp.f32 %v8630_v7 }
0x12c8   : > { %14153 = vmatmul.mubr.msk.f32.vlgmr.msra.gmra.mrb[124].mxu1 %vm523_vm10, %v8642_v8 }
0x12c9   : > { %14161 = vmatpush3.msra.mxu1 %v9028_v17  ;;  %14162 = vmatprep.mubr.msk.f32.mxu1 %vm14969_vm9, %v14968_v10  ;;  %v14797_v32 = vpop.eup %14796 }
0x12ca   : > { %14170 = vmatprep.subr.mxu1 %v14968_v10  ;;  %v8641_v23 = vmul.f32 %v14797_v32, %v16683_v40  ;;  %v14799_v50 = vpop.eup %14798  ;;  %v9452_v36 = vpop.permute.xlu0 %9451 }
0x12cb   : > { %v8643_v26 = vmul.f32 %v14799_v50, %v16685_v39 }
0x12cc   : > { %14148 = vmatmul.mubr.msk.f32.vlgmr.msra.gmra.mrb[104].mxu0 %vm523_vm10, %v8641_v23 }
0x12cd   : > { %v14801_v61 = vpop.eup %14800  ;;  %14156 = vmatpush3.msra.mxu0 %v8952_v45  ;;  %14157 = vmatprep.mubr.msk.f32.mxu0 %vm14969_vm9, %v14968_v10 }
0x12ce   : > { %v8644_v30 = vmul.f32 %v14801_v61, %v16691_v57  ;;  %14165 = vmatprep.subr.mxu0 %v14968_v10  ;;  %v9610_v52 = vpop.permute.xlu0 %9609 }
0x12d0   : > { %14163 = vmatmul.mubr.msk.f32.vlgmr.msra.gmra.mrb[126].mxu1 %vm523_vm10, %v8644_v30  ;;  %14158 = vmatmul.mubr.msk.f32.vlgmr.msra.gmra.mrb[106].mxu0 %vm523_vm10, %v8643_v26 }
0x12d1   : > { %v14803_v18 = vpop.eup %14802  ;;  %14171 = vmatpush3.msra.mxu1 %v16725_v11  ;;  %14166 = vmatpush3.msra.mxu0 %v9104_v34 }
0x12d2   : > { %14172 = vmatprep.mubr.msk.f32.mxu1 %vm14969_vm9, %v14968_v10  ;;  %v8646_v53 = vmul.f32 %v14803_v18, %v16695_v59  ;;  %14180 = vmatprep.subr.mxu1 %v14968_v10  ;;  %v9608_v40 = vpop.permute.xlu0 %9607 }
0x12d3   : > { %14167 = vmatprep.mubr.msk.f32.mxu0 %vm14969_vm9, %v14968_v10  ;;  %14175 = vmatprep.subr.mxu0 %v14968_v10 }
0x12d4   : > { %14173 = vmatmul.mubr.msk.f32.vlgmr.msra.gmra.mrb[128].mxu1 %vm523_vm10, %v8646_v53 }
0x12d5   : > { %14182 = vmatprep.mubr.msk.f32.mxu1 %vm14969_vm9, %v14968_v10 }
0x12d6   : > { %v9766_v47 = vpop.permute.xlu0 %9765 }
0x12d8   : > { %14181 = vmatpush3.xpose.msk.msra.mxu1 %vm523_vm10, %v16733_v22 }
0x12d9   : > { %14190 = vmatprep.subr.mxu1 %v14968_v10 }
0x12da   : > { %v9764_v59 = vpop.permute.xlu0 %9763 }
0x12db   : > { %14183 = vmatmul.mubr.msk.f32.vlgmr.msra.gmra.mrb[130].mxu1 %vm523_vm10, %v16737_v60 }
0x12dc   : > { %14191 = vmatpush3.xpose.msk.msra.mxu1 %vm523_vm10, %v16743_v28  ;;  %14192 = vmatprep.mubr.msk.f32.mxu1 %vm14969_vm9, %v14968_v10 }
0x12dd   : > { %14200 = vmatprep.subr.mxu1 %v14968_v10 }
0x12de   : > { %v10052_v6 = vpop.permute.xlu0 %10051 }
0x12df   : > { %14193 = vmatmul.mubr.msk.f32.vlgmr.msra.gmra.mrb[132].mxu1 %vm523_vm10, %v9530_v5 }
0x12e0   : > { %14202 = vmatprep.mubr.msk.f32.mxu1 %vm14969_vm9, %v14968_v10 }
0x12f3   : > { %v8627_v39 = vpop.xlane.xlu1 %8626 }
0x12f4   : > { %14804 = vrcp.f32 %v8627_v39 }
0x12f7   : > { %v9688_v43 = vpop.permute.xlu1 %9687 }
0x12f8   : > { %14201 = vmatpush3.xpose.msk.msra.mxu1 %vm523_vm10, %v9688_v43 }
0x12f9   : > { %14210 = vmatprep.subr.mxu1 %v14968_v10 }
0x12fb   : > { %v9686_v57 = vpop.permute.xlu1 %9685 }
0x12fc   : > { %14203 = vmatmul.mubr.msk.f32.vlgmr.msra.gmra.mrb[134].mxu1 %vm523_vm10, %v9686_v57 }
0x12fd   : > { %14212 = vmatprep.mubr.msk.f32.mxu1 %vm14969_vm9, %v14968_v10 }
0x12fe   : > { %v14805_v55 = vpop.eup %14804 }
0x12ff   : > { %v9844_v62 = vpop.permute.xlu1 %9843  ;;  %v8645_v15 = vmul.f32 %v14805_v55, %v16711_v63 }
0x1300   : > { %14211 = vmatpush3.xpose.msk.msra.mxu1 %vm523_vm10, %v9844_v62 }
0x1301   : > { %14168 = vmatmul.mubr.msk.f32.vlgmr.msra.gmra.mrb[108].mxu0 %vm523_vm10, %v8645_v15  ;;  %14220 = vmatprep.subr.mxu1 %v14968_v10 }
0x1302   : > { %14176 = vmatpush3.xpose.msk.msra.mxu0 %vm523_vm10, %v16764_v24  ;;  %14177 = vmatprep.mubr.msk.f32.mxu0 %vm14969_vm9, %v14968_v10 }
0x1303   : > { %v9842_v0 = vpop.permute.xlu1 %9841  ;;  %14185 = vmatprep.subr.mxu0 %v14968_v10 }
0x1304   : > { %14213 = vmatmul.mubr.msk.f32.vlgmr.msra.gmra.mrb[136].mxu1 %vm523_vm10, %v9842_v0 }
0x1305   : > { %14221 = vmatpush3.msra.mxu1 %v10052_v6  ;;  %14178 = vmatmul.mubr.msk.f32.vlgmr.msra.gmra.mrb[110].mxu0 %vm523_vm10, %v16766_v2 }
0x1306   : > { %14186 = vmatpush3.xpose.msk.msra.mxu0 %vm523_vm10, %v16768_v56  ;;  %14187 = vmatprep.mubr.msk.f32.mxu0 %vm14969_vm9, %v14968_v10 }
0x1307   : > { %14195 = vmatprep.subr.mxu0 %v14968_v10  ;;  %14222 = vmatprep.mubr.msk.f32.mxu1 %vm14969_vm9, %v14968_v10  ;;  %v9976_v63 = vpop.permute.xlu1 %9975 }
0x1308   : > { %14230 = vmatprep.subr.mxu1 %v14968_v10 }
0x1309   : > { %14188 = vmatmul.mubr.msk.f32.vlgmr.msra.gmra.mrb[112].mxu0 %vm523_vm10, %v9452_v36 }
0x130a   : > { %14196 = vmatpush3.xpose.msk.msra.mxu0 %vm523_vm10, %v9610_v52  ;;  %14197 = vmatprep.mubr.msk.f32.mxu0 %vm14969_vm9, %v14968_v10 }
0x130b   : > { %14205 = vmatprep.subr.mxu0 %v14968_v10 }
0x130d   : > { %14198 = vmatmul.mubr.msk.f32.vlgmr.msra.gmra.mrb[114].mxu0 %vm523_vm10, %v9608_v40 }
0x130e   : > { %14206 = vmatpush3.xpose.msk.msra.mxu0 %vm523_vm10, %v9766_v47  ;;  %14207 = vmatprep.mubr.msk.f32.mxu0 %vm14969_vm9, %v14968_v10 }
0x130f   : > { %14215 = vmatprep.subr.mxu0 %v14968_v10 }
0x1311   : > { %14208 = vmatmul.mubr.msk.f32.vlgmr.msra.gmra.mrb[116].mxu0 %vm523_vm10, %v9764_v59 }
0x1312   : > { %14216 = vmatpush3.msra.mxu0 %v9976_v63  ;;  %14217 = vmatprep.mubr.msk.f32.mxu0 %vm14969_vm9, %v14968_v10 }
0x1313   : > { %14225 = vmatprep.subr.mxu0 %v14968_v10 }
0x136d   : > { %v16852_v16 = vpop.f32.mrb[122].mxu1 }
0x136e   : > { %v14144_v17 = vpop.f32.mrb[123].mxu1 }
0x1397   : > { %v16854_v11 = vpop.f32.mrb[102].mxu0 }
0x1398   : > { %v14139_v22 = vpop.f32.mrb[103].mxu0 }
0x139b   : > { %v16856_v60 = vpop.f32.mrb[124].mxu1 }
0x139c   : > { %v14154_v28 = vpop.f32.mrb[125].mxu1 }
0x139f   : > { %v16858_v54 = vpop.f32.mrb[104].mxu0 }
0x13a0   : > { %v14149_v42 = vpop.f32.mrb[105].mxu0 }
0x13a3   : > { %v16860_v19 = vpop.f32.mrb[126].mxu1  ;;  %v16862_v45 = vpop.f32.mrb[106].mxu0 }
0x13a4   : > { %v14164_v34 = vpop.f32.mrb[127].mxu1  ;;  %v14159_v24 = vpop.f32.mrb[107].mxu0 }
0x13a5   : > { %v10128_v24 = vpop.permute.xlu1 %10127 }
0x13a7   : > { %v16864_v2 = vpop.f32.mrb[128].mxu1 }
0x13a8   : > { %v14174_v56 = vpop.f32.mrb[129].mxu1 }
0x13ae   : > { %v9447_v38 = vpop.f32.mrb[130].mxu1 }
0x13af   : > { %v9921_v58 = vmul.f32 1.442695, %v9447_v38  ;;  %v14184_v1 = vpop.f32.mrb[131].mxu1 }
0x13b1   : > { %14806 = vpow2.f32 %v9921_v58 }
0x13b2   : > { %v9603_v46 = vpop.f32.mrb[132].mxu1 }
0x13b3   : > { %v14194_v4 = vpop.f32.mrb[133].mxu1  ;;  %v9925_v30 = vmul.f32 1.442695, %v9603_v46  ;;  %v10204_v46 = vpop.permute.xlu1 %10203 }
0x13b7   : > { %v10356_v4 = vpop.permute.xlu1 %10355 }
0x13bb   : > { %v16866_v21 = vpop.eup %14806 }
0x13bc   : > { %v9938_v3 = vsel %vm523_vm10, %v16866_v21, 0.0 }
0x13bd   : > { %9939 = vadd.xlane.f32.xlu1 %v9938_v3  ;;  %v16906_v3 = vpop.permute.xlu1 %10507 }
0x13ce   : > { %10857 = vrot.lane.b32.xlu1 %v16396_v31, %s17589_s7 }
0x13cf   : > { %v9759_v13 = vpop.f32.mrb[134].mxu1 }
0x13d0   : > { %v14204_v7 = vpop.f32.mrb[135].mxu1  ;;  %v9929_v40 = vmul.f32 1.442695, %v9759_v13  ;;  %v16910_v13 = vpop.permute.xlu1 %10703 }
0x13d4   : > { %v16872_v8 = vpop.f32.mrb[108].mxu0  ;;  %v16916_v7 = vpop.permute.xlu1 %10701 }
0x13d5   : > { %v14169_v32 = vpop.f32.mrb[109].mxu0 }
0x13d7   : > { %v9915_v23 = vpop.f32.mrb[136].mxu1 }
0x13d8   : > { %v9369_v50 = vpop.f32.mrb[110].mxu0  ;;  %v14214_v61 = vpop.f32.mrb[137].mxu1  ;;  %v9933_v34 = vmul.f32 1.442695, %v9915_v23 }
0x13d9   : > { %v9919_v26 = vmul.f32 1.442695, %v9369_v50  ;;  %v14179_v18 = vpop.f32.mrb[111].mxu0  ;;  %v16924_v32 = vpop.permute.xlu1 %10859 }
0x13da   : > { %v10280_v50 = vpop.permute.xlu0 %10279 }
0x13db   : > { %14808 = vpow2.f32 %v9919_v26 }
0x13dc   : > { %v9525_v53 = vpop.f32.mrb[112].mxu0  ;;  %14810 = vpow2.f32 %v9925_v30 }
0x13dd   : > { %v9923_v5 = vmul.f32 1.442695, %v9525_v53  ;;  %v14189_v36 = vpop.f32.mrb[113].mxu0 }
0x13df   : > { %14812 = vpow2.f32 %v9923_v5 }
0x13e0   : > { %v9681_v52 = vpop.f32.mrb[114].mxu0 }
0x13e1   : > { %v9927_v39 = vmul.f32 1.442695, %v9681_v52  ;;  %v14199_v43 = vpop.f32.mrb[115].mxu0 }
0x13e3   : > { %14814 = vpow2.f32 %v9927_v39 }
0x13e4   : > { %v9837_v47 = vpop.f32.mrb[116].mxu0  ;;  %14816 = vpow2.f32 %v9929_v40 }
0x13e5   : > { %v16874_v57 = vpop.eup %14808  ;;  %v14209_v55 = vpop.f32.mrb[117].mxu0  ;;  %v9931_v42 = vmul.f32 1.442695, %v9837_v47 }
0x13e6   : > { %v9935_v59 = vsel %vm523_vm10, %v16874_v57, 0.0  ;;  %v16878_v62 = vpop.eup %14810 }
0x13e7   : > { %9936 = vadd.xlane.f32.xlu0 %v9935_v59  ;;  %v9944_v15 = vsel %vm523_vm10, %v16878_v62, 0.0  ;;  %14818 = vpow2.f32 %v9931_v42 }
0x13e8   : > { %14820 = vpow2.f32 %v9933_v34 }
0x13e9   : > { %v16882_v0 = vpop.eup %14812 }
0x13ea   : > { %v9941_v63 = vsel %vm523_vm10, %v16882_v0, 0.0 }
0x13eb   : > { %9945 = vadd.xlane.f32.xlu0 %v9944_v15 }
0x13ed   : > { %v16884_v6 = vpop.eup %14814 }
0x13ee   : > { %v16888_v17 = vpop.eup %14816  ;;  %v9947_v22 = vsel %vm523_vm10, %v16884_v6, 0.0 }
0x13ef   : > { %9942 = vadd.xlane.f32.xlu0 %v9941_v63  ;;  %v9950_v28 = vsel %vm523_vm10, %v16888_v17, 0.0 }
0x13f1   : > { %v16898_v56 = vpop.eup %14818 }
0x13f2   : > { %9948 = vadd.xlane.f32.xlu1 %v9947_v22  ;;  %v16900_v38 = vpop.eup %14820  ;;  %v9953_v58 = vsel %vm523_vm10, %v16898_v56, 0.0 }
0x13f3   : > { %9951 = vadd.xlane.f32.xlu0 %v9950_v28  ;;  %v9956_v1 = vsel %vm523_vm10, %v16900_v38, 0.0 }
0x1403   : > { %11015 = vrot.lane.b32.xlu1 %v16400_v51, %s17588_s6 }
0x1409   : > { %10779 = vrot.lane.b32.xlu0 %v16392_v12, %s17589_s7 }
0x1427   : > { %9954 = vadd.xlane.f32.xlu1 %v9953_v58 }
0x1428   : > { %9957 = vadd.xlane.f32.xlu0 %v9956_v1 }
0x1438   : > { %11013 = vrot.lane.b32.xlu1 %v16400_v51, %s17589_s7 }
0x143c   : > { %11171 = vrot.lane.b32.xlu1 %v16408_v35, %s17588_s6 }
0x143e   : > { %10937 = vrot.lane.b32.xlu0 %v16402_v33, %s17588_s6 }
0x1440   : > { %11169 = vrot.lane.b32.xlu1 %v16408_v35, %s17589_s7 }
0x1442   : > { %10935 = vrot.lane.b32.xlu0 %v16402_v33, %s17589_s7 }
0x1444   : > { %11303 = vrot.lane.b32.xlu1 %v16386_v9, %s17590_s8 }
0x1446   : > { %11093 = vrot.lane.b32.xlu0 %v16410_v37, %s17588_s6  ;;  %s13156_s6 = sshll.u32 %s15026_s16, 7  ;;  %s12760_s16 = scalar_lea.sflag [#allocation4], %s162_s5 }
0x1447   : > { %s17525_s11 = scalar_lea.hbm %s17573_s3, %s13156_s6 }
0x1448   : > { %11455 = vrot.lane.b32.xlu1 %v16392_v12, %s17590_s8 }
0x144a   : > { %v9940_v23 = vpop.xlane.xlu1 %9939  ;;  %11091 = vrot.lane.b32.xlu0 %v16410_v37, %s17589_s7  ;;  %s164_s7 = scalar_lea.vmem [#allocation3], %s17518_s28 }
0x144b   : > { %14822 = vrcp.f32 %v9940_v23 }
0x144c   : > { %11531 = vrot.lane.b32.xlu1 %v16396_v31, %s17590_s8  ;;  %v10432_v31 = vpop.permute.xlu0 %10431 }
0x144e   : > { %11379 = vrot.lane.b32.xlu0 %v16384_v29, %s17590_s8 }
0x1450   : > { %11683 = vrot.lane.b32.xlu1 %v16400_v51, %s17590_s8  ;;  %v10626_v29 = vpop.permute.xlu0 %10625 }
0x1452   : > { %11607 = vrot.lane.b32.xlu0 %v16402_v33, %s17590_s8 }
0x1454   : > { %v16945_v61 = vpop.permute.xlu0 %10623 }
0x1455   : > { %v14823_v9 = vpop.eup %14822 }
0x1456   : > { %v9968_v12 = vmul.f32 %v14823_v9, %v16866_v21  ;;  %v16949_v21 = vpop.permute.xlu1 %10857 }
0x1458   : > { %14223 = vmatmul.mubr.msk.f32.vlgmr.msra.gmra.mrb[138].mxu1 %vm523_vm10, %v9968_v12  ;;  %v16947_v51 = vpop.permute.xlu0 %10781 }
0x1459   : > { %14231 = vmatpush3.msra.mxu1 %v10204_v46  ;;  %14232 = vmatprep.mubr.msk.f32.mxu1 %vm14969_vm9, %v14968_v10 }
0x145a   : > { %14240 = vmatprep.subr.mxu1 %v14968_v10 }
0x1474   : > { %v9937_v30 = vpop.xlane.xlu0 %9936 }
0x1475   : > { %14824 = vrcp.f32 %v9937_v30 }
0x1478   : > { %v9946_v33 = vpop.xlane.xlu0 %9945 }
0x1479   : > { %14826 = vrcp.f32 %v9946_v33 }
0x147c   : > { %v9943_v26 = vpop.xlane.xlu0 %9942 }
0x147d   : > { %14828 = vrcp.f32 %v9943_v26 }
0x147f   : > { %v14825_v18 = vpop.eup %14824  ;;  %v9949_v53 = vpop.xlane.xlu1 %9948 }
0x1480   : > { %v9967_v5 = vmul.f32 %v14825_v18, %v16874_v57  ;;  %14830 = vrcp.f32 %v9949_v53  ;;  %v9952_v36 = vpop.xlane.xlu0 %9951 }
0x1481   : > { %14832 = vrcp.f32 %v9952_v36 }
0x1482   : > { %14218 = vmatmul.mubr.msk.f32.vlgmr.msra.gmra.mrb[118].mxu0 %vm523_vm10, %v9967_v5 }
0x1483   : > { %v14827_v52 = vpop.eup %14826  ;;  %14226 = vmatpush3.msra.mxu0 %v10128_v24  ;;  %14227 = vmatprep.mubr.msk.f32.mxu0 %vm14969_vm9, %v14968_v10 }
0x1484   : > { %v9970_v40 = vmul.f32 %v14827_v52, %v16878_v62  ;;  %14235 = vmatprep.subr.mxu0 %v14968_v10  ;;  %v11016_v62 = vpop.permute.xlu1 %11015  ;;  %v10780_v15 = vpop.permute.xlu0 %10779 }
0x1486   : > { %14233 = vmatmul.mubr.msk.f32.vlgmr.msra.gmra.mrb[140].mxu1 %vm523_vm10, %v9970_v40 }
0x1487   : > { %v14829_v39 = vpop.eup %14828  ;;  %14241 = vmatpush3.msra.mxu1 %v10356_v4  ;;  %14242 = vmatprep.mubr.msk.f32.mxu1 %vm14969_vm9, %v14968_v10 }
0x1488   : > { %v9969_v43 = vmul.f32 %v14829_v39, %v16882_v0  ;;  %14250 = vmatprep.subr.mxu1 %v14968_v10 }
0x148a   : > { %v14831_v47 = vpop.eup %14830  ;;  %14228 = vmatmul.mubr.msk.f32.vlgmr.msra.gmra.mrb[120].mxu0 %vm523_vm10, %v9969_v43 }
0x148b   : > { %v14833_v57 = vpop.eup %14832  ;;  %14236 = vmatpush3.msra.mxu0 %v10280_v50  ;;  %14237 = vmatprep.mubr.msk.f32.mxu0 %vm14969_vm9, %v14968_v10  ;;  %v9971_v55 = vmul.f32 %v14831_v47, %v16884_v6 }
0x148c   : > { %v9972_v59 = vmul.f32 %v14833_v57, %v16888_v17  ;;  %14245 = vmatprep.subr.mxu0 %v14968_v10 }
0x148e   : > { %14238 = vmatmul.mubr.msk.f32.vlgmr.msra.gmra.mrb[122].mxu0 %vm523_vm10, %v9971_v55  ;;  %14243 = vmatmul.mubr.msk.f32.vlgmr.msra.gmra.mrb[142].mxu1 %vm523_vm10, %v9972_v59 }
0x148f   : > { %14246 = vmatpush3.msra.mxu0 %v10432_v31  ;;  %14251 = vmatpush3.msra.mxu1 %v16906_v3 }
0x1490   : > { %14247 = vmatprep.mubr.msk.f32.mxu0 %vm14969_vm9, %v14968_v10  ;;  %14255 = vmatprep.subr.mxu0 %v14968_v10 }
0x1491   : > { %14252 = vmatprep.mubr.msk.f32.mxu1 %vm14969_vm9, %v14968_v10  ;;  %14260 = vmatprep.subr.mxu1 %v14968_v10 }
0x14b4   : > { %v9955_v0 = vpop.xlane.xlu1 %9954 }
0x14b5   : > { %14834 = vrcp.f32 %v9955_v0  ;;  %v9958_v6 = vpop.xlane.xlu0 %9957 }
0x14b6   : > { %14836 = vrcp.f32 %v9958_v6 }
0x14b8   : > { %v11014_v42 = vpop.permute.xlu1 %11013 }
0x14b9   : > { %v10938_v63 = vpop.permute.xlu0 %10937 }
0x14bd   : > { %v10936_v24 = vpop.permute.xlu0 %10935 }
0x14bf   : > { %v14835_v17 = vpop.eup %14834 }
0x14c0   : > { %v14837_v22 = vpop.eup %14836  ;;  %v9973_v28 = vmul.f32 %v14835_v17, %v16898_v56  ;;  %v11172_v56 = vpop.permute.xlu1 %11171 }
0x14c1   : > { %v9974_v34 = vmul.f32 %v14837_v22, %v16900_v38  ;;  %v11094_v38 = vpop.permute.xlu0 %11093 }
0x14c2   : > { %14248 = vmatmul.mubr.msk.f32.vlgmr.msra.gmra.mrb[124].mxu0 %vm523_vm10, %v9973_v28 }
0x14c3   : > { %14256 = vmatpush3.xpose.msk.msra.mxu0 %vm523_vm10, %v10626_v29  ;;  %14253 = vmatmul.mubr.msk.f32.vlgmr.msra.gmra.mrb[144].mxu1 %vm523_vm10, %v9974_v34 }
0x14c4   : > { %14261 = vmatpush3.xpose.msk.msra.mxu1 %vm523_vm10, %v16910_v13  ;;  %14257 = vmatprep.mubr.msk.f32.mxu0 %vm14969_vm9, %v14968_v10  ;;  %v11170_v58 = vpop.permute.xlu1 %11169 }
0x14c5   : > { %14265 = vmatprep.subr.mxu0 %v14968_v10  ;;  %14262 = vmatprep.mubr.msk.f32.mxu1 %vm14969_vm9, %v14968_v10  ;;  %v11092_v1 = vpop.permute.xlu0 %11091 }
0x14c6   : > { %14258 = vmatmul.mubr.msk.f32.vlgmr.msra.gmra.mrb[126].mxu0 %vm523_vm10, %v16945_v61  ;;  %14270 = vmatprep.subr.mxu1 %v14968_v10 }
0x14c7   : > { %14266 = vmatpush3.xpose.msk.msra.mxu0 %vm523_vm10, %v16947_v51  ;;  %14263 = vmatmul.mubr.msk.f32.vlgmr.msra.gmra.mrb[146].mxu1 %vm523_vm10, %v16916_v7 }
0x14c8   : > { %14271 = vmatpush3.xpose.msk.msra.mxu1 %vm523_vm10, %v16924_v32  ;;  %14267 = vmatprep.mubr.msk.f32.mxu0 %vm14969_vm9, %v14968_v10  ;;  %v11304_v46 = vpop.permute.xlu1 %11303 }
0x14c9   : > { %14275 = vmatprep.subr.mxu0 %v14968_v10  ;;  %14272 = vmatprep.mubr.msk.f32.mxu1 %vm14969_vm9, %v14968_v10  ;;  %v11380_v4 = vpop.permute.xlu0 %11379 }
0x14ca   : > { %14268 = vmatmul.mubr.msk.f32.vlgmr.msra.gmra.mrb[128].mxu0 %vm523_vm10, %v10780_v15  ;;  %14280 = vmatprep.subr.mxu1 %v14968_v10 }
0x14cb   : > { %14276 = vmatpush3.xpose.msk.msra.mxu0 %vm523_vm10, %v10938_v63  ;;  %14273 = vmatmul.mubr.msk.f32.vlgmr.msra.gmra.mrb[148].mxu1 %vm523_vm10, %v16949_v21 }
0x14cc   : > { %14281 = vmatpush3.xpose.msk.msra.mxu1 %vm523_vm10, %v11016_v62  ;;  %14277 = vmatprep.mubr.msk.f32.mxu0 %vm14969_vm9, %v14968_v10 }
0x14cd   : > { %14285 = vmatprep.subr.mxu0 %v14968_v10  ;;  %14282 = vmatprep.mubr.msk.f32.mxu1 %vm14969_vm9, %v14968_v10 }
0x14ce   : > { %14278 = vmatmul.mubr.msk.f32.vlgmr.msra.gmra.mrb[130].mxu0 %vm523_vm10, %v10936_v24  ;;  %14290 = vmatprep.subr.mxu1 %v14968_v10 }
0x14cf   : > { %14286 = vmatpush3.xpose.msk.msra.mxu0 %vm523_vm10, %v11094_v38  ;;  %14283 = vmatmul.mubr.msk.f32.vlgmr.msra.gmra.mrb[150].mxu1 %vm523_vm10, %v11014_v42 }
0x14d0   : > { %14291 = vmatpush3.xpose.msk.msra.mxu1 %vm523_vm10, %v11172_v56  ;;  %14287 = vmatprep.mubr.msk.f32.mxu0 %vm14969_vm9, %v14968_v10 }
0x14d1   : > { %14295 = vmatprep.subr.mxu0 %v14968_v10  ;;  %14292 = vmatprep.mubr.msk.f32.mxu1 %vm14969_vm9, %v14968_v10 }
0x14d2   : > { %14288 = vmatmul.mubr.msk.f32.vlgmr.msra.gmra.mrb[132].mxu0 %vm523_vm10, %v11092_v1  ;;  %14300 = vmatprep.subr.mxu1 %v14968_v10 }
0x14d3   : > { %14296 = vmatpush3.msra.mxu0 %v11304_v46  ;;  %14293 = vmatmul.mubr.msk.f32.vlgmr.msra.gmra.mrb[152].mxu1 %vm523_vm10, %v11170_v58 }
0x14d4   : > { %14301 = vmatpush3.msra.mxu1 %v11380_v4  ;;  %14297 = vmatprep.mubr.msk.f32.mxu0 %vm14969_vm9, %v14968_v10 }
0x14d5   : > { %14305 = vmatprep.subr.mxu0 %v14968_v10  ;;  %14302 = vmatprep.mubr.msk.f32.mxu1 %vm14969_vm9, %v14968_v10 }
0x14d6   : > { %14310 = vmatprep.subr.mxu1 %v14968_v10 }
0x152b   : > { %v17033_v3 = vpop.f32.mrb[138].mxu1 }
0x152c   : > { %v14224_v13 = vpop.f32.mrb[139].mxu1 }
0x1555   : > { %v17035_v7 = vpop.f32.mrb[118].mxu0 }
0x1556   : > { %v14219_v32 = vpop.f32.mrb[119].mxu0 }
0x1559   : > { %v17037_v23 = vpop.f32.mrb[140].mxu1 }
0x155a   : > { %v14234_v9 = vpop.f32.mrb[141].mxu1 }
0x155d   : > { %v17039_v12 = vpop.f32.mrb[120].mxu0 }
0x155e   : > { %v14229_v50 = vpop.f32.mrb[121].mxu0 }
0x1561   : > { %v17041_v31 = vpop.f32.mrb[122].mxu0  ;;  %v17043_v29 = vpop.f32.mrb[142].mxu1 }
0x1562   : > { %v14239_v61 = vpop.f32.mrb[123].mxu0  ;;  %v14244_v51 = vpop.f32.mrb[143].mxu1 }
0x1595   : > { %v17045_v30 = vpop.f32.mrb[124].mxu0 }
0x1596   : > { %v14249_v33 = vpop.f32.mrb[125].mxu0  ;;  %v17047_v21 = vpop.f32.mrb[144].mxu1 }
0x1597   : > { %v14254_v26 = vpop.f32.mrb[145].mxu1 }
0x1599   : > { %v10697_v18 = vpop.f32.mrb[126].mxu0 }
0x159a   : > { %v11247_v53 = vmul.f32 1.442695, %v10697_v18  ;;  %v14259_v5 = vpop.f32.mrb[127].mxu0  ;;  %v10775_v36 = vpop.f32.mrb[146].mxu1 }
0x159b   : > { %v11249_v52 = vmul.f32 1.442695, %v10775_v36  ;;  %v14264_v40 = vpop.f32.mrb[147].mxu1 }
0x159c   : > { %14838 = vpow2.f32 %v11247_v53 }
0x159d   : > { %14840 = vpow2.f32 %v11249_v52  ;;  %v10853_v39 = vpop.f32.mrb[128].mxu0 }
0x159e   : > { %v14269_v43 = vpop.f32.mrb[129].mxu0  ;;  %v10931_v47 = vpop.f32.mrb[148].mxu1  ;;  %v11251_v57 = vmul.f32 1.442695, %v10853_v39 }
0x159f   : > { %v11253_v55 = vmul.f32 1.442695, %v10931_v47  ;;  %v14274_v59 = vpop.f32.mrb[149].mxu1 }
0x15a1   : > { %14842 = vpow2.f32 %v11253_v55  ;;  %v11009_v62 = vpop.f32.mrb[130].mxu0 }
0x15a2   : > { %v11255_v15 = vmul.f32 1.442695, %v11009_v62  ;;  %v14279_v0 = vpop.f32.mrb[131].mxu0  ;;  %v11087_v6 = vpop.f32.mrb[150].mxu1  ;;  %14844 = vpow2.f32 %v11251_v57 }
0x15a3   : > { %v11257_v63 = vmul.f32 1.442695, %v11087_v6  ;;  %v14284_v17 = vpop.f32.mrb[151].mxu1 }
0x15a4   : > { %14846 = vpow2.f32 %v11255_v15 }
0x15a5   : > { %v11165_v22 = vpop.f32.mrb[132].mxu0  ;;  %14848 = vpow2.f32 %v11257_v63 }
0x15a6   : > { %v17049_v28 = vpop.eup %14838  ;;  %v11259_v42 = vmul.f32 1.442695, %v11165_v22  ;;  %v14289_v34 = vpop.f32.mrb[133].mxu0 }
0x15a7   : > { %v11243_v24 = vpop.f32.mrb[152].mxu1  ;;  %v17051_v56 = vpop.eup %14840  ;;  %v11263_v58 = vsel %vm523_vm10, %v17049_v28, 0.0 }
0x15a8   : > { %v11261_v38 = vmul.f32 1.442695, %v11243_v24  ;;  %v14294_v1 = vpop.f32.mrb[153].mxu1  ;;  %14850 = vpow2.f32 %v11259_v42  ;;  %11264 = vadd.xlane.f32.xlu0 %v11263_v58  ;;  %v11266_v46 = vsel %vm523_vm10, %v17051_v56, 0.0 }
0x15a9   : > { %11267 = vadd.xlane.f32.xlu1 %v11266_v46 }
0x15aa   : > { %14852 = vpow2.f32 %v11261_v38 }
0x15ab   : > { %v17057_v4 = vpop.eup %14842 }
0x15ac   : > { %v11272_v13 = vsel %vm523_vm10, %v17057_v4, 0.0  ;;  %v17061_v32 = vpop.eup %14844 }
0x15ad   : > { %11273 = vadd.xlane.f32.xlu0 %v11272_v13  ;;  %v11269_v61 = vsel %vm523_vm10, %v17061_v32, 0.0 }
0x15ae   : > { %v17063_v9 = vpop.eup %14846 }
0x15af   : > { %v11275_v50 = vsel %vm523_vm10, %v17063_v9, 0.0  ;;  %v17069_v51 = vpop.eup %14848 }
0x15b0   : > { %11276 = vadd.xlane.f32.xlu1 %v11275_v50  ;;  %v11278_v18 = vsel %vm523_vm10, %v17069_v51, 0.0 }
0x15b1   : > { %11270 = vadd.xlane.f32.xlu0 %v11269_v61  ;;  %v12997_v61 = vld [vmem:[%s17572_s2 + $0xd8] sm:$0xff] }
0x15b2   : > { %v17071_v33 = vpop.eup %14850 }
0x15b3   : > { %v11281_v26 = vsel %vm523_vm10, %v17071_v33, 0.0 }
0x15b4   : > { %11282 = vadd.xlane.f32.xlu1 %v11281_v26  ;;  %v17077_v53 = vpop.eup %14852 }
0x15b5   : > { %11279 = vadd.xlane.f32.xlu0 %v11278_v18  ;;  %v11284_v5 = vsel %vm523_vm10, %v17077_v53, 0.0 }
0x15b9   : > { %11285 = vadd.xlane.f32.xlu0 %v11284_v5 }
0x15c5   : > { %11835 = vrot.lane.b32.xlu1 %v16408_v35, %s17590_s8  ;;  %v11456_v35 = vpop.permute.xlu1 %11455 }
0x15c9   : > { %9265 = vrot.lane.b32.xlu1 %v16852_v16, %s17591_s9  ;;  %v11608_v16 = vpop.permute.xlu0 %11607 }
0x15cd   : > { %10593 = vrot.lane.b32.xlu1 %v17033_v3, %s17592_s10 }
0x15cf   : > { %11759 = vrot.lane.b32.xlu0 %v16410_v37, %s17590_s8  ;;  %v11532_v37 = vpop.permute.xlu1 %11531  ;;  %s12773_s8 = sshll.u32 %s164_s7, 4  ;;  %s17527_s8 = int_to_ptr.vmem [resolvable:$true] %s12773_s8 }
0x15d0   : > { %s14902_s17 = scalar_lea.vmem %s17527_s8, 128  ;;  %p14909_p0 = scmp.lt.s32.totalorder %s17527_s8, %s14907_s25 }
0x15d1   : > { %9269 = vrot.lane.b32.xlu1 %v16856_v60, %s17591_s9  ;;  %p14903_p11 = scmp.ne.s32.totalorder %s17527_s8, %s14902_s17  ;;  %p14910_p1 = scmp.lt.s32.totalorder %s14908_s26, %s14902_s17 }
0x15d3   : > { %9263 = vrot.lane.b32.xlu0 %v16854_v11, %s17591_s9  ;;  %v11684_v11 = vpop.permute.xlu1 %11683  ;;  %p14904_p12 = pnand %p14903_p11, %p15043_p5  ;;  %p14911_p2 = por %p14910_p1, %p14909_p0 }
0x15d5   : > { %10597 = vrot.lane.b32.xlu1 %v17037_v23, %s17592_s10  ;;  %p14905_p13 = pneg %p14904_p12 }
0x15d7   : > { %10591 = vrot.lane.b32.xlu0 %v17035_v7, %s17592_s10  ;;  %p14912_p3 = pnand %p14911_p2, %p14905_p13 }
0x15d9   : > { %9273 = vrot.lane.b32.xlu1 %v16860_v19, %s17591_s9 }
0x15db   : > { %9267 = vrot.lane.b32.xlu0 %v16858_v54, %s17591_s9 }
0x15dd   : > { %10601 = vrot.lane.b32.xlu1 %v17043_v29, %s17592_s10 }
0x15df   : > { %10595 = vrot.lane.b32.xlu0 %v17039_v12, %s17592_s10 }
0x15e1   : > { %9277 = vrot.lane.b32.xlu1 %v16864_v2, %s17591_s9 }
0x15e3   : > { %9271 = vrot.lane.b32.xlu0 %v16862_v45, %s17591_s9 }
0x15e5   : > { %10605 = vrot.lane.b32.xlu1 %v17047_v21, %s17592_s10 }
0x15e7   : > { %10599 = vrot.lane.b32.xlu0 %v17041_v31, %s17592_s10 }
0x15eb   : > { %9275 = vrot.lane.b32.xlu0 %v16872_v8, %s17591_s9 }
0x15ef   : > { %10603 = vrot.lane.b32.xlu0 %v17045_v30, %s17592_s10 }
0x1635   : > { %v11265_v60 = vpop.xlane.xlu0 %11264 }
0x1636   : > { %14854 = vrcp.f32 %v11265_v60  ;;  %v11268_v54 = vpop.xlane.xlu1 %11267 }
0x1637   : > { %14856 = vrcp.f32 %v11268_v54 }
0x163a   : > { %v11274_v19 = vpop.xlane.xlu0 %11273 }
0x163b   : > { %14858 = vrcp.f32 %v11274_v19 }
0x163d   : > { %v11277_v45 = vpop.xlane.xlu1 %11276 }
0x163e   : > { %v11271_v2 = vpop.xlane.xlu0 %11270 }
0x163f   : > { %14860 = vrcp.f32 %v11271_v2 }
0x1640   : > { %v14855_v3 = vpop.eup %14854  ;;  %14862 = vrcp.f32 %v11277_v45 }
0x1641   : > { %v14857_v7 = vpop.eup %14856  ;;  %v11295_v8 = vmul.f32 %v14855_v3, %v17049_v28  ;;  %v11283_v23 = vpop.xlane.xlu1 %11282 }
0x1642   : > { %v11296_v12 = vmul.f32 %v14857_v7, %v17051_v56  ;;  %v11280_v31 = vpop.xlane.xlu0 %11279 }
0x1643   : > { %14298 = vmatmul.mubr.msk.f32.vlgmr.msra.gmra.mrb[134].mxu0 %vm523_vm10, %v11295_v8  ;;  %14864 = vrcp.f32 %v11280_v31 }
0x1644   : > { %14306 = vmatpush3.msra.mxu0 %v11456_v35  ;;  %14303 = vmatmul.mubr.msk.f32.vlgmr.msra.gmra.mrb[154].mxu1 %vm523_vm10, %v11296_v12  ;;  %14866 = vrcp.f32 %v11283_v23 }
0x1645   : > { %v14859_v29 = vpop.eup %14858  ;;  %v11836_v30 = vpop.permute.xlu1 %11835  ;;  %14311 = vmatpush3.msra.mxu1 %v11532_v37  ;;  %14312 = vmatprep.mubr.msk.f32.mxu1 %vm14969_vm9, %v14968_v10 }
0x1646   : > { %v11298_v21 = vmul.f32 %v14859_v29, %v17057_v4  ;;  %v11286_v36 = vpop.xlane.xlu0 %11285  ;;  %14320 = vmatprep.subr.mxu1 %v14968_v10  ;;  %14307 = vmatprep.mubr.msk.f32.mxu0 %vm14969_vm9, %v14968_v10 }
0x1647   : > { %14868 = vrcp.f32 %v11286_v36  ;;  %14315 = vmatprep.subr.mxu0 %v14968_v10 }
0x1648   : > { %14313 = vmatmul.mubr.msk.f32.vlgmr.msra.gmra.mrb[156].mxu1 %vm523_vm10, %v11298_v21 }
0x1649   : > { %v14861_v52 = vpop.eup %14860  ;;  %v9266_v40 = vpop.permute.xlu1 %9265  ;;  %14321 = vmatpush3.msra.mxu1 %v11684_v11  ;;  %14322 = vmatprep.mubr.msk.f32.mxu1 %vm14969_vm9, %v14968_v10 }
0x164a   : > { %v11297_v39 = vmul.f32 %v14861_v52, %v17061_v32  ;;  %9288 = vst.msk [vmem:[#allocation2 + $0x8] sm:$0xff] %vm3129_vm11, %v9266_v40  ;;  %v11760_v43 = vpop.permute.xlu0 %11759  ;;  %14330 = vmatprep.subr.mxu1 %v14968_v10  ;;  %v14863_v47 = vpop.eup %14862  ;;  %v12995_v32 = vld [vmem:[%s17572_s2 + $0xc8] sm:$0xff] }
0x164b   : > { %v11299_v59 = vmul.f32 %v14863_v47, %v17063_v9  ;;  %v12996_v9 = vld [vmem:[%s17572_s2 + $0xd0] sm:$0xff] }
0x164c   : > { %14308 = vmatmul.mubr.msk.f32.vlgmr.msra.gmra.mrb[136].mxu0 %vm523_vm10, %v11297_v39  ;;  %v14483_v50 = vpack.c.bf16 %v12996_v9, %v12995_v32 }
0x164d   : > { %v14865_v57 = vpop.eup %14864  ;;  %v10594_v55 = vpop.permute.xlu1 %10593  ;;  %14316 = vmatpush3.msra.mxu0 %v11608_v16  ;;  %14317 = vmatprep.mubr.msk.f32.mxu0 %vm14969_vm9, %v14968_v10 }
0x164e   : > { %v11300_v62 = vmul.f32 %v14865_v57, %v17069_v51  ;;  %10616 = vst.msk [vmem:[#allocation2 + $0x8] sm:$0xff] %vm4458_vm12, %v10594_v55  ;;  %v9264_v15 = vpop.permute.xlu0 %9263  ;;  %14325 = vmatprep.subr.mxu0 %v14968_v10  ;;  %v14867_v0 = vpop.eup %14866  ;;  %v12998_v51 = vld [vmem:[%s17572_s2 + $0xe0] sm:$0xff] }
0x164f   : > { %9287 = vst.msk [vmem:[#allocation2] sm:$0xff] %vm3129_vm11, %v9264_v15  ;;  %v11301_v17 = vmul.f32 %v14867_v0, %v17071_v33  ;;  %v14487_v33 = vpack.c.bf16 %v12998_v51, %v12997_v61  ;;  %v13124_v15 = vld [vmem:[%s17572_s2 + $0x149] ss:$0 sm:$0xff] }
0x1650   : > { %14318 = vmatmul.mubr.msk.f32.vlgmr.msra.gmra.mrb[138].mxu0 %vm523_vm10, %v11299_v59  ;;  %14323 = vmatmul.mubr.msk.f32.vlgmr.msra.gmra.mrb[158].mxu1 %vm523_vm10, %v11300_v62 }
0x1651   : > { %v14869_v6 = vpop.eup %14868  ;;  %v9270_v63 = vpop.permute.xlu1 %9269  ;;  %14326 = vmatpush3.msra.mxu0 %v11760_v43  ;;  %14331 = vmatpush3.msra.mxu1 %v11836_v30 }
0x1652   : > { %v11302_v22 = vmul.f32 %v14869_v6, %v17077_v53  ;;  %9290 = vst.msk [vmem:[#allocation2 + $0x18] sm:$0xff] %vm3129_vm11, %v9270_v63  ;;  %v10592_v28 = vpop.permute.xlu0 %10591  ;;  %14327 = vmatprep.mubr.msk.f32.mxu0 %vm14969_vm9, %v14968_v10  ;;  %14332 = vmatprep.mubr.msk.f32.mxu1 %vm14969_vm9, %v14968_v10 }
0x1653   : > { %10615 = vst.msk [vmem:[#allocation2] sm:$0xff] %vm4458_vm12, %v10592_v28  ;;  %14484 = vmatprep.subr.bf16.mxu0 %v14483_v50 }
0x1654   : > { %14328 = vmatmul.mubr.msk.f32.vlgmr.msra.gmra.mrb[140].mxu0 %vm523_vm10, %v11301_v17  ;;  %14333 = vmatmul.mubr.msk.f32.vlgmr.msra.gmra.mrb[160].mxu1 %vm523_vm10, %v11302_v22 }
0x1655   : > { %v10598_v42 = vpop.permute.xlu1 %10597  ;;  %14486 = vmatpush3.bf16.msra.mxu0 %v14483_v50 }
0x1656   : > { %10618 = vst.msk [vmem:[#allocation2 + $0x18] sm:$0xff] %vm4458_vm12, %v10598_v42  ;;  %v9268_v34 = vpop.permute.xlu0 %9267  ;;  %14488 = vmatprep.subr.bf16.mxu0 %v14487_v33 }
0x1657   : > { %9289 = vst.msk [vmem:[#allocation2 + $0x10] sm:$0xff] %vm3129_vm11, %v9268_v34 }
0x1659   : > { %v9274_v24 = vpop.permute.xlu1 %9273  ;;  %14490 = vmatpush3.bf16.msra.mxu0 %v14487_v33 }
0x165a   : > { %9292 = vst.msk [vmem:[#allocation2 + $0x28] sm:$0xff] %vm3129_vm11, %v9274_v24  ;;  %v10596_v56 = vpop.permute.xlu0 %10595 }
0x165b   : > { %10617 = vst.msk [vmem:[#allocation2 + $0x10] sm:$0xff] %vm4458_vm12, %v10596_v56 }
0x165d   : > { %v10602_v38 = vpop.permute.xlu1 %10601 }
0x165e   : > { %10620 = vst.msk [vmem:[#allocation2 + $0x28] sm:$0xff] %vm4458_vm12, %v10602_v38  ;;  %v9272_v10 = vpop.permute.xlu0 %9271 }
0x165f   : > { %9291 = vst.msk [vmem:[#allocation2 + $0x20] sm:$0xff] %vm3129_vm11, %v9272_v10 }
0x1661   : > { %v9278_v58 = vpop.permute.xlu1 %9277 }
0x1662   : > { %9294 = vst.msk [vmem:[#allocation2 + $0x38] sm:$0xff] %vm3129_vm11, %v9278_v58  ;;  %v10600_v1 = vpop.permute.xlu0 %10599 }
0x1663   : > { %10619 = vst.msk [vmem:[#allocation2 + $0x20] sm:$0xff] %vm4458_vm12, %v10600_v1 }
0x1665   : > { %v10606_v46 = vpop.permute.xlu1 %10605 }
0x1666   : > { %10622 = vst.msk [vmem:[#allocation2 + $0x38] sm:$0xff] %vm4458_vm12, %v10606_v46  ;;  %v9276_v4 = vpop.permute.xlu0 %9275 }
0x1667   : > { %9293 = vst.msk [vmem:[#allocation2 + $0x30] sm:$0xff] %vm3129_vm11, %v9276_v4 }
0x166a   : > { %v10604_v13 = vpop.permute.xlu0 %10603 }
0x166b   : > { %10621 = vst.msk [vmem:[#allocation2 + $0x30] sm:$0xff] %vm4458_vm12, %v10604_v13 }
0x1716   : > { %v11375_v26 = vpop.f32.mrb[134].mxu0 }
0x1717   : > { %11919 = vrot.lane.b32.xlu0 %v11375_v26, %s17593_s24  ;;  %v14299_v18 = vpop.f32.mrb[135].mxu0  ;;  %v11451_v53 = vpop.f32.mrb[154].mxu1 }
0x1718   : > { %11921 = vrot.lane.b32.xlu1 %v11451_v53, %s17593_s24  ;;  %v14304_v5 = vpop.f32.mrb[155].mxu1 }
0x171b   : > { %v11603_v35 = vpop.f32.mrb[156].mxu1 }
0x171c   : > { %11925 = vrot.lane.b32.xlu1 %v11603_v35, %s17593_s24  ;;  %v14314_v37 = vpop.f32.mrb[157].mxu1 }
0x171f   : > { %v11527_v16 = vpop.f32.mrb[136].mxu0 }
0x1720   : > { %11923 = vrot.lane.b32.xlu0 %v11527_v16, %s17593_s24  ;;  %v14309_v11 = vpop.f32.mrb[137].mxu0 }
0x1723   : > { %v11679_v60 = vpop.f32.mrb[138].mxu0  ;;  %v11755_v54 = vpop.f32.mrb[158].mxu1 }
0x1724   : > { %11927 = vrot.lane.b32.xlu0 %v11679_v60, %s17593_s24  ;;  %v14319_v19 = vpop.f32.mrb[139].mxu0  ;;  %11929 = vrot.lane.b32.xlu1 %v11755_v54, %s17593_s24  ;;  %v14324_v45 = vpop.f32.mrb[159].mxu1 }
0x1727   : > { %v11831_v2 = vpop.f32.mrb[140].mxu0  ;;  %v11907_v3 = vpop.f32.mrb[160].mxu1 }
0x1728   : > { %11933 = vrot.lane.b32.xlu1 %v11907_v3, %s17593_s24  ;;  %v14334_v7 = vpop.f32.mrb[161].mxu1  ;;  %11931 = vrot.lane.b32.xlu0 %v11831_v2, %s17593_s24  ;;  %v14329_v8 = vpop.f32.mrb[141].mxu0 }
0x1789   : > { %v11920_v23 = vpop.permute.xlu0 %11919 }
0x178a   : > { %11943 = vst.msk [vmem:[#allocation2] sm:$0xff] %vm5787_vm13, %v11920_v23  ;;  %v11922_v12 = vpop.permute.xlu1 %11921 }
0x178b   : > { %11944 = vst.msk [vmem:[#allocation2 + $0x8] sm:$0xff] %vm5787_vm13, %v11922_v12  ;;  %v12999_v12 = vld [vmem:[%s17572_s2 + $0xe8] sm:$0xff] }
0x178e   : > { %v11926_v31 = vpop.permute.xlu1 %11925 }
0x178f   : > { %11946 = vst.msk [vmem:[#allocation2 + $0x18] sm:$0xff] %vm5787_vm13, %v11926_v31  ;;  %v13000_v31 = vld [vmem:[%s17572_s2 + $0xf0] sm:$0xff] }
0x1791   : > { %v11951_v29 = vld [vmem:[#allocation2] sm:$0xff] }
0x1792   : > { %14343 = vmatprep.mubr.msk.f32.mxu0 %vm390_vm8, %v11951_v29  ;;  %v11924_v30 = vpop.permute.xlu0 %11923  ;;  %v11952_v21 = vld [vmem:[#allocation2 + $0x8] sm:$0xff]  ;;  %v14491_v29 = vpack.c.bf16 %v13000_v31, %v12999_v12  ;;  %v17311_v12 = vld [vmem:[%s17572_s2 + $0x14a] ss:$0 sm:$0xff] }
0x1793   : > { %11945 = vst.msk [vmem:[#allocation2 + $0x10] sm:$0xff] %vm5787_vm13, %v11924_v30  ;;  %14344 = vmatmul.mubr.msk.f32.vlgmr.msra.gmra.mrb[142].mxu0 %vm390_vm8, %v11952_v21  ;;  %v13001_v30 = vld [vmem:[%s17572_s2 + $0xf8] sm:$0xff]  ;;  %v13002_v21 = vld [vmem:[%s17572_s2 + $0x100] sm:$0xff] }
0x1794   : > { %14492 = vmatprep.subr.bf16.mxu1 %v14491_v29 }
0x1795   : > { %14494 = vmatpush3.bf16.msra.mxu1 %v14491_v29 }
0x1796   : > { %v11930_v36 = vpop.permute.xlu1 %11929  ;;  %v11928_v52 = vpop.permute.xlu0 %11927  ;;  %v11954_v47 = vld [vmem:[#allocation2 + $0x18] sm:$0xff] }
0x1797   : > { %11948 = vst.msk [vmem:[#allocation2 + $0x28] sm:$0xff] %vm5787_vm13, %v11930_v36  ;;  %11947 = vst.msk [vmem:[#allocation2 + $0x20] sm:$0xff] %vm5787_vm13, %v11928_v52  ;;  %v14495_v36 = vpack.c.bf16 %v13002_v21, %v13001_v30  ;;  %v13003_v52 = vld [vmem:[%s17572_s2 + $0x108] sm:$0xff] }
0x1799   : > { %14496 = vmatprep.subr.bf16.mxu1 %v14495_v36 }
0x179a   : > { %v11934_v40 = vpop.permute.xlu1 %11933  ;;  %v11932_v39 = vpop.permute.xlu0 %11931  ;;  %v11953_v43 = vld [vmem:[#allocation2 + $0x10] sm:$0xff]  ;;  %14498 = vmatpush3.bf16.msra.mxu1 %v14495_v36 }
0x179b   : > { %11950 = vst.msk [vmem:[#allocation2 + $0x38] sm:$0xff] %vm5787_vm13, %v11934_v40  ;;  %11949 = vst.msk [vmem:[#allocation2 + $0x30] sm:$0xff] %vm5787_vm13, %v11932_v39  ;;  %14346 = vmatprep.mubr.msk.f32.mxu0 %vm390_vm8, %v11953_v43  ;;  %v13004_v40 = vld [vmem:[%s17572_s2 + $0x110] sm:$0xff]  ;;  %v13005_v39 = vld [vmem:[%s17572_s2 + $0x118] sm:$0xff] }
0x179c   : > { %14347 = vmatmul.mubr.msk.f32.gmra.mrb[144].mxu0 %vm390_vm8, %v11954_v47  ;;  %v14499_v43 = vpack.c.bf16 %v13004_v40, %v13003_v52  ;;  %v13006_v47 = vld [vmem:[%s17572_s2 + $0x120] sm:$0xff] }
0x179e   : > { %v11955_v57 = vld [vmem:[#allocation2 + $0x20] sm:$0xff]  ;;  %v11956_v55 = vld [vmem:[#allocation2 + $0x28] sm:$0xff]  ;;  %14500 = vmatprep.subr.bf16.mxu0 %v14499_v43 }
0x179f   : > { %14349 = vmatprep.mubr.msk.f32.mxu0 %vm390_vm8, %v11955_v57  ;;  %v14503_v57 = vpack.c.bf16 %v13006_v47, %v13005_v39  ;;  %14502 = vmatpush3.bf16.msra.mxu0 %v14499_v43 }
0x17a0   : > { %14350 = vmatmul.mubr.msk.f32.gmra.mrb[146].mxu0 %vm390_vm8, %v11956_v55  ;;  %v13007_v55 = vld [vmem:[%s17572_s2 + $0x128] sm:$0xff] }
0x17a1   : > { %14504 = vmatprep.subr.bf16.mxu0 %v14503_v57 }
0x17a2   : > { %v11957_v59 = vld [vmem:[#allocation2 + $0x30] sm:$0xff]  ;;  %v11958_v62 = vld [vmem:[#allocation2 + $0x38] sm:$0xff] }
0x17a3   : > { %14352 = vmatprep.mubr.msk.f32.mxu0 %vm390_vm8, %v11957_v59  ;;  %v13008_v59 = vld [vmem:[%s17572_s2 + $0x130] sm:$0xff]  ;;  %14506 = vmatpush3.bf16.msra.mxu0 %v14503_v57 }
0x17a4   : > { %14353 = vmatmul.mubr.msk.f32.gmra.mrb[148].mxu0 %vm390_vm8, %v11958_v62  ;;  %v14507_v62 = vpack.c.bf16 %v13008_v59, %v13007_v55 }
0x17a6   : > { %14508 = vmatprep.subr.bf16.mxu0 %v14507_v62 }
0x17a7   : > { %14510 = vmatpush3.bf16.msra.mxu0 %v14507_v62 }
0x1866   : > { %v14345_v0 = vpop.f32.mrb[142].mxu0 }
0x1867   : > { %v12059_v6 = vadd.f32 %v14345_v0, %v13124_v15  ;;  %v12053_v63 = vpop.f32.mrb[143].mxu0 }
0x1868   : > { %v12054_v17 = vadd.f32 %v13124_v15, %v12053_v63 }
0x1869   : > { %v17205_v22 = vadd.f32 %v12059_v6, %v16336_v49 }
0x186a   : > { %v17208_v28 = vadd.f32 %v12054_v17, %v16332_v41 }
0x186b   : > { %v12103_v42 = vsel %vm390_vm8, %v17205_v22, 0.0  ;;  %v12133_v24 = vmul.f32 %v17205_v22, %v17205_v22 }
0x186c   : > { %12104 = vadd.xlane.f32.xlu1 %v12103_v42  ;;  %v12100_v34 = vsel %vm390_vm8, %v17208_v28, 0.0  ;;  %v12132_v41 = vmul.f32 %v17208_v28, %v17208_v28 }
0x186d   : > { %12101 = vadd.xlane.f32.xlu0 %v12100_v34  ;;  %v12143_v49 = vsel %vm390_vm8, %v12133_v24, 0.0 }
0x186e   : > { %v12140_v32 = vsel %vm390_vm8, %v12132_v41, 0.0 }
0x186f   : > { %v14348_v56 = vpop.f32.mrb[144].mxu0 }
0x1870   : > { %v12069_v38 = vadd.f32 %v14348_v56, %v13124_v15  ;;  %v12063_v10 = vpop.f32.mrb[145].mxu0 }
0x1871   : > { %v12064_v58 = vadd.f32 %v13124_v15, %v12063_v10  ;;  %12144 = vadd.xlane.f32.xlu0 %v12143_v49 }
0x1872   : > { %v17223_v4 = vadd.f32 %v12069_v38, %v16349_v27 }
0x1873   : > { %v17220_v1 = vadd.f32 %v12064_v58, %v16345_v25  ;;  %v14351_v46 = vpop.f32.mrb[146].mxu0 }
0x1874   : > { %v12073_v13 = vpop.f32.mrb[147].mxu0  ;;  %v12079_v33 = vadd.f32 %v14351_v46, %v13124_v15  ;;  %v12109_v26 = vsel %vm390_vm8, %v17223_v4, 0.0  ;;  %v12135_v27 = vmul.f32 %v17223_v4, %v17223_v4 }
0x1875   : > { %v12074_v9 = vadd.f32 %v13124_v15, %v12073_v13  ;;  %12141 = vadd.xlane.f32.xlu0 %v12140_v32  ;;  %v12106_v50 = vsel %vm390_vm8, %v17220_v1, 0.0  ;;  %v12134_v61 = vmul.f32 %v17220_v1, %v17220_v1 }
0x1876   : > { %12107 = vadd.xlane.f32.xlu1 %v12106_v50  ;;  %v17239_v5 = vadd.f32 %v12079_v33, %v16362_v48  ;;  %v12149_v35 = vsel %vm390_vm8, %v12135_v27, 0.0 }
0x1877   : > { %v14354_v51 = vpop.f32.mrb[148].mxu0  ;;  %v17235_v18 = vadd.f32 %v12074_v9, %v16359_v44  ;;  %v12146_v53 = vsel %vm390_vm8, %v12134_v61, 0.0 }
0x1878   : > { %v12083_v25 = vpop.f32.mrb[149].mxu0  ;;  %v12089_v44 = vadd.f32 %v14354_v51, %v13124_v15  ;;  %v12115_v60 = vsel %vm390_vm8, %v17239_v5, 0.0  ;;  %v12137_v54 = vmul.f32 %v17239_v5, %v17239_v5 }
0x1879   : > { %12110 = vadd.xlane.f32.xlu0 %v12109_v26  ;;  %v12084_v37 = vadd.f32 %v13124_v15, %v12083_v25  ;;  %v12112_v16 = vsel %vm390_vm8, %v17235_v18, 0.0  ;;  %v12136_v11 = vmul.f32 %v17235_v18, %v17235_v18 }
0x187a   : > { %12147 = vadd.xlane.f32.xlu1 %v12146_v53  ;;  %v17255_v45 = vadd.f32 %v12089_v44, %v16373_v20  ;;  %v12155_v2 = vsel %vm390_vm8, %v12137_v54, 0.0 }
0x187b   : > { %v17251_v48 = vadd.f32 %v12084_v37, %v16371_v14  ;;  %v12152_v19 = vsel %vm390_vm8, %v12136_v11, 0.0 }
0x187c   : > { %v12121_v14 = vsel %vm390_vm8, %v17255_v45, 0.0  ;;  %v12139_v8 = vmul.f32 %v17255_v45, %v17255_v45 }
0x187d   : > { %12150 = vadd.xlane.f32.xlu0 %v12149_v35  ;;  %v12118_v3 = vsel %vm390_vm8, %v17251_v48, 0.0  ;;  %v12138_v7 = vmul.f32 %v17251_v48, %v17251_v48 }
0x187e   : > { %12113 = vadd.xlane.f32.xlu1 %v12112_v16  ;;  %v12161_v23 = vsel %vm390_vm8, %v12139_v8, 0.0 }
0x187f   : > { %v12158_v20 = vsel %vm390_vm8, %v12138_v7, 0.0 }
0x1881   : > { %12116 = vadd.xlane.f32.xlu0 %v12115_v60 }
0x1882   : > { %12153 = vadd.xlane.f32.xlu1 %v12152_v19 }
0x1885   : > { %12156 = vadd.xlane.f32.xlu0 %v12155_v2 }
0x1886   : > { %12119 = vadd.xlane.f32.xlu1 %v12118_v3 }
0x1889   : > { %12122 = vadd.xlane.f32.xlu0 %v12121_v14 }
0x188a   : > { %12159 = vadd.xlane.f32.xlu1 %v12158_v20 }
0x188d   : > { %12162 = vadd.xlane.f32.xlu0 %v12161_v23 }
0x18f9   : > { %v12105_v15 = vpop.xlane.xlu1 %12104 }
0x18fa   : > { %v12102_v0 = vpop.xlane.xlu0 %12101  ;;  %v12125_v6 = vmul.f32 0.03125, %v12105_v15 }
0x18fb   : > { %v12124_v42 = vmul.f32 0.03125, %v12102_v0 }
0x18fc   : > { %v12173_v17 = vmul.f32 %v12125_v6, %v12125_v6  ;;  %v12189_v60 = vsub.f32 %v17205_v22, %v12125_v6 }
0x18fd   : > { %v12172_v38 = vmul.f32 %v12124_v42, %v12124_v42  ;;  %v12188_v8 = vsub.f32 %v17208_v28, %v12124_v42  ;;  %v13134_v28 = vld [vmem:[%s17572_s2 + $0x14b] ss:$0 sm:$0xff] }
0x18fe   : > { %v12145_v63 = vpop.xlane.xlu0 %12144 }
0x18ff   : > { %v12165_v34 = vmul.f32 0.03125, %v12145_v63 }
0x1901   : > { %v12181_v24 = vsub.f32 %v12165_v34, %v12173_v17 }
0x1902   : > { %v12142_v56 = vpop.xlane.xlu0 %12141 }
0x1903   : > { %v12197_v10 = vadd.f32 1e-05, %v12181_v24  ;;  %v12164_v49 = vmul.f32 0.03125, %v12142_v56  ;;  %v12108_v41 = vpop.xlane.xlu1 %12107 }
0x1904   : > { %v12126_v58 = vmul.f32 0.03125, %v12108_v41 }
0x1905   : > { %14870 = vrsqrt.f32 %v12197_v10  ;;  %v12180_v46 = vsub.f32 %v12164_v49, %v12172_v38 }
0x1906   : > { %v12111_v13 = vpop.xlane.xlu0 %12110  ;;  %v12174_v61 = vmul.f32 %v12126_v58, %v12126_v58  ;;  %v12190_v57 = vsub.f32 %v17220_v1, %v12126_v58 }
0x1907   : > { %v12196_v32 = vadd.f32 1e-05, %v12180_v46  ;;  %v17298_v9 = vmul.f32 0.03125, %v12111_v13  ;;  %v12148_v50 = vpop.xlane.xlu1 %12147 }
0x1908   : > { %v12166_v51 = vmul.f32 0.03125, %v12148_v50 }
0x1909   : > { %14872 = vrsqrt.f32 %v12196_v32  ;;  %v12175_v26 = vmul.f32 %v17298_v9, %v17298_v9  ;;  %v12191_v34 = vsub.f32 %v17223_v4, %v17298_v9 }
0x190a   : > { %v12182_v33 = vsub.f32 %v12166_v51, %v12174_v61  ;;  %v12151_v25 = vpop.xlane.xlu0 %12150 }
0x190b   : > { %v12167_v27 = vmul.f32 0.03125, %v12151_v25  ;;  %v12114_v53 = vpop.xlane.xlu1 %12113 }
0x190c   : > { %v12198_v35 = vadd.f32 1e-05, %v12182_v33  ;;  %v17302_v37 = vmul.f32 0.03125, %v12114_v53 }
0x190d   : > { %v12183_v16 = vsub.f32 %v12167_v27, %v12175_v26 }
0x190e   : > { %14874 = vrsqrt.f32 %v12198_v35  ;;  %v12117_v11 = vpop.xlane.xlu0 %12116  ;;  %v12176_v3 = vmul.f32 %v17302_v37, %v17302_v37  ;;  %v12192_v32 = vsub.f32 %v17235_v18, %v17302_v37 }
0x190f   : > { %v14871_v44 = vpop.eup %14870  ;;  %v12199_v54 = vadd.f32 1e-05, %v12183_v16  ;;  %v12129_v19 = vmul.f32 0.03125, %v12117_v11  ;;  %v12154_v2 = vpop.xlane.xlu1 %12153 }
0x1910   : > { %v12168_v7 = vmul.f32 0.03125, %v12154_v2  ;;  %v12213_v14 = vmul.f32 %v14871_v44, %v12189_v60 }
0x1911   : > { %14876 = vrsqrt.f32 %v12199_v54  ;;  %v12177_v22 = vmul.f32 %v12129_v19, %v12129_v19  ;;  %v12193_v33 = vsub.f32 %v17239_v5, %v12129_v19 }
0x1912   : > { %v12184_v20 = vsub.f32 %v12168_v7, %v12176_v3  ;;  %v12157_v23 = vpop.xlane.xlu0 %12156  ;;  %v12225_v39 = vmul.f32 %v17311_v12, %v12213_v14  ;;  %v13010_v3 = vld [vmem:[%s17572_s2 + $0x140] sm:$0xff]  ;;  %v13135_v14 = vld [vmem:[%s17572_s2 + $0x14c] ss:$0 sm:$0xff] }
0x1913   : > { %v14873_v31 = vpop.eup %14872  ;;  %v12169_v29 = vmul.f32 0.03125, %v12157_v23  ;;  %v12120_v30 = vpop.xlane.xlu1 %12119 }
0x1914   : > { %v12200_v21 = vadd.f32 1e-05, %v12184_v20  ;;  %v12130_v36 = vmul.f32 0.03125, %v12120_v30  ;;  %v12212_v52 = vmul.f32 %v14873_v31, %v12188_v8  ;;  %v17321_v17 = vadd.f32 %v13134_v28, %v12225_v39 }
0x1915   : > { %v12185_v40 = vsub.f32 %v12169_v29, %v12177_v22 }
0x1916   : > { %14878 = vrsqrt.f32 %v12200_v21  ;;  %v12123_v43 = vpop.xlane.xlu0 %12122  ;;  %v12224_v47 = vmul.f32 %v17311_v12, %v12212_v52  ;;  %v12178_v0 = vmul.f32 %v12130_v36, %v12130_v36  ;;  %v12194_v35 = vsub.f32 %v17251_v48, %v12130_v36 }
0x1917   : > { %v12201_v55 = vadd.f32 1e-05, %v12185_v40  ;;  %v12131_v59 = vmul.f32 0.03125, %v12123_v43  ;;  %v12160_v62 = vpop.xlane.xlu1 %12159 }
0x1918   : > { %v14875_v15 = vpop.eup %14874  ;;  %v12170_v6 = vmul.f32 0.03125, %v12160_v62  ;;  %v17319_v63 = vadd.f32 %v13134_v28, %v12224_v47 }
0x1919   : > { %14880 = vrsqrt.f32 %v12201_v55  ;;  %v12214_v42 = vmul.f32 %v14875_v15, %v12190_v57  ;;  %v12179_v38 = vmul.f32 %v12131_v59, %v12131_v59  ;;  %v12195_v11 = vsub.f32 %v17255_v45, %v12131_v59  ;;  %v13009_v45 = vld [vmem:[%s17572_s2 + $0x138] sm:$0xff] }
0x191a   : > { %v12186_v24 = vsub.f32 %v12170_v6, %v12178_v0  ;;  %14363 = vmatprep.mubr.msk.f32.mxu1 %vm390_vm8, %v17319_v63  ;;  %v12163_v1 = vpop.xlane.xlu0 %12162  ;;  %v14511_v7 = vpack.c.bf16 %v13010_v3, %v13009_v45 }
0x191b   : > { %v14877_v56 = vpop.eup %14876  ;;  %v12171_v10 = vmul.f32 0.03125, %v12163_v1  ;;  %14364 = vmatmul.mubr.msk.f32.vlgmr.msra.gmra.mrb[162].mxu1 %vm390_vm8, %v17321_v17  ;;  %v12226_v49 = vmul.f32 %v17311_v12, %v12214_v42 }
0x191c   : > { %v12202_v41 = vadd.f32 1e-05, %v12186_v24  ;;  %v12215_v58 = vmul.f32 %v14877_v56, %v12191_v34  ;;  %14512 = vmatprep.subr.bf16.mxu0 %v14511_v7  ;;  %v13144_v34 = vld [vmem:[%s17572_s2 + $0x14d] ss:$0 sm:$0xff] }
0x191d   : > { %v12187_v46 = vsub.f32 %v12171_v10, %v12179_v38  ;;  %v17330_v13 = vadd.f32 %v13134_v28, %v12226_v49  ;;  %14514 = vmatpush3.bf16.msra.mxu0 %v14511_v7 }
0x191e   : > { %14882 = vrsqrt.f32 %v12202_v41  ;;  %v12227_v4 = vmul.f32 %v17311_v12, %v12215_v58 }
0x191f   : > { %v12203_v9 = vadd.f32 1e-05, %v12187_v46  ;;  %14366 = vmatprep.mubr.msk.f32.mxu1 %vm390_vm8, %v17330_v13 }
0x1920   : > { %v14879_v50 = vpop.eup %14878  ;;  %v17337_v61 = vadd.f32 %v13134_v28, %v12227_v4 }
0x1921   : > { %14884 = vrsqrt.f32 %v12203_v9  ;;  %v12216_v51 = vmul.f32 %v14879_v50, %v12192_v32 }
0x1922   : > { %14367 = vmatmul.mubr.msk.f32.gmra.mrb[164].mxu1 %vm390_vm8, %v17337_v61 }
0x1923   : > { %v14881_v25 = vpop.eup %14880  ;;  %v12228_v26 = vmul.f32 %v17311_v12, %v12216_v51 }
0x1924   : > { %v12217_v27 = vmul.f32 %v14881_v25, %v12193_v33 }
0x1925   : > { %v17343_v53 = vadd.f32 %v13134_v28, %v12228_v26 }
0x1926   : > { %v12229_v18 = vmul.f32 %v17311_v12, %v12217_v27 }
0x1927   : > { %14369 = vmatprep.mubr.msk.f32.mxu1 %vm390_vm8, %v17343_v53 }
0x1928   : > { %v14883_v37 = vpop.eup %14882  ;;  %v17349_v16 = vadd.f32 %v13134_v28, %v12229_v18 }
0x1929   : > { %v12218_v5 = vmul.f32 %v14883_v37, %v12194_v35 }
0x192a   : > { %14370 = vmatmul.mubr.msk.f32.gmra.mrb[166].mxu1 %vm390_vm8, %v17349_v16 }
0x192b   : > { %v14885_v44 = vpop.eup %14884  ;;  %v12230_v60 = vmul.f32 %v17311_v12, %v12218_v5 }
0x192c   : > { %v12219_v54 = vmul.f32 %v14885_v44, %v12195_v11 }
0x192d   : > { %v17355_v19 = vadd.f32 %v13134_v28, %v12230_v60 }
0x192e   : > { %v12231_v48 = vmul.f32 %v17311_v12, %v12219_v54 }
0x192f   : > { %14372 = vmatprep.mubr.msk.f32.mxu1 %vm390_vm8, %v17355_v19 }
0x1930   : > { %v17360_v2 = vadd.f32 %v13134_v28, %v12231_v48 }
0x1932   : > { %14373 = vmatmul.mubr.msk.f32.gmra.mrb[168].mxu1 %vm390_vm8, %v17360_v2 }
0x19ee   : > { %v14365_v8 = vpop.f32.mrb[162].mxu1 }
0x19ef   : > { %v12344_v20 = vadd.f32 %v14365_v8, %v13135_v14  ;;  %v12338_v23 = vpop.f32.mrb[163].mxu1 }
0x19f0   : > { %v12339_v12 = vadd.f32 %v13135_v14, %v12338_v23 }
0x19f1   : > { %v12378_v22 = vmax.f32 %v12344_v20, 0.0 }
0x19f2   : > { %v12377_v31 = vmax.f32 %v12339_v12, 0.0 }
0x19f4   : > { %14391 = vmatprep.mubr.msk.f32.mxu0 %vm6235_vm14, %v12377_v31 }
0x19f5   : > { %v14368_v29 = vpop.f32.mrb[164].mxu1  ;;  %14392 = vmatmul.mubr.msk.f32.vlgmr.msra.gmra.mrb[150].mxu0 %vm6235_vm14, %v12378_v22 }
0x19f6   : > { %v12354_v30 = vadd.f32 %v14368_v29, %v13135_v14  ;;  %v12348_v21 = vpop.f32.mrb[165].mxu1 }
0x19f7   : > { %v12349_v36 = vadd.f32 %v13135_v14, %v12348_v21 }
0x19f8   : > { %v12380_v40 = vmax.f32 %v12354_v30, 0.0 }
0x19f9   : > { %v12379_v52 = vmax.f32 %v12349_v36, 0.0 }
0x19fb   : > { %14394 = vmatprep.mubr.msk.f32.mxu0 %vm6235_vm14, %v12379_v52 }
0x19fc   : > { %14395 = vmatmul.mubr.msk.f32.gmra.mrb[152].mxu0 %vm6235_vm14, %v12380_v40 }
0x19fd   : > { %v14371_v39 = vpop.f32.mrb[166].mxu1 }
0x19fe   : > { %v12364_v43 = vadd.f32 %v14371_v39, %v13135_v14  ;;  %v12358_v28 = vpop.f32.mrb[167].mxu1 }
0x19ff   : > { %v12359_v47 = vadd.f32 %v13135_v14, %v12358_v28 }
0x1a00   : > { %v12382_v55 = vmax.f32 %v12364_v43, 0.0 }
0x1a01   : > { %v12381_v57 = vmax.f32 %v12359_v47, 0.0 }
0x1a03   : > { %14397 = vmatprep.mubr.msk.f32.mxu0 %vm6235_vm14, %v12381_v57 }
0x1a04   : > { %14398 = vmatmul.mubr.msk.f32.gmra.mrb[154].mxu0 %vm6235_vm14, %v12382_v55 }
0x1a05   : > { %v14374_v59 = vpop.f32.mrb[168].mxu1 }
0x1a06   : > { %v12374_v62 = vadd.f32 %v14374_v59, %v13135_v14  ;;  %v12368_v15 = vpop.f32.mrb[169].mxu1 }
0x1a07   : > { %v12369_v0 = vadd.f32 %v13135_v14, %v12368_v15 }
0x1a08   : > { %v12384_v42 = vmax.f32 %v12374_v62, 0.0 }
0x1a09   : > { %v12383_v6 = vmax.f32 %v12369_v0, 0.0 }
0x1a0b   : > { %14400 = vmatprep.mubr.msk.f32.mxu0 %vm6235_vm14, %v12383_v6 }
0x1a0c   : > { %14401 = vmatmul.mubr.msk.f32.gmra.mrb[156].mxu0 %vm6235_vm14, %v12384_v42 }
0x1ac8   : > { %v14393_v24 = vpop.f32.mrb[150].mxu0 }
0x1ac9   : > { %v12485_v1 = vadd.f32 %v14393_v24, %v13144_v34  ;;  %v12479_v56 = vpop.f32.mrb[151].mxu0 }
0x1aca   : > { %v12480_v38 = vadd.f32 %v13144_v34, %v12479_v56 }
0x1acb   : > { %v17385_v10 = vadd.f32 %v12485_v1, %v17321_v17 }
0x1acc   : > { %v17388_v49 = vadd.f32 %v12480_v38, %v17319_v63 }
0x1acd   : > { %v12529_v41 = vsel %vm390_vm8, %v17385_v10, 0.0  ;;  %v12559_v58 = vmul.f32 %v17385_v10, %v17385_v10 }
0x1ace   : > { %12530 = vadd.xlane.f32.xlu0 %v12529_v41  ;;  %v12526_v46 = vsel %vm390_vm8, %v17388_v49, 0.0  ;;  %v12558_v4 = vmul.f32 %v17388_v49, %v17388_v49 }
0x1acf   : > { %12527 = vadd.xlane.f32.xlu1 %v12526_v46  ;;  %v14396_v32 = vpop.f32.mrb[152].mxu0  ;;  %v12569_v63 = vsel %vm390_vm8, %v12559_v58, 0.0 }
0x1ad0   : > { %v12495_v17 = vadd.f32 %v14396_v32, %v13144_v34  ;;  %v12489_v9 = vpop.f32.mrb[153].mxu0  ;;  %v12566_v33 = vsel %vm390_vm8, %v12558_v4, 0.0 }
0x1ad1   : > { %v12490_v50 = vadd.f32 %v13144_v34, %v12489_v9 }
0x1ad2   : > { %v17400_v51 = vadd.f32 %v12495_v17, %v17337_v61  ;;  %12570 = vadd.xlane.f32.xlu0 %v12569_v63 }
0x1ad3   : > { %v17404_v25 = vadd.f32 %v12490_v50, %v17330_v13  ;;  %12567 = vadd.xlane.f32.xlu1 %v12566_v33 }
0x1ad4   : > { %v12535_v26 = vsel %vm390_vm8, %v17400_v51, 0.0  ;;  %v12561_v18 = vmul.f32 %v17400_v51, %v17400_v51 }
0x1ad5   : > { %v12532_v27 = vsel %vm390_vm8, %v17404_v25, 0.0  ;;  %v12560_v13 = vmul.f32 %v17404_v25, %v17404_v25 }
0x1ad6   : > { %12536 = vadd.xlane.f32.xlu0 %v12535_v26  ;;  %v12575_v11 = vsel %vm390_vm8, %v12561_v18, 0.0 }
0x1ad7   : > { %12533 = vadd.xlane.f32.xlu1 %v12532_v27  ;;  %v14399_v61 = vpop.f32.mrb[154].mxu0  ;;  %v12572_v48 = vsel %vm390_vm8, %v12560_v13, 0.0 }
0x1ad8   : > { %v12505_v35 = vadd.f32 %v14399_v61, %v13144_v34  ;;  %v12499_v37 = vpop.f32.mrb[155].mxu0 }
0x1ad9   : > { %v12500_v5 = vadd.f32 %v13144_v34, %v12499_v37  ;;  %v17461_v37 = vld [vmem:[%s17572_s2 + $0x14e] ss:$0 sm:$0xff] }
0x1ada   : > { %v17416_v44 = vadd.f32 %v12505_v35, %v17349_v16  ;;  %12576 = vadd.xlane.f32.xlu0 %v12575_v11 }
0x1adb   : > { %v17419_v60 = vadd.f32 %v12500_v5, %v17343_v53 }
0x1adc   : > { %v12541_v54 = vsel %vm390_vm8, %v17416_v44, 0.0  ;;  %v12563_v45 = vmul.f32 %v17416_v44, %v17416_v44 }
0x1add   : > { %12542 = vadd.xlane.f32.xlu1 %v12541_v54  ;;  %v12538_v16 = vsel %vm390_vm8, %v17419_v60, 0.0  ;;  %v12562_v20 = vmul.f32 %v17419_v60, %v17419_v60 }
0x1ade   : > { %12573 = vadd.xlane.f32.xlu0 %v12572_v48  ;;  %v12581_v53 = vsel %vm390_vm8, %v12563_v45, 0.0 }
0x1adf   : > { %v14402_v3 = vpop.f32.mrb[156].mxu0  ;;  %v12578_v22 = vsel %vm390_vm8, %v12562_v20, 0.0 }
0x1ae0   : > { %v12515_v7 = vadd.f32 %v14402_v3, %v13144_v34  ;;  %v12509_v14 = vpop.f32.mrb[157].mxu0 }
0x1ae1   : > { %v12510_v8 = vadd.f32 %v13144_v34, %v12509_v14  ;;  %12539 = vadd.xlane.f32.xlu1 %v12538_v16 }
0x1ae2   : > { %v17432_v23 = vadd.f32 %v12515_v7, %v17360_v2  ;;  %12582 = vadd.xlane.f32.xlu0 %v12581_v53 }
0x1ae3   : > { %v17435_v12 = vadd.f32 %v12510_v8, %v17355_v19 }
0x1ae4   : > { %v12547_v31 = vsel %vm390_vm8, %v17432_v23, 0.0  ;;  %v12565_v29 = vmul.f32 %v17432_v23, %v17432_v23 }
0x1ae5   : > { %12548 = vadd.xlane.f32.xlu1 %v12547_v31  ;;  %v12544_v30 = vsel %vm390_vm8, %v17435_v12, 0.0  ;;  %v12564_v2 = vmul.f32 %v17435_v12, %v17435_v12 }
0x1ae6   : > { %12579 = vadd.xlane.f32.xlu0 %v12578_v22  ;;  %v12587_v19 = vsel %vm390_vm8, %v12565_v29, 0.0 }
0x1ae7   : > { %v12584_v21 = vsel %vm390_vm8, %v12564_v2, 0.0 }
0x1ae9   : > { %12545 = vadd.xlane.f32.xlu1 %v12544_v30 }
0x1aea   : > { %12588 = vadd.xlane.f32.xlu0 %v12587_v19 }
0x1aed   : > { %12585 = vadd.xlane.f32.xlu1 %v12584_v21 }
0x1b5b   : > { %v12531_v36 = vpop.xlane.xlu0 %12530 }
0x1b5c   : > { %v12551_v52 = vmul.f32 0.03125, %v12531_v36  ;;  %v12528_v40 = vpop.xlane.xlu1 %12527 }
0x1b5d   : > { %v12550_v39 = vmul.f32 0.03125, %v12528_v40 }
0x1b5e   : > { %v12599_v28 = vmul.f32 %v12551_v52, %v12551_v52  ;;  %v12615_v26 = vsub.f32 %v17385_v10, %v12551_v52  ;;  %v17468_v10 = vld [vmem:[%s17572_s2 + $0x14f] ss:$0 sm:$0xff] }
0x1b5f   : > { %v12571_v43 = vpop.xlane.xlu0 %12570  ;;  %v12598_v55 = vmul.f32 %v12550_v39, %v12550_v39  ;;  %v12614_v35 = vsub.f32 %v17388_v49, %v12550_v39 }
0x1b60   : > { %v12591_v47 = vmul.f32 0.03125, %v12571_v43  ;;  %v12568_v57 = vpop.xlane.xlu1 %12567 }
0x1b61   : > { %v12590_v59 = vmul.f32 0.03125, %v12568_v57 }
0x1b62   : > { %v12607_v62 = vsub.f32 %v12591_v47, %v12599_v28 }
0x1b63   : > { %v12606_v15 = vsub.f32 %v12590_v59, %v12598_v55  ;;  %v12537_v0 = vpop.xlane.xlu0 %12536 }
0x1b64   : > { %v12623_v6 = vadd.f32 1e-05, %v12607_v62  ;;  %v12553_v42 = vmul.f32 0.03125, %v12537_v0  ;;  %v12534_v24 = vpop.xlane.xlu1 %12533 }
0x1b65   : > { %v12622_v34 = vadd.f32 1e-05, %v12606_v15  ;;  %v17448_v38 = vmul.f32 0.03125, %v12534_v24 }
0x1b66   : > { %14886 = vrsqrt.f32 %v12623_v6  ;;  %v12601_v56 = vmul.f32 %v12553_v42, %v12553_v42  ;;  %v12617_v19 = vsub.f32 %v17400_v51, %v12553_v42 }
0x1b67   : > { %14888 = vrsqrt.f32 %v12622_v34  ;;  %v12577_v1 = vpop.xlane.xlu0 %12576  ;;  %v12600_v32 = vmul.f32 %v17448_v38, %v17448_v38  ;;  %v12616_v55 = vsub.f32 %v17404_v25, %v17448_v38 }
0x1b68   : > { %v12593_v41 = vmul.f32 0.03125, %v12577_v1 }
0x1b6a   : > { %v12609_v58 = vsub.f32 %v12593_v41, %v12601_v56  ;;  %v12543_v46 = vpop.xlane.xlu1 %12542 }
0x1b6b   : > { %v12574_v4 = vpop.xlane.xlu0 %12573  ;;  %v17452_v9 = vmul.f32 0.03125, %v12543_v46 }
0x1b6c   : > { %v12625_v17 = vadd.f32 1e-05, %v12609_v58  ;;  %v12592_v50 = vmul.f32 0.03125, %v12574_v4 }
0x1b6d   : > { %v12603_v5 = vmul.f32 %v17452_v9, %v17452_v9  ;;  %v12619_v25 = vsub.f32 %v17416_v44, %v17452_v9 }
0x1b6e   : > { %14890 = vrsqrt.f32 %v12625_v17  ;;  %v12608_v63 = vsub.f32 %v12592_v50, %v12600_v32  ;;  %v12540_v33 = vpop.xlane.xlu1 %12539 }
0x1b6f   : > { %v17455_v27 = vmul.f32 0.03125, %v12540_v33  ;;  %v12583_v18 = vpop.xlane.xlu0 %12582 }
0x1b70   : > { %v14887_v61 = vpop.eup %14886  ;;  %v12624_v11 = vadd.f32 1e-05, %v12608_v63  ;;  %v12595_v13 = vmul.f32 0.03125, %v12583_v18 }
0x1b71   : > { %v14889_v54 = vpop.eup %14888  ;;  %v12639_v48 = vmul.f32 %v14887_v61, %v12615_v26  ;;  %v12602_v14 = vmul.f32 %v17455_v27, %v17455_v27  ;;  %v12618_v44 = vsub.f32 %v17419_v60, %v17455_v27 }
0x1b72   : > { %v12638_v45 = vmul.f32 %v14889_v54, %v12614_v35  ;;  %14892 = vrsqrt.f32 %v12624_v11  ;;  %v12611_v49 = vsub.f32 %v12595_v13, %v12603_v5  ;;  %v12549_v3 = vpop.xlane.xlu1 %12548 }
0x1b73   : > { %v12651_v7 = vmul.f32 %v17461_v37, %v12639_v48  ;;  %v12580_v16 = vpop.xlane.xlu0 %12579  ;;  %v17474_v20 = vmul.f32 0.03125, %v12549_v3 }
0x1b74   : > { %v12650_v8 = vmul.f32 %v17461_v37, %v12638_v45  ;;  %v12627_v53 = vadd.f32 1e-05, %v12611_v49  ;;  %v12594_v31 = vmul.f32 0.03125, %v12580_v16 }
0x1b75   : > { %v12663_v22 = vadd.f32 %v17468_v10, %v12651_v7  ;;  %v12605_v39 = vmul.f32 %v17474_v20, %v17474_v20  ;;  %v12621_v49 = vsub.f32 %v17432_v23, %v17474_v20 }
0x1b76   : > { %v12662_v29 = vadd.f32 %v17468_v10, %v12650_v8  ;;  %14894 = vrsqrt.f32 %v12627_v53  ;;  %v12610_v30 = vsub.f32 %v12594_v31, %v12602_v14  ;;  %v12546_v2 = vpop.xlane.xlu1 %12545 }
0x1b77   : > { %v17479_v21 = vmul.f32 0.03125, %v12546_v2  ;;  %v12589_v36 = vpop.xlane.xlu0 %12588  ;;  %v12677_v40 = vsel %vm390_vm8, %v12663_v22, 0.0 }
0x1b78   : > { %v14891_v52 = vpop.eup %14890  ;;  %v12626_v43 = vadd.f32 1e-05, %v12610_v30  ;;  %v12597_v28 = vmul.f32 0.03125, %v12589_v36  ;;  %v12670_v47 = vsel %vm390_vm8, %v12662_v29, 0.0  ;;  %v12678_v62 = vrot.slane %v12677_v40, 4 }
0x1b79   : > { %v12641_v57 = vmul.f32 %v14891_v52, %v12617_v19  ;;  %v12604_v0 = vmul.f32 %v17479_v21, %v17479_v21  ;;  %v12671_v34 = vrot.slane %v12670_v47, 4  ;;  %v12620_v29 = vsub.f32 %v17435_v12, %v17479_v21 }
0x1b7a   : > { %14896 = vrsqrt.f32 %v12626_v43  ;;  %v12613_v59 = vsub.f32 %v12597_v28, %v12605_v39  ;;  %v12586_v51 = vpop.xlane.xlu1 %12585  ;;  %v12679_v38 = vadd.f32 %v12678_v62, %v12677_v40 }
0x1b7b   : > { %v12653_v15 = vmul.f32 %v17461_v37, %v12641_v57  ;;  %v12596_v6 = vmul.f32 0.03125, %v12586_v51  ;;  %v12672_v17 = vadd.f32 %v12671_v34, %v12670_v47 }
0x1b7c   : > { %v14893_v42 = vpop.eup %14892  ;;  %v12629_v24 = vadd.f32 1e-05, %v12613_v59  ;;  %v12680_v26 = vrot.slane %v12679_v38, 2 }
0x1b7d   : > { %v12665_v1 = vadd.f32 %v17468_v10, %v12653_v15  ;;  %v12640_v56 = vmul.f32 %v14893_v42, %v12616_v55  ;;  %v12612_v41 = vsub.f32 %v12596_v6, %v12604_v0  ;;  %v12673_v35 = vrot.slane %v12672_v17, 2 }
0x1b7e   : > { %14898 = vrsqrt.f32 %v12629_v24  ;;  %v12681_v45 = vadd.f32 %v12680_v26, %v12679_v38 }
0x1b7f   : > { %v12691_v58 = vsel %vm390_vm8, %v12665_v1, 0.0  ;;  %v12652_v46 = vmul.f32 %v17461_v37, %v12640_v56  ;;  %v12628_v4 = vadd.f32 1e-05, %v12612_v41  ;;  %v12674_v60 = vadd.f32 %v12673_v35, %v12672_v17 }
0x1b80   : > { %v14895_v32 = vpop.eup %14894  ;;  %v12692_v50 = vrot.slane %v12691_v58, 4  ;;  %v12682_v19 = vrot.slane %v12681_v45, 1 }
0x1b81   : > { %v12664_v63 = vadd.f32 %v17468_v10, %v12652_v46  ;;  %v12643_v33 = vmul.f32 %v14895_v32, %v12619_v25  ;;  %14900 = vrsqrt.f32 %v12628_v4  ;;  %v12675_v36 = vrot.slane %v12674_v60, 1 }
0x1b82   : > { %v12693_v11 = vadd.f32 %v12692_v50, %v12691_v58  ;;  %v12683_v59 = vadd.f32 %v12682_v19, %v12681_v45 }
0x1b83   : > { %v12684_v18 = vsel %vm390_vm8, %v12664_v63, 0.0  ;;  %v12655_v9 = vmul.f32 %v17461_v37, %v12643_v33  ;;  %v12676_v51 = vadd.f32 %v12675_v36, %v12674_v60 }
0x1b84   : > { %v14897_v61 = vpop.eup %14896  ;;  %v12685_v5 = vrot.slane %v12684_v18, 4  ;;  %v12694_v8 = vrot.slane %v12693_v11, 2  ;;  %v12728_v38 = vmul.f32 0.125, %v12683_v59 }
0x1b85   : > { %v12667_v13 = vadd.f32 %v17468_v10, %v12655_v9  ;;  %v12642_v54 = vmul.f32 %v14897_v61, %v12618_v44  ;;  %v12727_v25 = vmul.f32 0.125, %v12676_v51 }
0x1b86   : > { %v12686_v48 = vadd.f32 %v12685_v5, %v12684_v18  ;;  %v12695_v28 = vadd.f32 %v12694_v8, %v12693_v11 }
0x1b87   : > { %v12654_v3 = vmul.f32 %v17461_v37, %v12642_v54  ;;  %v12705_v7 = vsel %vm390_vm8, %v12667_v13, 0.0  ;;  %v12744_v33 = vsel %vm12743_vm15, %v12728_v38, %v12727_v25 }
0x1b88   : > { %v14899_v14 = vpop.eup %14898  ;;  %v12687_v27 = vrot.slane %v12686_v48, 2  ;;  %v12706_v16 = vrot.slane %v12705_v7, 4  ;;  %v12696_v6 = vrot.slane %v12695_v28, 1 }
0x1b89   : > { %v12666_v53 = vadd.f32 %v17468_v10, %v12654_v3  ;;  %v12645_v31 = vmul.f32 %v14899_v14, %v12621_v49 }
0x1b8a   : > { %v12688_v22 = vadd.f32 %v12687_v27, %v12686_v48  ;;  %v12707_v30 = vadd.f32 %v12706_v16, %v12705_v7 }
0x1b8b   : > { %v14901_v2 = vpop.eup %14900  ;;  %v12698_v23 = vsel %vm390_vm8, %v12666_v53, 0.0  ;;  %v12657_v20 = vmul.f32 %v17461_v37, %v12645_v31 }
0x1b8c   : > { %v12699_v52 = vrot.slane %v12698_v23, 4  ;;  %v12644_v40 = vmul.f32 %v14901_v2, %v12620_v29  ;;  %v12689_v43 = vrot.slane %v12688_v22, 1  ;;  %v12708_v55 = vrot.slane %v12707_v30, 2 }
0x1b8d   : > { %v12669_v39 = vadd.f32 %v17468_v10, %v12657_v20 }
0x1b8e   : > { %v12656_v47 = vmul.f32 %v17461_v37, %v12644_v40  ;;  %v12700_v57 = vadd.f32 %v12699_v52, %v12698_v23  ;;  %v12690_v0 = vadd.f32 %v12689_v43, %v12688_v22  ;;  %v12709_v34 = vadd.f32 %v12708_v55, %v12707_v30 }
0x1b8f   : > { %v12719_v12 = vsel %vm390_vm8, %v12669_v39, 0.0 }
0x1b90   : > { %v12668_v21 = vadd.f32 %v17468_v10, %v12656_v47  ;;  %v12701_v62 = vrot.slane %v12700_v57, 2  ;;  %v12720_v15 = vrot.slane %v12719_v12, 4  ;;  %v12729_v46 = vmul.f32 0.125, %v12690_v0 }
0x1b91   : > { %v12697_v10 = vadd.f32 %v12696_v6, %v12695_v28  ;;  %v12710_v32 = vrot.slane %v12709_v34, 1 }
0x1b92   : > { %v12702_v42 = vadd.f32 %v12701_v62, %v12700_v57  ;;  %v12712_v24 = vsel %vm390_vm8, %v12668_v21, 0.0  ;;  %v12721_v1 = vadd.f32 %v12720_v15, %v12719_v12  ;;  %v12746_v44 = vsel %vm12745_vm0, %v12729_v46, %v12744_v33 }
0x1b93   : > { %v12713_v37 = vrot.slane %v12712_v24, 4  ;;  %v12711_v9 = vadd.f32 %v12710_v32, %v12709_v34  ;;  %v12730_v61 = vmul.f32 0.125, %v12697_v10 }
0x1b94   : > { %v12703_v56 = vrot.slane %v12702_v42, 1  ;;  %v12722_v41 = vrot.slane %v12721_v1, 2 }
0x1b95   : > { %v12714_v58 = vadd.f32 %v12713_v37, %v12712_v24  ;;  %v12748_v11 = vsel %vm12747_vm1, %v12730_v61, %v12746_v44  ;;  %v12732_v48 = vmul.f32 0.125, %v12711_v9 }
0x1b96   : > { %v12704_v4 = vadd.f32 %v12703_v56, %v12702_v42  ;;  %v12723_v17 = vadd.f32 %v12722_v41, %v12721_v1 }
0x1b97   : > { %v12715_v50 = vrot.slane %v12714_v58, 2 }
0x1b98   : > { %v12724_v63 = vrot.slane %v12723_v17, 1  ;;  %v12731_v18 = vmul.f32 0.125, %v12704_v4 }
0x1b99   : > { %v12716_v26 = vadd.f32 %v12715_v50, %v12714_v58 }
0x1b9a   : > { %v12725_v5 = vadd.f32 %v12724_v63, %v12723_v17  ;;  %v12750_v54 = vsel %vm12749_vm2, %v12731_v18, %v12748_v11 }
0x1b9b   : > { %v12717_v35 = vrot.slane %v12716_v26, 1  ;;  %v12752_v3 = vsel %vm12751_vm3, %v12732_v48, %v12750_v54 }
0x1b9c   : > { %v12734_v49 = vmul.f32 0.125, %v12725_v5 }
0x1b9d   : > { %v12718_v13 = vadd.f32 %v12717_v35, %v12716_v26 }
0x1b9f   : > { %v12733_v45 = vmul.f32 0.125, %v12718_v13 }
0x1ba1   : > { %v12754_v7 = vsel %vm12753_vm4, %v12733_v45, %v12752_v3 }
0x1ba2   : > { %v12756_v14 = vsel %vm12755_vm5, %v12734_v49, %v12754_v7 }
0x1ba3   : > { %12758 = vst.msk [vmem:[%s164_s7] sm:$0xff] %vm390_vm8, %v12756_v14 }
0x1ba4   : > { %14915 = shalt.err (!%p14912_p3)
}
0x1ba5   : > { %s14916_s27 = scalar_lea.hbm %s17525_s11, 128  ;;  %s14920_s24 = scalar_lea.hbm %s17573_s3, 256 }
0x1ba6   : > { %p14917_p4 = scmp.ne.s32.totalorder %s17525_s11, %s14916_s27  ;;  %p14921_p9 = scmp.lt.u32.totalorder %s17525_s11, %s17573_s3 }
0x1ba7   : > { %p14922_p10 = scmp.lt.u32.totalorder %s14920_s24, %s14916_s27  ;;  %p14924_p12 = scmp.lt.u32.totalorder %s14916_s27, %s17525_s11 }
0x1ba8   : > { %p14918_p7 = pnand %p14917_p4, %p15043_p5 }
0x1ba9   : > { %p14923_p11 = por %p14922_p10, %p14921_p9 }
0x1baa   : > { %p14919_p8 = pneg %p14918_p7 }
0x1bab   : > { %p14925_p13 = por %p14924_p12, %p14923_p11 }
0x1bad   : > { %p14926_p0 = pnand %p14925_p13, %p14919_p8 }
0x1baf   : > { %14929 = shalt.err (!%p14926_p0)
}
0x1bb0   : > { %14523 = dma.vmem_to_hbm [thread:$0]  (%p15043_p5), %s17527_s8, 128, %s17525_s11, %s12760_s16  }
0x1bb1 PF: > { %p14529_p1 = scmp.ge.s32.totalorder %s14964_s15, 2  ;;  %s12785_s5 = sand.u32 1, %s14952_s12  }
0x1bb2   : > { %s12786_s28 = scalar_lea.sflag [#allocation4], %s12785_s5 }
0x1bb3   : > { %p14526_p2 = pnand %p14529_p1, %p15047_p6 }
0x1bb5   : > { %14947 = dma.done.wait (!%p14526_p2), %s12786_s28, 128  }
0x1bb6   : > { %14949 = vsyncadd (!%p14526_p2), %s12786_s28, 4294967168  ;;  %p13_p3 = scmp.ge.s32.totalorder %s15030_s18, 4   ;;  %s17594_s12 = smov %s14956_s13 }
0x1bb7   : > { %s17595_s13 = smov %s14960_s14  ;;  %s17596_s14 = smov %s15041_s21 }
0x1bb8   : > { %s17597_s15 = smov %s15030_s18  ;;  %15 = sbr.rel (!%p13_p3) target bundleno = 3 (0x3), region = 68 }
0x1bbf   :  { %12791 = vsyncpa [#allocation4], 1 }
0x1bc0   :  { %12793 = vsyncpa [#allocation4 + $0x1], 1 }

</bundles_post_ra>
